<compile_context>
chip_gen: v5e
topology: v5e:2x2
jax: 0.10.0
libtpu: 0.0.40
codegen_flags: <defaults>
</compile_context>

<pallas_src>
import functools

import jax
import jax.numpy as jnp
from jax.experimental import pallas as pl
from jax.experimental.pallas import tpu as pltpu

_VMEM_LIMIT_BYTES = 32 * 1024 * 1024  # safe on v5e/v6e (128 MiB) and v7x (64 MiB physical)


def _round_up(a, b):
    return (a + b - 1) // b * b


# ---------------------------------------------------------------------------
# Tiled fused matmul kernel (MXU): out = relu?(x @ w + bias)
# BN scale is folded into w by the callers; bias is the folded BN shift.
# ---------------------------------------------------------------------------

def _matmul_kernel(x_ref, w_ref, b_ref, o_ref, acc_ref, *, relu):
    @pl.when(pl.program_id(2) == 0)
    def _init():
        acc_ref[...] = jnp.zeros_like(acc_ref)

    acc_ref[...] += jnp.dot(x_ref[...], w_ref[...],
                            preferred_element_type=jnp.float32)

    @pl.when(pl.program_id(2) == pl.num_programs(2) - 1)
    def _finalize():
        y = acc_ref[...] + b_ref[...]
        if relu:
            y = jnp.maximum(y, 0.0)
        o_ref[...] = y


def matmul_bias_act(x, w, bias, relu, *, tm=256, tn=256, tk=512):
    """x:(M,K) f32, w:(K,Cout) f32 (scale pre-folded), bias:(Cout,) f32."""
    M, K = x.shape
    Cout = w.shape[1]
    # Per-layer tile sizes: MXU/lane friendly, shrink for small layers.
    tm = min(tm, _round_up(M, 8))
    tk = min(tk, _round_up(K, 128))
    tn = min(tn, _round_up(Cout, 128))
    Mp, Kp, Np = _round_up(M, tm), _round_up(K, tk), _round_up(Cout, tn)

    xb = jnp.pad(x, ((0, Mp - M), (0, Kp - K))).astype(jnp.bfloat16)
    wb = jnp.pad(w, ((0, Kp - K), (0, Np - Cout))).astype(jnp.bfloat16)
    bb = jnp.pad(bias.astype(jnp.float32), (0, Np - Cout)).reshape(1, Np)

    out = pl.pallas_call(
        functools.partial(_matmul_kernel, relu=relu),
        out_shape=jax.ShapeDtypeStruct((Mp, Np), jnp.float32),
        grid=(Mp // tm, Np // tn, Kp // tk),
        in_specs=[
            pl.BlockSpec((tm, tk), lambda i, j, k: (i, k)),
            pl.BlockSpec((tk, tn), lambda i, j, k: (k, j)),
            pl.BlockSpec((1, tn), lambda i, j, k: (0, j)),
        ],
        out_specs=pl.BlockSpec((tm, tn), lambda i, j, k: (i, j)),
        scratch_shapes=[pltpu.VMEM((tm, tn), jnp.float32)],
        compiler_params=pltpu.CompilerParams(
            dimension_semantics=("parallel", "parallel", "arbitrary"),
            vmem_limit_bytes=_VMEM_LIMIT_BYTES),
    )(xb, wb, bb)
    return out[:M, :Cout]


# ---------------------------------------------------------------------------
# Depthwise 3x3 conv + folded BN, and 3x3/s2 max-pool.
# Taps are unit-stride slices taken INSIDE the kernel (no 9x HBM patch tensor).
# For stride 2 the padded plane is pre-decimated into 4 phase planes (1x traffic).
# ---------------------------------------------------------------------------

def _phase_taps(x, stride, pad_value):
    N, H, W, C = x.shape
    Ho = (H - 1) // stride + 1
    Wo = (W - 1) // stride + 1
    if stride == 1:
        xp = jnp.pad(x, ((0, 0), (1, 1), (1, 1), (0, 0)), constant_values=pad_value)
        return xp, Ho, Wo                                   # (N, H+2, W+2, C)
    # stride == 2: pad to even extents, then split into 4 even/odd phase planes.
    eh = (H + 2) % 2
    ew = (W + 2) % 2
    xp = jnp.pad(x, ((0, 0), (1, 1 + eh), (1, 1 + ew), (0, 0)),
                 constant_values=pad_value)
    phases = jnp.stack([xp[:, a::2, b::2, :] for a in (0, 1) for b in (0, 1)],
                       axis=0)                               # (4, N, Hq, Wq, C)
    P, _, Hq, Wq, _ = phases.shape
    return phases.reshape(P * N, Hq, Wq, C), Ho, Wo


def _dwconv_kernel(ph_ref, w_ref, b_ref, o_ref, *, stride, n_batch):
    N, Ho, Wo, C = o_ref.shape
    acc = jnp.zeros((N, Ho, Wo, C), jnp.float32)
    for dh in range(3):
        for dw in range(3):
            p = (dh % stride) * stride + (dw % stride)
            oh, ow = dh // stride, dw // stride
            tap = ph_ref[pl.ds(p * n_batch, n_batch),
                         pl.ds(oh, Ho), pl.ds(ow, Wo), :]
            wt = w_ref[pl.ds(dh * 3 + dw, 1), :, :, :]       # (1,1,1,C)
            acc = acc + tap * wt
    o_ref[...] = acc + b_ref[...]


def dwconv3x3_bn(x, p, stride):
    N, H, W, C = x.shape
    phases, Ho, Wo = _phase_taps(x, stride, 0.0)
    wf = (p['w'] * p['s']).reshape(9, 1, 1, C)               # fold BN scale into taps
    bf = p['b'].reshape(1, 1, 1, C)
    return pl.pallas_call(
        functools.partial(_dwconv_kernel, stride=stride, n_batch=N),
        out_shape=jax.ShapeDtypeStruct((N, Ho, Wo, C), jnp.float32),
        grid=(1,),
        in_specs=[
            pl.BlockSpec(phases.shape, lambda i: (0, 0, 0, 0)),
            pl.BlockSpec((9, 1, 1, C), lambda i: (0, 0, 0, 0)),
            pl.BlockSpec((1, 1, 1, C), lambda i: (0, 0, 0, 0)),
        ],
        out_specs=pl.BlockSpec((N, Ho, Wo, C), lambda i: (0, 0, 0, 0)),
        compiler_params=pltpu.CompilerParams(
            dimension_semantics=("arbitrary",),
            vmem_limit_bytes=_VMEM_LIMIT_BYTES),
    )(phases, wf, bf)


def _maxpool_kernel(ph_ref, o_ref, *, stride, n_batch):
    N, Ho, Wo, C = o_ref.shape
    m = jnp.full((N, Ho, Wo, C), -jnp.inf, jnp.float32)
    for dh in range(3):
        for dw in range(3):
            p = (dh % stride) * stride + (dw % stride)
            oh, ow = dh // stride, dw // stride
            tap = ph_ref[pl.ds(p * n_batch, n_batch),
                         pl.ds(oh, Ho), pl.ds(ow, Wo), :]
            m = jnp.maximum(m, tap)
    o_ref[...] = m


def maxpool3x3_s2(x):
    N, H, W, C = x.shape
    phases, Ho, Wo = _phase_taps(x, 2, -jnp.inf)
    return pl.pallas_call(
        functools.partial(_maxpool_kernel, stride=2, n_batch=N),
        out_shape=jax.ShapeDtypeStruct((N, Ho, Wo, C), jnp.float32),
        grid=(1,),
        in_specs=[pl.BlockSpec(phases.shape, lambda i: (0, 0, 0, 0))],
        out_specs=pl.BlockSpec((N, Ho, Wo, C), lambda i: (0, 0, 0, 0)),
        compiler_params=pltpu.CompilerParams(
            dimension_semantics=("arbitrary",),
            vmem_limit_bytes=_VMEM_LIMIT_BYTES),
    )(phases)


# ---------------------------------------------------------------------------
# Global average pool (single sublane-axis reduction)
# ---------------------------------------------------------------------------

def _avgpool_kernel(x_ref, o_ref, *, inv_hw):
    o_ref[...] = jnp.sum(x_ref[...], axis=1) * inv_hw


def global_avgpool(x):
    N, H, W, C = x.shape
    xs = x.reshape(N, H * W, C)
    return pl.pallas_call(
        functools.partial(_avgpool_kernel, inv_hw=1.0 / (H * W)),
        out_shape=jax.ShapeDtypeStruct((N, C), jnp.float32),
        grid=(1,),
        in_specs=[pl.BlockSpec((N, H * W, C), lambda i: (0, 0, 0))],
        out_specs=pl.BlockSpec((N, C), lambda i: (0, 0)),
        compiler_params=pltpu.CompilerParams(
            dimension_semantics=("arbitrary",),
            vmem_limit_bytes=_VMEM_LIMIT_BYTES),
    )(xs)


# ---------------------------------------------------------------------------
# JAX glue (im2col for conv1, channel shuffle, block plumbing)
# ---------------------------------------------------------------------------

def conv1x1_bn_act(x, p, relu=True):
    N, H, W, C = x.shape
    wf = p['w'] * p['s'][None, :]                           # fold BN scale
    y = matmul_bias_act(x.reshape(N * H * W, C), wf, p['b'], relu)
    return y.reshape(N, H, W, -1)


def conv1_3x3_s2(x, p):
    """Dense 3x3/stride-2 conv via im2col + fused matmul/BN/ReLU kernel."""
    N, H, W, C = x.shape
    Ho = (H - 1) // 2 + 1
    Wo = (W - 1) // 2 + 1
    xp = jnp.pad(x, ((0, 0), (1, 1), (1, 1), (0, 0)))
    cols = []
    for dh in range(3):
        for dw in range(3):
            sl = jax.lax.slice(
                xp, (0, dh, dw, 0),
                (N, dh + 2 * (Ho - 1) + 1, dw + 2 * (Wo - 1) + 1, C),
                (1, 2, 2, 1))
            cols.append(sl.reshape(N * Ho * Wo, C))
    xim = jnp.concatenate(cols, axis=1)                     # (M, 9*C), (dh,dw,cin) order
    wf = p['w'] * p['s'][None, :]
    y = matmul_bias_act(xim, wf, p['b'], relu=True)
    return y.reshape(N, Ho, Wo, -1)


def channel_shuffle(x, groups):
    # TODO(synk): fold this fixed permutation into downstream weights instead.
    N, H, W, C = x.shape
    cpg = C // groups
    x = x.reshape(N, H, W, groups, cpg)
    x = jnp.transpose(x, (0, 1, 2, 4, 3))
    return x.reshape(N, H, W, C)


def branch2_fwd(x, p, stride):
    y = conv1x1_bn_act(x, p['pw1'], relu=True)
    y = dwconv3x3_bn(y, p['dw'], stride)
    y = conv1x1_bn_act(y, p['pw2'], relu=True)
    return y


def branch1_fwd(x, p, stride):
    y = dwconv3x3_bn(x, p['dw'], stride)
    y = conv1x1_bn_act(y, p['pw'], relu=True)
    return y


def inverted_residual_fwd(x, blk):
    stride, benchmodel = blk['stride'], blk['benchmodel']
    if benchmodel == 1:
        c2 = x.shape[-1] // 2
        x1, x2 = x[..., :c2], x[..., c2:]
        out = jnp.concatenate([x1, branch2_fwd(x2, blk['b2'], stride)], axis=-1)
    else:
        out = jnp.concatenate(
            [branch1_fwd(x, blk['b1'], stride), branch2_fwd(x, blk['b2'], stride)],
            axis=-1)
    return channel_shuffle(out, 2)


# ---------------------------------------------------------------------------
# Deterministic parameter initialization (synthetic; matches module's shapes)
# ---------------------------------------------------------------------------

class _KeyGen:
    def __init__(self, key):
        self._key = key

    def __call__(self):
        self._key, sub = jax.random.split(self._key)
        return sub


def _make_bn(kg, c):
    gamma = 1.0 + 0.1 * jax.random.normal(kg(), (c,), jnp.float32)
    beta = 0.1 * jax.random.normal(kg(), (c,), jnp.float32)
    mean = 0.1 * jax.random.normal(kg(), (c,), jnp.float32)
    var = 1.0 + 0.1 * jax.random.uniform(kg(), (c,), jnp.float32)
    scale = gamma / jnp.sqrt(var + 1e-5)
    bias = beta - mean * scale
    return scale, bias


def _make_pw(kg, cin, cout):
    w = 0.1 * jax.random.normal(kg(), (cin, cout), jnp.float32)
    s, b = _make_bn(kg, cout)
    return {'w': w, 's': s, 'b': b}


def _make_dw(kg, c):
    w = 0.1 * jax.random.normal(kg(), (3, 3, c), jnp.float32)
    s, b = _make_bn(kg, c)
    return {'w': w, 's': s, 'b': b}


def _make_conv3x3(kg, cin, cout):
    # stored as (kh, kw, cin, cout) flattened to (9*cin, cout), matching im2col order
    w = 0.1 * jax.random.normal(kg(), (3, 3, cin, cout), jnp.float32)
    s, b = _make_bn(kg, cout)
    return {'w': w.reshape(9 * cin, cout), 's': s, 'b': b}


def init_shufflenet_params(key, n_class=10, width_mult=0.5):
    stage_repeats = [4, 8, 4]
    if width_mult == 0.5:
        stage_out_channels = [-1, 24, 48, 96, 192, 1024]
    elif width_mult == 1.0:
        stage_out_channels = [-1, 24, 116, 232, 464, 1024]
    elif width_mult == 1.5:
        stage_out_channels = [-1, 24, 176, 352, 704, 1024]
    elif width_mult == 2.0:
        stage_out_channels = [-1, 24, 224, 488, 976, 2048]
    else:
        raise ValueError("unsupported width_mult")

    kg = _KeyGen(key)
    params = {}
    input_channel = stage_out_channels[1]
    params['conv1'] = _make_conv3x3(kg, 3, input_channel)

    features = []
    for idxstage in range(len(stage_repeats)):
        numrepeat = stage_repeats[idxstage]
        output_channel = stage_out_channels[idxstage + 2]
        oup_inc = output_channel // 2
        for i in range(numrepeat):
            if i == 0:
                blk = {'stride': 2, 'benchmodel': 2,
                       'b1': {'dw': _make_dw(kg, input_channel),
                              'pw': _make_pw(kg, input_channel, oup_inc)},
                       'b2': {'pw1': _make_pw(kg, input_channel, oup_inc),
                              'dw': _make_dw(kg, oup_inc),
                              'pw2': _make_pw(kg, oup_inc, oup_inc)}}
            else:
                blk = {'stride': 1, 'benchmodel': 1,
                       'b2': {'pw1': _make_pw(kg, oup_inc, oup_inc),
                              'dw': _make_dw(kg, oup_inc),
                              'pw2': _make_pw(kg, oup_inc, oup_inc)}}
            features.append(blk)
            input_channel = output_channel
    params['features'] = features
    params['conv_last'] = _make_pw(kg, input_channel, stage_out_channels[-1])
    params['classifier'] = {
        'w': 0.1 * jax.random.normal(kg(), (stage_out_channels[-1], n_class), jnp.float32),
        'b': 0.1 * jax.random.normal(kg(), (n_class,), jnp.float32),
    }
    return params


# ---------------------------------------------------------------------------
# Full forward (mirrors ShuffleNetV2.forward)
# ---------------------------------------------------------------------------

def shufflenet_v2_forward(x_nchw, params):
    x = jnp.transpose(x_nchw, (0, 2, 3, 1)).astype(jnp.float32)   # NCHW -> NHWC

    y = conv1_3x3_s2(x, params['conv1'])          # conv1 + BN + ReLU (im2col matmul)
    y = maxpool3x3_s2(y)                          # maxpool 3x3 / s2 / pad 1

    for blk in params['features']:                # InvertedResidual stages
        y = inverted_residual_fwd(y, blk)

    y = conv1x1_bn_act(y, params['conv_last'], relu=True)   # conv_last
    pooled = global_avgpool(y)                                # global avg pool

    cls = params['classifier']                                # Linear classifier
    logits = matmul_bias_act(pooled, cls['w'], cls['b'], relu=False)
    return logits


if __name__ == "__main__":
    key = jax.random.PRNGKey(0)
    kp, kx = jax.random.split(key)
    n_class = 10
    input_size = 32          # smallest allowed (input_size % 32 == 0)
    params = init_shufflenet_params(kp, n_class=n_class, width_mult=0.5)
    x = jax.random.normal(kx, (2, 3, input_size, input_size), jnp.float32)  # NCHW

    fwd = jax.jit(lambda inp: shufflenet_v2_forward(inp, params))
    out = jax.block_until_ready(fwd(x))

    assert out.shape == (2, n_class), out.shape
    assert bool(jnp.all(jnp.isfinite(out)))
    print("KERNEL_OK")
</pallas_src>

<mosaic_0001>
module attributes {stable_mosaic.version = 11 : i64} {
  func.func @_matmul_kernel(%arg0: i32, %arg1: i32, %arg2: i32, %arg3: memref<256x128xbf16, #tpu.memory_space<vmem>>, %arg4: memref<128x128xbf16, #tpu.memory_space<vmem>>, %arg5: memref<1x128xf32, #tpu.memory_space<vmem>>, %arg6: memref<256x128xf32, #tpu.memory_space<vmem>>, %arg7: memref<256x128xf32, #tpu.memory_space<vmem>>) attributes {dimension_semantics = [#tpu.dimension_semantics<parallel>, #tpu.dimension_semantics<parallel>, #tpu.dimension_semantics<arbitrary>], iteration_bounds = array<i64: 2, 1, 1>, scalar_prefetch = 0 : i64, scratch_operands = 1 : i64, tpu.core_type = #tpu.core_type<tc>, window_params = [{transform_indices = @transform_0, window_bounds = array<i64: 256, 128>}, {transform_indices = @transform_1, window_bounds = array<i64: 128, 128>}, {transform_indices = @transform_2, window_bounds = array<i64: 1, 128>}, {transform_indices = @transform_3, window_bounds = array<i64: 256, 128>}]} {
    %c0_i32 = arith.constant 0 : i32
    %0 = arith.cmpi eq, %arg2, %c0_i32 : i32
    %1 = arith.extui %0 : i1 to i32
    %c0_i32_0 = arith.constant 0 : i32
    %2 = arith.cmpi ne, %1, %c0_i32_0 : i32
    scf.if %2 {
      %cst_10 = arith.constant 0.000000e+00 : f32
      %12 = vector.broadcast %cst_10 : f32 to vector<256x128xf32>
      %c0_11 = arith.constant 0 : index
      %c0_12 = arith.constant 0 : index
      %13 = vector.load %arg7[%c0_11, %c0_12] : memref<256x128xf32, #tpu.memory_space<vmem>>, vector<256x128xf32>
      tpu.vector_store %arg7[%c0_11, %c0_12], %12 {strides = array<i32>} : memref<256x128xf32, #tpu.memory_space<vmem>>, vector<256x128xf32>,
    } else {
    }
    %c0 = arith.constant 0 : index
    %c0_1 = arith.constant 0 : index
    %3 = vector.load %arg7[%c0, %c0_1] : memref<256x128xf32, #tpu.memory_space<vmem>>, vector<256x128xf32>
    %c0_2 = arith.constant 0 : index
    %c0_3 = arith.constant 0 : index
    %4 = vector.load %arg3[%c0_2, %c0_3] : memref<256x128xbf16, #tpu.memory_space<vmem>>, vector<256x128xbf16>
    %c0_4 = arith.constant 0 : index
    %c0_5 = arith.constant 0 : index
    %5 = vector.load %arg4[%c0_4, %c0_5] : memref<128x128xbf16, #tpu.memory_space<vmem>>, vector<128x128xbf16>
    %cst = arith.constant dense<0.000000e+00> : vector<256x128xf32>
    %6 = tpu.matmul %4, %5, %cst {dimension_numbers = #tpu.dot_dimension_numbers<[1], [0], [0], [1], [0, 0, 1, 1], [], []>} : vector<256x128xbf16>, vector<128x128xbf16>, vector<256x128xf32> -> vector<256x128xf32>
    %7 = arith.addf %3, %6 : vector<256x128xf32>
    %c0_6 = arith.constant 0 : index
    %c0_7 = arith.constant 0 : index
    %8 = vector.load %arg7[%c0_6, %c0_7] : memref<256x128xf32, #tpu.memory_space<vmem>>, vector<256x128xf32>
    tpu.vector_store %arg7[%c0_6, %c0_7], %7 {strides = array<i32>} : memref<256x128xf32, #tpu.memory_space<vmem>>, vector<256x128xf32>,
    %c0_i32_8 = arith.constant 0 : i32
    %9 = arith.cmpi eq, %arg2, %c0_i32_8 : i32
    %10 = arith.extui %9 : i1 to i32
    %c0_i32_9 = arith.constant 0 : i32
    %11 = arith.cmpi ne, %10, %c0_i32_9 : i32
    scf.if %11 {
      %c0_10 = arith.constant 0 : index
      %c0_11 = arith.constant 0 : index
      %12 = vector.load %arg7[%c0_10, %c0_11] : memref<256x128xf32, #tpu.memory_space<vmem>>, vector<256x128xf32>
      %c0_12 = arith.constant 0 : index
      %c0_13 = arith.constant 0 : index
      %13 = vector.load %arg5[%c0_12, %c0_13] : memref<1x128xf32, #tpu.memory_space<vmem>>, vector<1x128xf32>
      %14 = vector.broadcast %13 : vector<1x128xf32> to vector<256x128xf32>
      %15 = arith.addf %12, %14 : vector<256x128xf32>
      %cst_14 = arith.constant 0.000000e+00 : f32
      %16 = vector.broadcast %cst_14 : f32 to vector<256x128xf32>
      %17 = arith.maximumf %15, %16 : vector<256x128xf32>
      %c0_15 = arith.constant 0 : index
      %c0_16 = arith.constant 0 : index
      %18 = vector.load %arg6[%c0_15, %c0_16] : memref<256x128xf32, #tpu.memory_space<vmem>>, vector<256x128xf32>
      tpu.vector_store %arg6[%c0_15, %c0_16], %17 {strides = array<i32>} : memref<256x128xf32, #tpu.memory_space<vmem>>, vector<256x128xf32>,
    } else {
    }
    return
  }
  func.func @transform_0(%arg0: i32, %arg1: i32, %arg2: i32) -> (i32, i32) {
    %c0_i32 = arith.constant 0 : i32
    return %arg0, %arg2 : i32, i32
  }
  func.func @transform_1(%arg0: i32, %arg1: i32, %arg2: i32) -> (i32, i32) {
    %c0_i32 = arith.constant 0 : i32
    return %arg2, %arg1 : i32, i32
  }
  func.func @transform_2(%arg0: i32, %arg1: i32, %arg2: i32) -> (i32, i32) {
    %c0_i32 = arith.constant 0 : i32
    %c0_i32_0 = arith.constant 0 : i32
    return %c0_i32, %arg1 : i32, i32
  }
  func.func @transform_3(%arg0: i32, %arg1: i32, %arg2: i32) -> (i32, i32) {
    %c0_i32 = arith.constant 0 : i32
    return %arg0, %arg1 : i32, i32
  }
}

module attributes {stable_mosaic.version = 11 : i64} {
  func.func @_maxpool_kernel(%arg0: i32, %arg1: memref<8x9x9x24xf32, #tpu.memory_space<vmem>>, %arg2: memref<2x8x8x24xf32, #tpu.memory_space<vmem>>) attributes {dimension_semantics = [#tpu.dimension_semantics<arbitrary>], iteration_bounds = array<i64: 1>, scalar_prefetch = 0 : i64, scratch_operands = 0 : i64, tpu.core_type = #tpu.core_type<tc>, window_params = [{pipeline_mode = #tpu.pipeline_mode<synchronous>, transform_indices = @transform_0, window_bounds = array<i64: 8, 9, 9, 24>}, {pipeline_mode = #tpu.pipeline_mode<synchronous>, transform_indices = @transform_1, window_bounds = array<i64: 2, 8, 8, 24>}]} {
    %cst = arith.constant 0xFF800000 : f32
    %0 = vector.broadcast %cst : f32 to vector<2x8x8x24xf32>
    %c0 = arith.constant 0 : index
    %c0_0 = arith.constant 0 : index
    %c0_1 = arith.constant 0 : index
    %c0_2 = arith.constant 0 : index
    %1 = vector.load %arg1[%c0, %c0_0, %c0_1, %c0_2] : memref<8x9x9x24xf32, #tpu.memory_space<vmem>>, vector<2x8x8x24xf32>
    %2 = arith.maximumf %0, %1 : vector<2x8x8x24xf32>
    %c2 = arith.constant 2 : index
    %c0_3 = arith.constant 0 : index
    %c0_4 = arith.constant 0 : index
    %c0_5 = arith.constant 0 : index
    %3 = vector.load %arg1[%c2, %c0_3, %c0_4, %c0_5] : memref<8x9x9x24xf32, #tpu.memory_space<vmem>>, vector<2x8x8x24xf32>
    %4 = arith.maximumf %2, %3 : vector<2x8x8x24xf32>
    %c0_6 = arith.constant 0 : index
    %c0_7 = arith.constant 0 : index
    %c1 = arith.constant 1 : index
    %c0_8 = arith.constant 0 : index
    %5 = vector.load %arg1[%c0_6, %c0_7, %c1, %c0_8] : memref<8x9x9x24xf32, #tpu.memory_space<vmem>>, vector<2x8x8x24xf32>
    %6 = arith.maximumf %4, %5 : vector<2x8x8x24xf32>
    %c4 = arith.constant 4 : index
    %c0_9 = arith.constant 0 : index
    %c0_10 = arith.constant 0 : index
    %c0_11 = arith.constant 0 : index
    %7 = vector.load %arg1[%c4, %c0_9, %c0_10, %c0_11] : memref<8x9x9x24xf32, #tpu.memory_space<vmem>>, vector<2x8x8x24xf32>
    %8 = arith.maximumf %6, %7 : vector<2x8x8x24xf32>
    %c6 = arith.constant 6 : index
    %c0_12 = arith.constant 0 : index
    %c0_13 = arith.constant 0 : index
    %c0_14 = arith.constant 0 : index
    %9 = vector.load %arg1[%c6, %c0_12, %c0_13, %c0_14] : memref<8x9x9x24xf32, #tpu.memory_space<vmem>>, vector<2x8x8x24xf32>
    %10 = arith.maximumf %8, %9 : vector<2x8x8x24xf32>
    %c4_15 = arith.constant 4 : index
    %c0_16 = arith.constant 0 : index
    %c1_17 = arith.constant 1 : index
    %c0_18 = arith.constant 0 : index
    %11 = vector.load %arg1[%c4_15, %c0_16, %c1_17, %c0_18] : memref<8x9x9x24xf32, #tpu.memory_space<vmem>>, vector<2x8x8x24xf32>
    %12 = arith.maximumf %10, %11 : vector<2x8x8x24xf32>
    %c0_19 = arith.constant 0 : index
    %c1_20 = arith.constant 1 : index
    %c0_21 = arith.constant 0 : index
    %c0_22 = arith.constant 0 : index
    %13 = vector.load %arg1[%c0_19, %c1_20, %c0_21, %c0_22] : memref<8x9x9x24xf32, #tpu.memory_space<vmem>>, vector<2x8x8x24xf32>
    %14 = arith.maximumf %12, %13 : vector<2x8x8x24xf32>
    %c2_23 = arith.constant 2 : index
    %c1_24 = arith.constant 1 : index
    %c0_25 = arith.constant 0 : index
    %c0_26 = arith.constant 0 : index
    %15 = vector.load %arg1[%c2_23, %c1_24, %c0_25, %c0_26] : memref<8x9x9x24xf32, #tpu.memory_space<vmem>>, vector<2x8x8x24xf32>
    %16 = arith.maximumf %14, %15 : vector<2x8x8x24xf32>
    %c0_27 = arith.constant 0 : index
    %c1_28 = arith.constant 1 : index
    %c1_29 = arith.constant 1 : index
    %c0_30 = arith.constant 0 : index
    %17 = vector.load %arg1[%c0_27, %c1_28, %c1_29, %c0_30] : memref<8x9x9x24xf32, #tpu.memory_space<vmem>>, vector<2x8x8x24xf32>
    %18 = arith.maximumf %16, %17 : vector<2x8x8x24xf32>
    %c0_31 = arith.constant 0 : index
    %c0_32 = arith.constant 0 : index
    %c0_33 = arith.constant 0 : index
    %c0_34 = arith.constant 0 : index
    %19 = vector.load %arg2[%c0_31, %c0_32, %c0_33, %c0_34] : memref<2x8x8x24xf32, #tpu.memory_space<vmem>>, vector<2x8x8x24xf32>
    tpu.vector_store %arg2[%c0_31, %c0_32, %c0_33, %c0_34], %18 {strides = array<i32>} : memref<2x8x8x24xf32, #tpu.memory_space<vmem>>, vector<2x8x8x24xf32>,
    return
  }
  func.func @transform_0(%arg0: i32) -> (i32, i32, i32, i32) {
    %c0_i32 = arith.constant 0 : i32
    %c0_i32_0 = arith.constant 0 : i32
    %c0_i32_1 = arith.constant 0 : i32
    %c0_i32_2 = arith.constant 0 : i32
    %c0_i32_3 = arith.constant 0 : i32
    return %c0_i32, %c0_i32_0, %c0_i32_1, %c0_i32_2 : i32, i32, i32, i32
  }
  func.func @transform_1(%arg0: i32) -> (i32, i32, i32, i32) {
    %c0_i32 = arith.constant 0 : i32
    %c0_i32_0 = arith.constant 0 : i32
    %c0_i32_1 = arith.constant 0 : i32
    %c0_i32_2 = arith.constant 0 : i32
    %c0_i32_3 = arith.constant 0 : i32
    return %c0_i32, %c0_i32_0, %c0_i32_1, %c0_i32_2 : i32, i32, i32, i32
  }
}

module attributes {stable_mosaic.version = 11 : i64} {
  func.func @_matmul_kernel(%arg0: i32, %arg1: i32, %arg2: i32, %arg3: memref<128x128xbf16, #tpu.memory_space<vmem>>, %arg4: memref<128x128xbf16, #tpu.memory_space<vmem>>, %arg5: memref<1x128xf32, #tpu.memory_space<vmem>>, %arg6: memref<128x128xf32, #tpu.memory_space<vmem>>, %arg7: memref<128x128xf32, #tpu.memory_space<vmem>>) attributes {dimension_semantics = [#tpu.dimension_semantics<parallel>, #tpu.dimension_semantics<parallel>, #tpu.dimension_semantics<arbitrary>], iteration_bounds = array<i64: 1, 1, 1>, scalar_prefetch = 0 : i64, scratch_operands = 1 : i64, tpu.core_type = #tpu.core_type<tc>, window_params = [{transform_indices = @transform_0, window_bounds = array<i64: 128, 128>}, {transform_indices = @transform_1, window_bounds = array<i64: 128, 128>}, {transform_indices = @transform_2, window_bounds = array<i64: 1, 128>}, {transform_indices = @transform_3, window_bounds = array<i64: 128, 128>}]} {
    %c0_i32 = arith.constant 0 : i32
    %0 = arith.cmpi eq, %arg2, %c0_i32 : i32
    %1 = arith.extui %0 : i1 to i32
    %c0_i32_0 = arith.constant 0 : i32
    %2 = arith.cmpi ne, %1, %c0_i32_0 : i32
    scf.if %2 {
      %cst_10 = arith.constant 0.000000e+00 : f32
      %12 = vector.broadcast %cst_10 : f32 to vector<128x128xf32>
      %c0_11 = arith.constant 0 : index
      %c0_12 = arith.constant 0 : index
      %13 = vector.load %arg7[%c0_11, %c0_12] : memref<128x128xf32, #tpu.memory_space<vmem>>, vector<128x128xf32>
      tpu.vector_store %arg7[%c0_11, %c0_12], %12 {strides = array<i32>} : memref<128x128xf32, #tpu.memory_space<vmem>>, vector<128x128xf32>,
    } else {
    }
    %c0 = arith.constant 0 : index
    %c0_1 = arith.constant 0 : index
    %3 = vector.load %arg7[%c0, %c0_1] : memref<128x128xf32, #tpu.memory_space<vmem>>, vector<128x128xf32>
    %c0_2 = arith.constant 0 : index
    %c0_3 = arith.constant 0 : index
    %4 = vector.load %arg3[%c0_2, %c0_3] : memref<128x128xbf16, #tpu.memory_space<vmem>>, vector<128x128xbf16>
    %c0_4 = arith.constant 0 : index
    %c0_5 = arith.constant 0 : index
    %5 = vector.load %arg4[%c0_4, %c0_5] : memref<128x128xbf16, #tpu.memory_space<vmem>>, vector<128x128xbf16>
    %cst = arith.constant dense<0.000000e+00> : vector<128x128xf32>
    %6 = tpu.matmul %4, %5, %cst {dimension_numbers = #tpu.dot_dimension_numbers<[1], [0], [0], [1], [0, 0, 1, 1], [], []>} : vector<128x128xbf16>, vector<128x128xbf16>, vector<128x128xf32> -> vector<128x128xf32>
    %7 = arith.addf %3, %6 : vector<128x128xf32>
    %c0_6 = arith.constant 0 : index
    %c0_7 = arith.constant 0 : index
    %8 = vector.load %arg7[%c0_6, %c0_7] : memref<128x128xf32, #tpu.memory_space<vmem>>, vector<128x128xf32>
    tpu.vector_store %arg7[%c0_6, %c0_7], %7 {strides = array<i32>} : memref<128x128xf32, #tpu.memory_space<vmem>>, vector<128x128xf32>,
    %c0_i32_8 = arith.constant 0 : i32
    %9 = arith.cmpi eq, %arg2, %c0_i32_8 : i32
    %10 = arith.extui %9 : i1 to i32
    %c0_i32_9 = arith.constant 0 : i32
    %11 = arith.cmpi ne, %10, %c0_i32_9 : i32
    scf.if %11 {
      %c0_10 = arith.constant 0 : index
      %c0_11 = arith.constant 0 : index
      %12 = vector.load %arg7[%c0_10, %c0_11] : memref<128x128xf32, #tpu.memory_space<vmem>>, vector<128x128xf32>
      %c0_12 = arith.constant 0 : index
      %c0_13 = arith.constant 0 : index
      %13 = vector.load %arg5[%c0_12, %c0_13] : memref<1x128xf32, #tpu.memory_space<vmem>>, vector<1x128xf32>
      %14 = vector.broadcast %13 : vector<1x128xf32> to vector<128x128xf32>
      %15 = arith.addf %12, %14 : vector<128x128xf32>
      %cst_14 = arith.constant 0.000000e+00 : f32
      %16 = vector.broadcast %cst_14 : f32 to vector<128x128xf32>
      %17 = arith.maximumf %15, %16 : vector<128x128xf32>
      %c0_15 = arith.constant 0 : index
      %c0_16 = arith.constant 0 : index
      %18 = vector.load %arg6[%c0_15, %c0_16] : memref<128x128xf32, #tpu.memory_space<vmem>>, vector<128x128xf32>
      tpu.vector_store %arg6[%c0_15, %c0_16], %17 {strides = array<i32>} : memref<128x128xf32, #tpu.memory_space<vmem>>, vector<128x128xf32>,
    } else {
    }
    return
  }
  func.func @transform_0(%arg0: i32, %arg1: i32, %arg2: i32) -> (i32, i32) {
    %c0_i32 = arith.constant 0 : i32
    return %arg0, %arg2 : i32, i32
  }
  func.func @transform_1(%arg0: i32, %arg1: i32, %arg2: i32) -> (i32, i32) {
    %c0_i32 = arith.constant 0 : i32
    return %arg2, %arg1 : i32, i32
  }
  func.func @transform_2(%arg0: i32, %arg1: i32, %arg2: i32) -> (i32, i32) {
    %c0_i32 = arith.constant 0 : i32
    %c0_i32_0 = arith.constant 0 : i32
    return %c0_i32, %arg1 : i32, i32
  }
  func.func @transform_3(%arg0: i32, %arg1: i32, %arg2: i32) -> (i32, i32) {
    %c0_i32 = arith.constant 0 : i32
    return %arg0, %arg1 : i32, i32
  }
}

module attributes {stable_mosaic.version = 11 : i64} {
  func.func @_dwconv_kernel(%arg0: i32, %arg1: memref<8x5x5x24xf32, #tpu.memory_space<vmem>>, %arg2: memref<9x1x1x24xf32, #tpu.memory_space<vmem>>, %arg3: memref<1x1x1x24xf32, #tpu.memory_space<vmem>>, %arg4: memref<2x4x4x24xf32, #tpu.memory_space<vmem>>) attributes {dimension_semantics = [#tpu.dimension_semantics<arbitrary>], iteration_bounds = array<i64: 1>, scalar_prefetch = 0 : i64, scratch_operands = 0 : i64, tpu.core_type = #tpu.core_type<tc>, window_params = [{pipeline_mode = #tpu.pipeline_mode<synchronous>, transform_indices = @transform_0, window_bounds = array<i64: 8, 5, 5, 24>}, {pipeline_mode = #tpu.pipeline_mode<synchronous>, transform_indices = @transform_1, window_bounds = array<i64: 9, 1, 1, 24>}, {pipeline_mode = #tpu.pipeline_mode<synchronous>, transform_indices = @transform_2, window_bounds = array<i64: 1, 1, 1, 24>}, {pipeline_mode = #tpu.pipeline_mode<synchronous>, transform_indices = @transform_3, window_bounds = array<i64: 2, 4, 4, 24>}]} {
    %cst = arith.constant 0.000000e+00 : f32
    %0 = vector.broadcast %cst : f32 to vector<2x4x4x24xf32>
    %c0 = arith.constant 0 : index
    %c0_0 = arith.constant 0 : index
    %c0_1 = arith.constant 0 : index
    %c0_2 = arith.constant 0 : index
    %1 = vector.load %arg1[%c0, %c0_0, %c0_1, %c0_2] : memref<8x5x5x24xf32, #tpu.memory_space<vmem>>, vector<2x4x4x24xf32>
    %c0_3 = arith.constant 0 : index
    %c0_4 = arith.constant 0 : index
    %c0_5 = arith.constant 0 : index
    %c0_6 = arith.constant 0 : index
    %2 = vector.load %arg2[%c0_3, %c0_4, %c0_5, %c0_6] : memref<9x1x1x24xf32, #tpu.memory_space<vmem>>, vector<1x1x1x24xf32>
    %3 = vector.broadcast %2 : vector<1x1x1x24xf32> to vector<2x4x4x24xf32>
    %4 = arith.mulf %1, %3 : vector<2x4x4x24xf32>
    %5 = arith.addf %0, %4 : vector<2x4x4x24xf32>
    %c2 = arith.constant 2 : index
    %c0_7 = arith.constant 0 : index
    %c0_8 = arith.constant 0 : index
    %c0_9 = arith.constant 0 : index
    %6 = vector.load %arg1[%c2, %c0_7, %c0_8, %c0_9] : memref<8x5x5x24xf32, #tpu.memory_space<vmem>>, vector<2x4x4x24xf32>
    %c1 = arith.constant 1 : index
    %c0_10 = arith.constant 0 : index
    %c0_11 = arith.constant 0 : index
    %c0_12 = arith.constant 0 : index
    %7 = vector.load %arg2[%c1, %c0_10, %c0_11, %c0_12] : memref<9x1x1x24xf32, #tpu.memory_space<vmem>>, vector<1x1x1x24xf32>
    %8 = vector.broadcast %7 : vector<1x1x1x24xf32> to vector<2x4x4x24xf32>
    %9 = arith.mulf %6, %8 : vector<2x4x4x24xf32>
    %10 = arith.addf %5, %9 : vector<2x4x4x24xf32>
    %c0_13 = arith.constant 0 : index
    %c0_14 = arith.constant 0 : index
    %c1_15 = arith.constant 1 : index
    %c0_16 = arith.constant 0 : index
    %11 = vector.load %arg1[%c0_13, %c0_14, %c1_15, %c0_16] : memref<8x5x5x24xf32, #tpu.memory_space<vmem>>, vector<2x4x4x24xf32>
    %c2_17 = arith.constant 2 : index
    %c0_18 = arith.constant 0 : index
    %c0_19 = arith.constant 0 : index
    %c0_20 = arith.constant 0 : index
    %12 = vector.load %arg2[%c2_17, %c0_18, %c0_19, %c0_20] : memref<9x1x1x24xf32, #tpu.memory_space<vmem>>, vector<1x1x1x24xf32>
    %13 = vector.broadcast %12 : vector<1x1x1x24xf32> to vector<2x4x4x24xf32>
    %14 = arith.mulf %11, %13 : vector<2x4x4x24xf32>
    %15 = arith.addf %10, %14 : vector<2x4x4x24xf32>
    %c4 = arith.constant 4 : index
    %c0_21 = arith.constant 0 : index
    %c0_22 = arith.constant 0 : index
    %c0_23 = arith.constant 0 : index
    %16 = vector.load %arg1[%c4, %c0_21, %c0_22, %c0_23] : memref<8x5x5x24xf32, #tpu.memory_space<vmem>>, vector<2x4x4x24xf32>
    %c3 = arith.constant 3 : index
    %c0_24 = arith.constant 0 : index
    %c0_25 = arith.constant 0 : index
    %c0_26 = arith.constant 0 : index
    %17 = vector.load %arg2[%c3, %c0_24, %c0_25, %c0_26] : memref<9x1x1x24xf32, #tpu.memory_space<vmem>>, vector<1x1x1x24xf32>
    %18 = vector.broadcast %17 : vector<1x1x1x24xf32> to vector<2x4x4x24xf32>
    %19 = arith.mulf %16, %18 : vector<2x4x4x24xf32>
    %20 = arith.addf %15, %19 : vector<2x4x4x24xf32>
    %c6 = arith.constant 6 : index
    %c0_27 = arith.constant 0 : index
    %c0_28 = arith.constant 0 : index
    %c0_29 = arith.constant 0 : index
    %21 = vector.load %arg1[%c6, %c0_27, %c0_28, %c0_29] : memref<8x5x5x24xf32, #tpu.memory_space<vmem>>, vector<2x4x4x24xf32>
    %c4_30 = arith.constant 4 : index
    %c0_31 = arith.constant 0 : index
    %c0_32 = arith.constant 0 : index
    %c0_33 = arith.constant 0 : index
    %22 = vector.load %arg2[%c4_30, %c0_31, %c0_32, %c0_33] : memref<9x1x1x24xf32, #tpu.memory_space<vmem>>, vector<1x1x1x24xf32>
    %23 = vector.broadcast %22 : vector<1x1x1x24xf32> to vector<2x4x4x24xf32>
    %24 = arith.mulf %21, %23 : vector<2x4x4x24xf32>
    %25 = arith.addf %20, %24 : vector<2x4x4x24xf32>
    %c4_34 = arith.constant 4 : index
    %c0_35 = arith.constant 0 : index
    %c1_36 = arith.constant 1 : index
    %c0_37 = arith.constant 0 : index
    %26 = vector.load %arg1[%c4_34, %c0_35, %c1_36, %c0_37] : memref<8x5x5x24xf32, #tpu.memory_space<vmem>>, vector<2x4x4x24xf32>
    %c5 = arith.constant 5 : index
    %c0_38 = arith.constant 0 : index
    %c0_39 = arith.constant 0 : index
    %c0_40 = arith.constant 0 : index
    %27 = vector.load %arg2[%c5, %c0_38, %c0_39, %c0_40] : memref<9x1x1x24xf32, #tpu.memory_space<vmem>>, vector<1x1x1x24xf32>
    %28 = vector.broadcast %27 : vector<1x1x1x24xf32> to vector<2x4x4x24xf32>
    %29 = arith.mulf %26, %28 : vector<2x4x4x24xf32>
    %30 = arith.addf %25, %29 : vector<2x4x4x24xf32>
    %c0_41 = arith.constant 0 : index
    %c1_42 = arith.constant 1 : index
    %c0_43 = arith.constant 0 : index
    %c0_44 = arith.constant 0 : index
    %31 = vector.load %arg1[%c0_41, %c1_42, %c0_43, %c0_44] : memref<8x5x5x24xf32, #tpu.memory_space<vmem>>, vector<2x4x4x24xf32>
    %c6_45 = arith.constant 6 : index
    %c0_46 = arith.constant 0 : index
    %c0_47 = arith.constant 0 : index
    %c0_48 = arith.constant 0 : index
    %32 = vector.load %arg2[%c6_45, %c0_46, %c0_47, %c0_48] : memref<9x1x1x24xf32, #tpu.memory_space<vmem>>, vector<1x1x1x24xf32>
    %33 = vector.broadcast %32 : vector<1x1x1x24xf32> to vector<2x4x4x24xf32>
    %34 = arith.mulf %31, %33 : vector<2x4x4x24xf32>
    %35 = arith.addf %30, %34 : vector<2x4x4x24xf32>
    %c2_49 = arith.constant 2 : index
    %c1_50 = arith.constant 1 : index
    %c0_51 = arith.constant 0 : index
    %c0_52 = arith.constant 0 : index
    %36 = vector.load %arg1[%c2_49, %c1_50, %c0_51, %c0_52] : memref<8x5x5x24xf32, #tpu.memory_space<vmem>>, vector<2x4x4x24xf32>
    %c7 = arith.constant 7 : index
    %c0_53 = arith.constant 0 : index
    %c0_54 = arith.constant 0 : index
    %c0_55 = arith.constant 0 : index
    %37 = vector.load %arg2[%c7, %c0_53, %c0_54, %c0_55] : memref<9x1x1x24xf32, #tpu.memory_space<vmem>>, vector<1x1x1x24xf32>
    %38 = vector.broadcast %37 : vector<1x1x1x24xf32> to vector<2x4x4x24xf32>
    %39 = arith.mulf %36, %38 : vector<2x4x4x24xf32>
    %40 = arith.addf %35, %39 : vector<2x4x4x24xf32>
    %c0_56 = arith.constant 0 : index
    %c1_57 = arith.constant 1 : index
    %c1_58 = arith.constant 1 : index
    %c0_59 = arith.constant 0 : index
    %41 = vector.load %arg1[%c0_56, %c1_57, %c1_58, %c0_59] : memref<8x5x5x24xf32, #tpu.memory_space<vmem>>, vector<2x4x4x24xf32>
    %c8 = arith.constant 8 : index
    %c0_60 = arith.constant 0 : index
    %c0_61 = arith.constant 0 : index
    %c0_62 = arith.constant 0 : index
    %42 = vector.load %arg2[%c8, %c0_60, %c0_61, %c0_62] : memref<9x1x1x24xf32, #tpu.memory_space<vmem>>, vector<1x1x1x24xf32>
    %43 = vector.broadcast %42 : vector<1x1x1x24xf32> to vector<2x4x4x24xf32>
    %44 = arith.mulf %41, %43 : vector<2x4x4x24xf32>
    %45 = arith.addf %40, %44 : vector<2x4x4x24xf32>
    %c0_63 = arith.constant 0 : index
    %c0_64 = arith.constant 0 : index
    %c0_65 = arith.constant 0 : index
    %c0_66 = arith.constant 0 : index
    %46 = vector.load %arg3[%c0_63, %c0_64, %c0_65, %c0_66] : memref<1x1x1x24xf32, #tpu.memory_space<vmem>>, vector<1x1x1x24xf32>
    %47 = vector.broadcast %46 : vector<1x1x1x24xf32> to vector<2x4x4x24xf32>
    %48 = arith.addf %45, %47 : vector<2x4x4x24xf32>
    %c0_67 = arith.constant 0 : index
    %c0_68 = arith.constant 0 : index
    %c0_69 = arith.constant 0 : index
    %c0_70 = arith.constant 0 : index
    %49 = vector.load %arg4[%c0_67, %c0_68, %c0_69, %c0_70] : memref<2x4x4x24xf32, #tpu.memory_space<vmem>>, vector<2x4x4x24xf32>
    tpu.vector_store %arg4[%c0_67, %c0_68, %c0_69, %c0_70], %48 {strides = array<i32>} : memref<2x4x4x24xf32, #tpu.memory_space<vmem>>, vector<2x4x4x24xf32>,
    return
  }
  func.func @transform_0(%arg0: i32) -> (i32, i32, i32, i32) {
    %c0_i32 = arith.constant 0 : i32
    %c0_i32_0 = arith.constant 0 : i32
    %c0_i32_1 = arith.constant 0 : i32
    %c0_i32_2 = arith.constant 0 : i32
    %c0_i32_3 = arith.constant 0 : i32
    return %c0_i32, %c0_i32_0, %c0_i32_1, %c0_i32_2 : i32, i32, i32, i32
  }
  func.func @transform_1(%arg0: i32) -> (i32, i32, i32, i32) {
    %c0_i32 = arith.constant 0 : i32
    %c0_i32_0 = arith.constant 0 : i32
    %c0_i32_1 = arith.constant 0 : i32
    %c0_i32_2 = arith.constant 0 : i32
    %c0_i32_3 = arith.constant 0 : i32
    return %c0_i32, %c0_i32_0, %c0_i32_1, %c0_i32_2 : i32, i32, i32, i32
  }
  func.func @transform_2(%arg0: i32) -> (i32, i32, i32, i32) {
    %c0_i32 = arith.constant 0 : i32
    %c0_i32_0 = arith.constant 0 : i32
    %c0_i32_1 = arith.constant 0 : i32
    %c0_i32_2 = arith.constant 0 : i32
    %c0_i32_3 = arith.constant 0 : i32
    return %c0_i32, %c0_i32_0, %c0_i32_1, %c0_i32_2 : i32, i32, i32, i32
  }
  func.func @transform_3(%arg0: i32) -> (i32, i32, i32, i32) {
    %c0_i32 = arith.constant 0 : i32
    %c0_i32_0 = arith.constant 0 : i32
    %c0_i32_1 = arith.constant 0 : i32
    %c0_i32_2 = arith.constant 0 : i32
    %c0_i32_3 = arith.constant 0 : i32
    return %c0_i32, %c0_i32_0, %c0_i32_1, %c0_i32_2 : i32, i32, i32, i32
  }
}

module attributes {stable_mosaic.version = 11 : i64} {
  func.func @_matmul_kernel(%arg0: i32, %arg1: i32, %arg2: i32, %arg3: memref<32x128xbf16, #tpu.memory_space<vmem>>, %arg4: memref<128x128xbf16, #tpu.memory_space<vmem>>, %arg5: memref<1x128xf32, #tpu.memory_space<vmem>>, %arg6: memref<32x128xf32, #tpu.memory_space<vmem>>, %arg7: memref<32x128xf32, #tpu.memory_space<vmem>>) attributes {dimension_semantics = [#tpu.dimension_semantics<parallel>, #tpu.dimension_semantics<parallel>, #tpu.dimension_semantics<arbitrary>], iteration_bounds = array<i64: 1, 1, 1>, scalar_prefetch = 0 : i64, scratch_operands = 1 : i64, tpu.core_type = #tpu.core_type<tc>, window_params = [{transform_indices = @transform_0, window_bounds = array<i64: 32, 128>}, {transform_indices = @transform_1, window_bounds = array<i64: 128, 128>}, {transform_indices = @transform_2, window_bounds = array<i64: 1, 128>}, {transform_indices = @transform_3, window_bounds = array<i64: 32, 128>}]} {
    %c0_i32 = arith.constant 0 : i32
    %0 = arith.cmpi eq, %arg2, %c0_i32 : i32
    %1 = arith.extui %0 : i1 to i32
    %c0_i32_0 = arith.constant 0 : i32
    %2 = arith.cmpi ne, %1, %c0_i32_0 : i32
    scf.if %2 {
      %cst_10 = arith.constant 0.000000e+00 : f32
      %12 = vector.broadcast %cst_10 : f32 to vector<32x128xf32>
      %c0_11 = arith.constant 0 : index
      %c0_12 = arith.constant 0 : index
      %13 = vector.load %arg7[%c0_11, %c0_12] : memref<32x128xf32, #tpu.memory_space<vmem>>, vector<32x128xf32>
      tpu.vector_store %arg7[%c0_11, %c0_12], %12 {strides = array<i32>} : memref<32x128xf32, #tpu.memory_space<vmem>>, vector<32x128xf32>,
    } else {
    }
    %c0 = arith.constant 0 : index
    %c0_1 = arith.constant 0 : index
    %3 = vector.load %arg7[%c0, %c0_1] : memref<32x128xf32, #tpu.memory_space<vmem>>, vector<32x128xf32>
    %c0_2 = arith.constant 0 : index
    %c0_3 = arith.constant 0 : index
    %4 = vector.load %arg3[%c0_2, %c0_3] : memref<32x128xbf16, #tpu.memory_space<vmem>>, vector<32x128xbf16>
    %c0_4 = arith.constant 0 : index
    %c0_5 = arith.constant 0 : index
    %5 = vector.load %arg4[%c0_4, %c0_5] : memref<128x128xbf16, #tpu.memory_space<vmem>>, vector<128x128xbf16>
    %cst = arith.constant dense<0.000000e+00> : vector<32x128xf32>
    %6 = tpu.matmul %4, %5, %cst {dimension_numbers = #tpu.dot_dimension_numbers<[1], [0], [0], [1], [0, 0, 1, 1], [], []>} : vector<32x128xbf16>, vector<128x128xbf16>, vector<32x128xf32> -> vector<32x128xf32>
    %7 = arith.addf %3, %6 : vector<32x128xf32>
    %c0_6 = arith.constant 0 : index
    %c0_7 = arith.constant 0 : index
    %8 = vector.load %arg7[%c0_6, %c0_7] : memref<32x128xf32, #tpu.memory_space<vmem>>, vector<32x128xf32>
    tpu.vector_store %arg7[%c0_6, %c0_7], %7 {strides = array<i32>} : memref<32x128xf32, #tpu.memory_space<vmem>>, vector<32x128xf32>,
    %c0_i32_8 = arith.constant 0 : i32
    %9 = arith.cmpi eq, %arg2, %c0_i32_8 : i32
    %10 = arith.extui %9 : i1 to i32
    %c0_i32_9 = arith.constant 0 : i32
    %11 = arith.cmpi ne, %10, %c0_i32_9 : i32
    scf.if %11 {
      %c0_10 = arith.constant 0 : index
      %c0_11 = arith.constant 0 : index
      %12 = vector.load %arg7[%c0_10, %c0_11] : memref<32x128xf32, #tpu.memory_space<vmem>>, vector<32x128xf32>
      %c0_12 = arith.constant 0 : index
      %c0_13 = arith.constant 0 : index
      %13 = vector.load %arg5[%c0_12, %c0_13] : memref<1x128xf32, #tpu.memory_space<vmem>>, vector<1x128xf32>
      %14 = vector.broadcast %13 : vector<1x128xf32> to vector<32x128xf32>
      %15 = arith.addf %12, %14 : vector<32x128xf32>
      %cst_14 = arith.constant 0.000000e+00 : f32
      %16 = vector.broadcast %cst_14 : f32 to vector<32x128xf32>
      %17 = arith.maximumf %15, %16 : vector<32x128xf32>
      %c0_15 = arith.constant 0 : index
      %c0_16 = arith.constant 0 : index
      %18 = vector.load %arg6[%c0_15, %c0_16] : memref<32x128xf32, #tpu.memory_space<vmem>>, vector<32x128xf32>
      tpu.vector_store %arg6[%c0_15, %c0_16], %17 {strides = array<i32>} : memref<32x128xf32, #tpu.memory_space<vmem>>, vector<32x128xf32>,
    } else {
    }
    return
  }
  func.func @transform_0(%arg0: i32, %arg1: i32, %arg2: i32) -> (i32, i32) {
    %c0_i32 = arith.constant 0 : i32
    return %arg0, %arg2 : i32, i32
  }
  func.func @transform_1(%arg0: i32, %arg1: i32, %arg2: i32) -> (i32, i32) {
    %c0_i32 = arith.constant 0 : i32
    return %arg2, %arg1 : i32, i32
  }
  func.func @transform_2(%arg0: i32, %arg1: i32, %arg2: i32) -> (i32, i32) {
    %c0_i32 = arith.constant 0 : i32
    %c0_i32_0 = arith.constant 0 : i32
    return %c0_i32, %arg1 : i32, i32
  }
  func.func @transform_3(%arg0: i32, %arg1: i32, %arg2: i32) -> (i32, i32) {
    %c0_i32 = arith.constant 0 : i32
    return %arg0, %arg1 : i32, i32
  }
}

module attributes {stable_mosaic.version = 11 : i64} {
  func.func @_dwconv_kernel(%arg0: i32, %arg1: memref<2x6x6x24xf32, #tpu.memory_space<vmem>>, %arg2: memref<9x1x1x24xf32, #tpu.memory_space<vmem>>, %arg3: memref<1x1x1x24xf32, #tpu.memory_space<vmem>>, %arg4: memref<2x4x4x24xf32, #tpu.memory_space<vmem>>) attributes {dimension_semantics = [#tpu.dimension_semantics<arbitrary>], iteration_bounds = array<i64: 1>, scalar_prefetch = 0 : i64, scratch_operands = 0 : i64, tpu.core_type = #tpu.core_type<tc>, window_params = [{pipeline_mode = #tpu.pipeline_mode<synchronous>, transform_indices = @transform_0, window_bounds = array<i64: 2, 6, 6, 24>}, {pipeline_mode = #tpu.pipeline_mode<synchronous>, transform_indices = @transform_1, window_bounds = array<i64: 9, 1, 1, 24>}, {pipeline_mode = #tpu.pipeline_mode<synchronous>, transform_indices = @transform_2, window_bounds = array<i64: 1, 1, 1, 24>}, {pipeline_mode = #tpu.pipeline_mode<synchronous>, transform_indices = @transform_3, window_bounds = array<i64: 2, 4, 4, 24>}]} {
    %cst = arith.constant 0.000000e+00 : f32
    %0 = vector.broadcast %cst : f32 to vector<2x4x4x24xf32>
    %c0 = arith.constant 0 : index
    %c0_0 = arith.constant 0 : index
    %c0_1 = arith.constant 0 : index
    %c0_2 = arith.constant 0 : index
    %1 = vector.load %arg1[%c0, %c0_0, %c0_1, %c0_2] : memref<2x6x6x24xf32, #tpu.memory_space<vmem>>, vector<2x4x4x24xf32>
    %c0_3 = arith.constant 0 : index
    %c0_4 = arith.constant 0 : index
    %c0_5 = arith.constant 0 : index
    %c0_6 = arith.constant 0 : index
    %2 = vector.load %arg2[%c0_3, %c0_4, %c0_5, %c0_6] : memref<9x1x1x24xf32, #tpu.memory_space<vmem>>, vector<1x1x1x24xf32>
    %3 = vector.broadcast %2 : vector<1x1x1x24xf32> to vector<2x4x4x24xf32>
    %4 = arith.mulf %1, %3 : vector<2x4x4x24xf32>
    %5 = arith.addf %0, %4 : vector<2x4x4x24xf32>
    %c0_7 = arith.constant 0 : index
    %c0_8 = arith.constant 0 : index
    %c1 = arith.constant 1 : index
    %c0_9 = arith.constant 0 : index
    %6 = vector.load %arg1[%c0_7, %c0_8, %c1, %c0_9] : memref<2x6x6x24xf32, #tpu.memory_space<vmem>>, vector<2x4x4x24xf32>
    %c1_10 = arith.constant 1 : index
    %c0_11 = arith.constant 0 : index
    %c0_12 = arith.constant 0 : index
    %c0_13 = arith.constant 0 : index
    %7 = vector.load %arg2[%c1_10, %c0_11, %c0_12, %c0_13] : memref<9x1x1x24xf32, #tpu.memory_space<vmem>>, vector<1x1x1x24xf32>
    %8 = vector.broadcast %7 : vector<1x1x1x24xf32> to vector<2x4x4x24xf32>
    %9 = arith.mulf %6, %8 : vector<2x4x4x24xf32>
    %10 = arith.addf %5, %9 : vector<2x4x4x24xf32>
    %c0_14 = arith.constant 0 : index
    %c0_15 = arith.constant 0 : index
    %c2 = arith.constant 2 : index
    %c0_16 = arith.constant 0 : index
    %11 = vector.load %arg1[%c0_14, %c0_15, %c2, %c0_16] : memref<2x6x6x24xf32, #tpu.memory_space<vmem>>, vector<2x4x4x24xf32>
    %c2_17 = arith.constant 2 : index
    %c0_18 = arith.constant 0 : index
    %c0_19 = arith.constant 0 : index
    %c0_20 = arith.constant 0 : index
    %12 = vector.load %arg2[%c2_17, %c0_18, %c0_19, %c0_20] : memref<9x1x1x24xf32, #tpu.memory_space<vmem>>, vector<1x1x1x24xf32>
    %13 = vector.broadcast %12 : vector<1x1x1x24xf32> to vector<2x4x4x24xf32>
    %14 = arith.mulf %11, %13 : vector<2x4x4x24xf32>
    %15 = arith.addf %10, %14 : vector<2x4x4x24xf32>
    %c0_21 = arith.constant 0 : index
    %c1_22 = arith.constant 1 : index
    %c0_23 = arith.constant 0 : index
    %c0_24 = arith.constant 0 : index
    %16 = vector.load %arg1[%c0_21, %c1_22, %c0_23, %c0_24] : memref<2x6x6x24xf32, #tpu.memory_space<vmem>>, vector<2x4x4x24xf32>
    %c3 = arith.constant 3 : index
    %c0_25 = arith.constant 0 : index
    %c0_26 = arith.constant 0 : index
    %c0_27 = arith.constant 0 : index
    %17 = vector.load %arg2[%c3, %c0_25, %c0_26, %c0_27] : memref<9x1x1x24xf32, #tpu.memory_space<vmem>>, vector<1x1x1x24xf32>
    %18 = vector.broadcast %17 : vector<1x1x1x24xf32> to vector<2x4x4x24xf32>
    %19 = arith.mulf %16, %18 : vector<2x4x4x24xf32>
    %20 = arith.addf %15, %19 : vector<2x4x4x24xf32>
    %c0_28 = arith.constant 0 : index
    %c1_29 = arith.constant 1 : index
    %c1_30 = arith.constant 1 : index
    %c0_31 = arith.constant 0 : index
    %21 = vector.load %arg1[%c0_28, %c1_29, %c1_30, %c0_31] : memref<2x6x6x24xf32, #tpu.memory_space<vmem>>, vector<2x4x4x24xf32>
    %c4 = arith.constant 4 : index
    %c0_32 = arith.constant 0 : index
    %c0_33 = arith.constant 0 : index
    %c0_34 = arith.constant 0 : index
    %22 = vector.load %arg2[%c4, %c0_32, %c0_33, %c0_34] : memref<9x1x1x24xf32, #tpu.memory_space<vmem>>, vector<1x1x1x24xf32>
    %23 = vector.broadcast %22 : vector<1x1x1x24xf32> to vector<2x4x4x24xf32>
    %24 = arith.mulf %21, %23 : vector<2x4x4x24xf32>
    %25 = arith.addf %20, %24 : vector<2x4x4x24xf32>
    %c0_35 = arith.constant 0 : index
    %c1_36 = arith.constant 1 : index
    %c2_37 = arith.constant 2 : index
    %c0_38 = arith.constant 0 : index
    %26 = vector.load %arg1[%c0_35, %c1_36, %c2_37, %c0_38] : memref<2x6x6x24xf32, #tpu.memory_space<vmem>>, vector<2x4x4x24xf32>
    %c5 = arith.constant 5 : index
    %c0_39 = arith.constant 0 : index
    %c0_40 = arith.constant 0 : index
    %c0_41 = arith.constant 0 : index
    %27 = vector.load %arg2[%c5, %c0_39, %c0_40, %c0_41] : memref<9x1x1x24xf32, #tpu.memory_space<vmem>>, vector<1x1x1x24xf32>
    %28 = vector.broadcast %27 : vector<1x1x1x24xf32> to vector<2x4x4x24xf32>
    %29 = arith.mulf %26, %28 : vector<2x4x4x24xf32>
    %30 = arith.addf %25, %29 : vector<2x4x4x24xf32>
    %c0_42 = arith.constant 0 : index
    %c2_43 = arith.constant 2 : index
    %c0_44 = arith.constant 0 : index
    %c0_45 = arith.constant 0 : index
    %31 = vector.load %arg1[%c0_42, %c2_43, %c0_44, %c0_45] : memref<2x6x6x24xf32, #tpu.memory_space<vmem>>, vector<2x4x4x24xf32>
    %c6 = arith.constant 6 : index
    %c0_46 = arith.constant 0 : index
    %c0_47 = arith.constant 0 : index
    %c0_48 = arith.constant 0 : index
    %32 = vector.load %arg2[%c6, %c0_46, %c0_47, %c0_48] : memref<9x1x1x24xf32, #tpu.memory_space<vmem>>, vector<1x1x1x24xf32>
    %33 = vector.broadcast %32 : vector<1x1x1x24xf32> to vector<2x4x4x24xf32>
    %34 = arith.mulf %31, %33 : vector<2x4x4x24xf32>
    %35 = arith.addf %30, %34 : vector<2x4x4x24xf32>
    %c0_49 = arith.constant 0 : index
    %c2_50 = arith.constant 2 : index
    %c1_51 = arith.constant 1 : index
    %c0_52 = arith.constant 0 : index
    %36 = vector.load %arg1[%c0_49, %c2_50, %c1_51, %c0_52] : memref<2x6x6x24xf32, #tpu.memory_space<vmem>>, vector<2x4x4x24xf32>
    %c7 = arith.constant 7 : index
    %c0_53 = arith.constant 0 : index
    %c0_54 = arith.constant 0 : index
    %c0_55 = arith.constant 0 : index
    %37 = vector.load %arg2[%c7, %c0_53, %c0_54, %c0_55] : memref<9x1x1x24xf32, #tpu.memory_space<vmem>>, vector<1x1x1x24xf32>
    %38 = vector.broadcast %37 : vector<1x1x1x24xf32> to vector<2x4x4x24xf32>
    %39 = arith.mulf %36, %38 : vector<2x4x4x24xf32>
    %40 = arith.addf %35, %39 : vector<2x4x4x24xf32>
    %c0_56 = arith.constant 0 : index
    %c2_57 = arith.constant 2 : index
    %c2_58 = arith.constant 2 : index
    %c0_59 = arith.constant 0 : index
    %41 = vector.load %arg1[%c0_56, %c2_57, %c2_58, %c0_59] : memref<2x6x6x24xf32, #tpu.memory_space<vmem>>, vector<2x4x4x24xf32>
    %c8 = arith.constant 8 : index
    %c0_60 = arith.constant 0 : index
    %c0_61 = arith.constant 0 : index
    %c0_62 = arith.constant 0 : index
    %42 = vector.load %arg2[%c8, %c0_60, %c0_61, %c0_62] : memref<9x1x1x24xf32, #tpu.memory_space<vmem>>, vector<1x1x1x24xf32>
    %43 = vector.broadcast %42 : vector<1x1x1x24xf32> to vector<2x4x4x24xf32>
    %44 = arith.mulf %41, %43 : vector<2x4x4x24xf32>
    %45 = arith.addf %40, %44 : vector<2x4x4x24xf32>
    %c0_63 = arith.constant 0 : index
    %c0_64 = arith.constant 0 : index
    %c0_65 = arith.constant 0 : index
    %c0_66 = arith.constant 0 : index
    %46 = vector.load %arg3[%c0_63, %c0_64, %c0_65, %c0_66] : memref<1x1x1x24xf32, #tpu.memory_space<vmem>>, vector<1x1x1x24xf32>
    %47 = vector.broadcast %46 : vector<1x1x1x24xf32> to vector<2x4x4x24xf32>
    %48 = arith.addf %45, %47 : vector<2x4x4x24xf32>
    %c0_67 = arith.constant 0 : index
    %c0_68 = arith.constant 0 : index
    %c0_69 = arith.constant 0 : index
    %c0_70 = arith.constant 0 : index
    %49 = vector.load %arg4[%c0_67, %c0_68, %c0_69, %c0_70] : memref<2x4x4x24xf32, #tpu.memory_space<vmem>>, vector<2x4x4x24xf32>
    tpu.vector_store %arg4[%c0_67, %c0_68, %c0_69, %c0_70], %48 {strides = array<i32>} : memref<2x4x4x24xf32, #tpu.memory_space<vmem>>, vector<2x4x4x24xf32>,
    return
  }
  func.func @transform_0(%arg0: i32) -> (i32, i32, i32, i32) {
    %c0_i32 = arith.constant 0 : i32
    %c0_i32_0 = arith.constant 0 : i32
    %c0_i32_1 = arith.constant 0 : i32
    %c0_i32_2 = arith.constant 0 : i32
    %c0_i32_3 = arith.constant 0 : i32
    return %c0_i32, %c0_i32_0, %c0_i32_1, %c0_i32_2 : i32, i32, i32, i32
  }
  func.func @transform_1(%arg0: i32) -> (i32, i32, i32, i32) {
    %c0_i32 = arith.constant 0 : i32
    %c0_i32_0 = arith.constant 0 : i32
    %c0_i32_1 = arith.constant 0 : i32
    %c0_i32_2 = arith.constant 0 : i32
    %c0_i32_3 = arith.constant 0 : i32
    return %c0_i32, %c0_i32_0, %c0_i32_1, %c0_i32_2 : i32, i32, i32, i32
  }
  func.func @transform_2(%arg0: i32) -> (i32, i32, i32, i32) {
    %c0_i32 = arith.constant 0 : i32
    %c0_i32_0 = arith.constant 0 : i32
    %c0_i32_1 = arith.constant 0 : i32
    %c0_i32_2 = arith.constant 0 : i32
    %c0_i32_3 = arith.constant 0 : i32
    return %c0_i32, %c0_i32_0, %c0_i32_1, %c0_i32_2 : i32, i32, i32, i32
  }
  func.func @transform_3(%arg0: i32) -> (i32, i32, i32, i32) {
    %c0_i32 = arith.constant 0 : i32
    %c0_i32_0 = arith.constant 0 : i32
    %c0_i32_1 = arith.constant 0 : i32
    %c0_i32_2 = arith.constant 0 : i32
    %c0_i32_3 = arith.constant 0 : i32
    return %c0_i32, %c0_i32_0, %c0_i32_1, %c0_i32_2 : i32, i32, i32, i32
  }
}

module attributes {stable_mosaic.version = 11 : i64} {
  func.func @_dwconv_kernel(%arg0: i32, %arg1: memref<8x3x3x48xf32, #tpu.memory_space<vmem>>, %arg2: memref<9x1x1x48xf32, #tpu.memory_space<vmem>>, %arg3: memref<1x1x1x48xf32, #tpu.memory_space<vmem>>, %arg4: memref<2x2x2x48xf32, #tpu.memory_space<vmem>>) attributes {dimension_semantics = [#tpu.dimension_semantics<arbitrary>], iteration_bounds = array<i64: 1>, scalar_prefetch = 0 : i64, scratch_operands = 0 : i64, tpu.core_type = #tpu.core_type<tc>, window_params = [{pipeline_mode = #tpu.pipeline_mode<synchronous>, transform_indices = @transform_0, window_bounds = array<i64: 8, 3, 3, 48>}, {pipeline_mode = #tpu.pipeline_mode<synchronous>, transform_indices = @transform_1, window_bounds = array<i64: 9, 1, 1, 48>}, {pipeline_mode = #tpu.pipeline_mode<synchronous>, transform_indices = @transform_2, window_bounds = array<i64: 1, 1, 1, 48>}, {pipeline_mode = #tpu.pipeline_mode<synchronous>, transform_indices = @transform_3, window_bounds = array<i64: 2, 2, 2, 48>}]} {
    %cst = arith.constant 0.000000e+00 : f32
    %0 = vector.broadcast %cst : f32 to vector<2x2x2x48xf32>
    %c0 = arith.constant 0 : index
    %c0_0 = arith.constant 0 : index
    %c0_1 = arith.constant 0 : index
    %c0_2 = arith.constant 0 : index
    %1 = vector.load %arg1[%c0, %c0_0, %c0_1, %c0_2] : memref<8x3x3x48xf32, #tpu.memory_space<vmem>>, vector<2x2x2x48xf32>
    %c0_3 = arith.constant 0 : index
    %c0_4 = arith.constant 0 : index
    %c0_5 = arith.constant 0 : index
    %c0_6 = arith.constant 0 : index
    %2 = vector.load %arg2[%c0_3, %c0_4, %c0_5, %c0_6] : memref<9x1x1x48xf32, #tpu.memory_space<vmem>>, vector<1x1x1x48xf32>
    %3 = vector.broadcast %2 : vector<1x1x1x48xf32> to vector<2x2x2x48xf32>
    %4 = arith.mulf %1, %3 : vector<2x2x2x48xf32>
    %5 = arith.addf %0, %4 : vector<2x2x2x48xf32>
    %c2 = arith.constant 2 : index
    %c0_7 = arith.constant 0 : index
    %c0_8 = arith.constant 0 : index
    %c0_9 = arith.constant 0 : index
    %6 = vector.load %arg1[%c2, %c0_7, %c0_8, %c0_9] : memref<8x3x3x48xf32, #tpu.memory_space<vmem>>, vector<2x2x2x48xf32>
    %c1 = arith.constant 1 : index
    %c0_10 = arith.constant 0 : index
    %c0_11 = arith.constant 0 : index
    %c0_12 = arith.constant 0 : index
    %7 = vector.load %arg2[%c1, %c0_10, %c0_11, %c0_12] : memref<9x1x1x48xf32, #tpu.memory_space<vmem>>, vector<1x1x1x48xf32>
    %8 = vector.broadcast %7 : vector<1x1x1x48xf32> to vector<2x2x2x48xf32>
    %9 = arith.mulf %6, %8 : vector<2x2x2x48xf32>
    %10 = arith.addf %5, %9 : vector<2x2x2x48xf32>
    %c0_13 = arith.constant 0 : index
    %c0_14 = arith.constant 0 : index
    %c1_15 = arith.constant 1 : index
    %c0_16 = arith.constant 0 : index
    %11 = vector.load %arg1[%c0_13, %c0_14, %c1_15, %c0_16] : memref<8x3x3x48xf32, #tpu.memory_space<vmem>>, vector<2x2x2x48xf32>
    %c2_17 = arith.constant 2 : index
    %c0_18 = arith.constant 0 : index
    %c0_19 = arith.constant 0 : index
    %c0_20 = arith.constant 0 : index
    %12 = vector.load %arg2[%c2_17, %c0_18, %c0_19, %c0_20] : memref<9x1x1x48xf32, #tpu.memory_space<vmem>>, vector<1x1x1x48xf32>
    %13 = vector.broadcast %12 : vector<1x1x1x48xf32> to vector<2x2x2x48xf32>
    %14 = arith.mulf %11, %13 : vector<2x2x2x48xf32>
    %15 = arith.addf %10, %14 : vector<2x2x2x48xf32>
    %c4 = arith.constant 4 : index
    %c0_21 = arith.constant 0 : index
    %c0_22 = arith.constant 0 : index
    %c0_23 = arith.constant 0 : index
    %16 = vector.load %arg1[%c4, %c0_21, %c0_22, %c0_23] : memref<8x3x3x48xf32, #tpu.memory_space<vmem>>, vector<2x2x2x48xf32>
    %c3 = arith.constant 3 : index
    %c0_24 = arith.constant 0 : index
    %c0_25 = arith.constant 0 : index
    %c0_26 = arith.constant 0 : index
    %17 = vector.load %arg2[%c3, %c0_24, %c0_25, %c0_26] : memref<9x1x1x48xf32, #tpu.memory_space<vmem>>, vector<1x1x1x48xf32>
    %18 = vector.broadcast %17 : vector<1x1x1x48xf32> to vector<2x2x2x48xf32>
    %19 = arith.mulf %16, %18 : vector<2x2x2x48xf32>
    %20 = arith.addf %15, %19 : vector<2x2x2x48xf32>
    %c6 = arith.constant 6 : index
    %c0_27 = arith.constant 0 : index
    %c0_28 = arith.constant 0 : index
    %c0_29 = arith.constant 0 : index
    %21 = vector.load %arg1[%c6, %c0_27, %c0_28, %c0_29] : memref<8x3x3x48xf32, #tpu.memory_space<vmem>>, vector<2x2x2x48xf32>
    %c4_30 = arith.constant 4 : index
    %c0_31 = arith.constant 0 : index
    %c0_32 = arith.constant 0 : index
    %c0_33 = arith.constant 0 : index
    %22 = vector.load %arg2[%c4_30, %c0_31, %c0_32, %c0_33] : memref<9x1x1x48xf32, #tpu.memory_space<vmem>>, vector<1x1x1x48xf32>
    %23 = vector.broadcast %22 : vector<1x1x1x48xf32> to vector<2x2x2x48xf32>
    %24 = arith.mulf %21, %23 : vector<2x2x2x48xf32>
    %25 = arith.addf %20, %24 : vector<2x2x2x48xf32>
    %c4_34 = arith.constant 4 : index
    %c0_35 = arith.constant 0 : index
    %c1_36 = arith.constant 1 : index
    %c0_37 = arith.constant 0 : index
    %26 = vector.load %arg1[%c4_34, %c0_35, %c1_36, %c0_37] : memref<8x3x3x48xf32, #tpu.memory_space<vmem>>, vector<2x2x2x48xf32>
    %c5 = arith.constant 5 : index
    %c0_38 = arith.constant 0 : index
    %c0_39 = arith.constant 0 : index
    %c0_40 = arith.constant 0 : index
    %27 = vector.load %arg2[%c5, %c0_38, %c0_39, %c0_40] : memref<9x1x1x48xf32, #tpu.memory_space<vmem>>, vector<1x1x1x48xf32>
    %28 = vector.broadcast %27 : vector<1x1x1x48xf32> to vector<2x2x2x48xf32>
    %29 = arith.mulf %26, %28 : vector<2x2x2x48xf32>
    %30 = arith.addf %25, %29 : vector<2x2x2x48xf32>
    %c0_41 = arith.constant 0 : index
    %c1_42 = arith.constant 1 : index
    %c0_43 = arith.constant 0 : index
    %c0_44 = arith.constant 0 : index
    %31 = vector.load %arg1[%c0_41, %c1_42, %c0_43, %c0_44] : memref<8x3x3x48xf32, #tpu.memory_space<vmem>>, vector<2x2x2x48xf32>
    %c6_45 = arith.constant 6 : index
    %c0_46 = arith.constant 0 : index
    %c0_47 = arith.constant 0 : index
    %c0_48 = arith.constant 0 : index
    %32 = vector.load %arg2[%c6_45, %c0_46, %c0_47, %c0_48] : memref<9x1x1x48xf32, #tpu.memory_space<vmem>>, vector<1x1x1x48xf32>
    %33 = vector.broadcast %32 : vector<1x1x1x48xf32> to vector<2x2x2x48xf32>
    %34 = arith.mulf %31, %33 : vector<2x2x2x48xf32>
    %35 = arith.addf %30, %34 : vector<2x2x2x48xf32>
    %c2_49 = arith.constant 2 : index
    %c1_50 = arith.constant 1 : index
    %c0_51 = arith.constant 0 : index
    %c0_52 = arith.constant 0 : index
    %36 = vector.load %arg1[%c2_49, %c1_50, %c0_51, %c0_52] : memref<8x3x3x48xf32, #tpu.memory_space<vmem>>, vector<2x2x2x48xf32>
    %c7 = arith.constant 7 : index
    %c0_53 = arith.constant 0 : index
    %c0_54 = arith.constant 0 : index
    %c0_55 = arith.constant 0 : index
    %37 = vector.load %arg2[%c7, %c0_53, %c0_54, %c0_55] : memref<9x1x1x48xf32, #tpu.memory_space<vmem>>, vector<1x1x1x48xf32>
    %38 = vector.broadcast %37 : vector<1x1x1x48xf32> to vector<2x2x2x48xf32>
    %39 = arith.mulf %36, %38 : vector<2x2x2x48xf32>
    %40 = arith.addf %35, %39 : vector<2x2x2x48xf32>
    %c0_56 = arith.constant 0 : index
    %c1_57 = arith.constant 1 : index
    %c1_58 = arith.constant 1 : index
    %c0_59 = arith.constant 0 : index
    %41 = vector.load %arg1[%c0_56, %c1_57, %c1_58, %c0_59] : memref<8x3x3x48xf32, #tpu.memory_space<vmem>>, vector<2x2x2x48xf32>
    %c8 = arith.constant 8 : index
    %c0_60 = arith.constant 0 : index
    %c0_61 = arith.constant 0 : index
    %c0_62 = arith.constant 0 : index
    %42 = vector.load %arg2[%c8, %c0_60, %c0_61, %c0_62] : memref<9x1x1x48xf32, #tpu.memory_space<vmem>>, vector<1x1x1x48xf32>
    %43 = vector.broadcast %42 : vector<1x1x1x48xf32> to vector<2x2x2x48xf32>
    %44 = arith.mulf %41, %43 : vector<2x2x2x48xf32>
    %45 = arith.addf %40, %44 : vector<2x2x2x48xf32>
    %c0_63 = arith.constant 0 : index
    %c0_64 = arith.constant 0 : index
    %c0_65 = arith.constant 0 : index
    %c0_66 = arith.constant 0 : index
    %46 = vector.load %arg3[%c0_63, %c0_64, %c0_65, %c0_66] : memref<1x1x1x48xf32, #tpu.memory_space<vmem>>, vector<1x1x1x48xf32>
    %47 = vector.broadcast %46 : vector<1x1x1x48xf32> to vector<2x2x2x48xf32>
    %48 = arith.addf %45, %47 : vector<2x2x2x48xf32>
    %c0_67 = arith.constant 0 : index
    %c0_68 = arith.constant 0 : index
    %c0_69 = arith.constant 0 : index
    %c0_70 = arith.constant 0 : index
    %49 = vector.load %arg4[%c0_67, %c0_68, %c0_69, %c0_70] : memref<2x2x2x48xf32, #tpu.memory_space<vmem>>, vector<2x2x2x48xf32>
    tpu.vector_store %arg4[%c0_67, %c0_68, %c0_69, %c0_70], %48 {strides = array<i32>} : memref<2x2x2x48xf32, #tpu.memory_space<vmem>>, vector<2x2x2x48xf32>,
    return
  }
  func.func @transform_0(%arg0: i32) -> (i32, i32, i32, i32) {
    %c0_i32 = arith.constant 0 : i32
    %c0_i32_0 = arith.constant 0 : i32
    %c0_i32_1 = arith.constant 0 : i32
    %c0_i32_2 = arith.constant 0 : i32
    %c0_i32_3 = arith.constant 0 : i32
    return %c0_i32, %c0_i32_0, %c0_i32_1, %c0_i32_2 : i32, i32, i32, i32
  }
  func.func @transform_1(%arg0: i32) -> (i32, i32, i32, i32) {
    %c0_i32 = arith.constant 0 : i32
    %c0_i32_0 = arith.constant 0 : i32
    %c0_i32_1 = arith.constant 0 : i32
    %c0_i32_2 = arith.constant 0 : i32
    %c0_i32_3 = arith.constant 0 : i32
    return %c0_i32, %c0_i32_0, %c0_i32_1, %c0_i32_2 : i32, i32, i32, i32
  }
  func.func @transform_2(%arg0: i32) -> (i32, i32, i32, i32) {
    %c0_i32 = arith.constant 0 : i32
    %c0_i32_0 = arith.constant 0 : i32
    %c0_i32_1 = arith.constant 0 : i32
    %c0_i32_2 = arith.constant 0 : i32
    %c0_i32_3 = arith.constant 0 : i32
    return %c0_i32, %c0_i32_0, %c0_i32_1, %c0_i32_2 : i32, i32, i32, i32
  }
  func.func @transform_3(%arg0: i32) -> (i32, i32, i32, i32) {
    %c0_i32 = arith.constant 0 : i32
    %c0_i32_0 = arith.constant 0 : i32
    %c0_i32_1 = arith.constant 0 : i32
    %c0_i32_2 = arith.constant 0 : i32
    %c0_i32_3 = arith.constant 0 : i32
    return %c0_i32, %c0_i32_0, %c0_i32_1, %c0_i32_2 : i32, i32, i32, i32
  }
}

module attributes {stable_mosaic.version = 11 : i64} {
  func.func @_matmul_kernel(%arg0: i32, %arg1: i32, %arg2: i32, %arg3: memref<8x128xbf16, #tpu.memory_space<vmem>>, %arg4: memref<128x128xbf16, #tpu.memory_space<vmem>>, %arg5: memref<1x128xf32, #tpu.memory_space<vmem>>, %arg6: memref<8x128xf32, #tpu.memory_space<vmem>>, %arg7: memref<8x128xf32, #tpu.memory_space<vmem>>) attributes {dimension_semantics = [#tpu.dimension_semantics<parallel>, #tpu.dimension_semantics<parallel>, #tpu.dimension_semantics<arbitrary>], iteration_bounds = array<i64: 1, 1, 1>, scalar_prefetch = 0 : i64, scratch_operands = 1 : i64, tpu.core_type = #tpu.core_type<tc>, window_params = [{transform_indices = @transform_0, window_bounds = array<i64: 8, 128>}, {transform_indices = @transform_1, window_bounds = array<i64: 128, 128>}, {transform_indices = @transform_2, window_bounds = array<i64: 1, 128>}, {transform_indices = @transform_3, window_bounds = array<i64: 8, 128>}]} {
    %c0_i32 = arith.constant 0 : i32
    %0 = arith.cmpi eq, %arg2, %c0_i32 : i32
    %1 = arith.extui %0 : i1 to i32
    %c0_i32_0 = arith.constant 0 : i32
    %2 = arith.cmpi ne, %1, %c0_i32_0 : i32
    scf.if %2 {
      %cst_10 = arith.constant 0.000000e+00 : f32
      %12 = vector.broadcast %cst_10 : f32 to vector<8x128xf32>
      %c0_11 = arith.constant 0 : index
      %c0_12 = arith.constant 0 : index
      %13 = vector.load %arg7[%c0_11, %c0_12] : memref<8x128xf32, #tpu.memory_space<vmem>>, vector<8x128xf32>
      tpu.vector_store %arg7[%c0_11, %c0_12], %12 {strides = array<i32>} : memref<8x128xf32, #tpu.memory_space<vmem>>, vector<8x128xf32>,
    } else {
    }
    %c0 = arith.constant 0 : index
    %c0_1 = arith.constant 0 : index
    %3 = vector.load %arg7[%c0, %c0_1] : memref<8x128xf32, #tpu.memory_space<vmem>>, vector<8x128xf32>
    %c0_2 = arith.constant 0 : index
    %c0_3 = arith.constant 0 : index
    %4 = vector.load %arg3[%c0_2, %c0_3] : memref<8x128xbf16, #tpu.memory_space<vmem>>, vector<8x128xbf16>
    %c0_4 = arith.constant 0 : index
    %c0_5 = arith.constant 0 : index
    %5 = vector.load %arg4[%c0_4, %c0_5] : memref<128x128xbf16, #tpu.memory_space<vmem>>, vector<128x128xbf16>
    %cst = arith.constant dense<0.000000e+00> : vector<8x128xf32>
    %6 = tpu.matmul %4, %5, %cst {dimension_numbers = #tpu.dot_dimension_numbers<[1], [0], [0], [1], [0, 0, 1, 1], [], []>} : vector<8x128xbf16>, vector<128x128xbf16>, vector<8x128xf32> -> vector<8x128xf32>
    %7 = arith.addf %3, %6 : vector<8x128xf32>
    %c0_6 = arith.constant 0 : index
    %c0_7 = arith.constant 0 : index
    %8 = vector.load %arg7[%c0_6, %c0_7] : memref<8x128xf32, #tpu.memory_space<vmem>>, vector<8x128xf32>
    tpu.vector_store %arg7[%c0_6, %c0_7], %7 {strides = array<i32>} : memref<8x128xf32, #tpu.memory_space<vmem>>, vector<8x128xf32>,
    %c0_i32_8 = arith.constant 0 : i32
    %9 = arith.cmpi eq, %arg2, %c0_i32_8 : i32
    %10 = arith.extui %9 : i1 to i32
    %c0_i32_9 = arith.constant 0 : i32
    %11 = arith.cmpi ne, %10, %c0_i32_9 : i32
    scf.if %11 {
      %c0_10 = arith.constant 0 : index
      %c0_11 = arith.constant 0 : index
      %12 = vector.load %arg7[%c0_10, %c0_11] : memref<8x128xf32, #tpu.memory_space<vmem>>, vector<8x128xf32>
      %c0_12 = arith.constant 0 : index
      %c0_13 = arith.constant 0 : index
      %13 = vector.load %arg5[%c0_12, %c0_13] : memref<1x128xf32, #tpu.memory_space<vmem>>, vector<1x128xf32>
      %14 = vector.broadcast %13 : vector<1x128xf32> to vector<8x128xf32>
      %15 = arith.addf %12, %14 : vector<8x128xf32>
      %cst_14 = arith.constant 0.000000e+00 : f32
      %16 = vector.broadcast %cst_14 : f32 to vector<8x128xf32>
      %17 = arith.maximumf %15, %16 : vector<8x128xf32>
      %c0_15 = arith.constant 0 : index
      %c0_16 = arith.constant 0 : index
      %18 = vector.load %arg6[%c0_15, %c0_16] : memref<8x128xf32, #tpu.memory_space<vmem>>, vector<8x128xf32>
      tpu.vector_store %arg6[%c0_15, %c0_16], %17 {strides = array<i32>} : memref<8x128xf32, #tpu.memory_space<vmem>>, vector<8x128xf32>,
    } else {
    }
    return
  }
  func.func @transform_0(%arg0: i32, %arg1: i32, %arg2: i32) -> (i32, i32) {
    %c0_i32 = arith.constant 0 : i32
    return %arg0, %arg2 : i32, i32
  }
  func.func @transform_1(%arg0: i32, %arg1: i32, %arg2: i32) -> (i32, i32) {
    %c0_i32 = arith.constant 0 : i32
    return %arg2, %arg1 : i32, i32
  }
  func.func @transform_2(%arg0: i32, %arg1: i32, %arg2: i32) -> (i32, i32) {
    %c0_i32 = arith.constant 0 : i32
    %c0_i32_0 = arith.constant 0 : i32
    return %c0_i32, %arg1 : i32, i32
  }
  func.func @transform_3(%arg0: i32, %arg1: i32, %arg2: i32) -> (i32, i32) {
    %c0_i32 = arith.constant 0 : i32
    return %arg0, %arg1 : i32, i32
  }
}

module attributes {stable_mosaic.version = 11 : i64} {
  func.func @_dwconv_kernel(%arg0: i32, %arg1: memref<2x4x4x48xf32, #tpu.memory_space<vmem>>, %arg2: memref<9x1x1x48xf32, #tpu.memory_space<vmem>>, %arg3: memref<1x1x1x48xf32, #tpu.memory_space<vmem>>, %arg4: memref<2x2x2x48xf32, #tpu.memory_space<vmem>>) attributes {dimension_semantics = [#tpu.dimension_semantics<arbitrary>], iteration_bounds = array<i64: 1>, scalar_prefetch = 0 : i64, scratch_operands = 0 : i64, tpu.core_type = #tpu.core_type<tc>, window_params = [{pipeline_mode = #tpu.pipeline_mode<synchronous>, transform_indices = @transform_0, window_bounds = array<i64: 2, 4, 4, 48>}, {pipeline_mode = #tpu.pipeline_mode<synchronous>, transform_indices = @transform_1, window_bounds = array<i64: 9, 1, 1, 48>}, {pipeline_mode = #tpu.pipeline_mode<synchronous>, transform_indices = @transform_2, window_bounds = array<i64: 1, 1, 1, 48>}, {pipeline_mode = #tpu.pipeline_mode<synchronous>, transform_indices = @transform_3, window_bounds = array<i64: 2, 2, 2, 48>}]} {
    %cst = arith.constant 0.000000e+00 : f32
    %0 = vector.broadcast %cst : f32 to vector<2x2x2x48xf32>
    %c0 = arith.constant 0 : index
    %c0_0 = arith.constant 0 : index
    %c0_1 = arith.constant 0 : index
    %c0_2 = arith.constant 0 : index
    %1 = vector.load %arg1[%c0, %c0_0, %c0_1, %c0_2] : memref<2x4x4x48xf32, #tpu.memory_space<vmem>>, vector<2x2x2x48xf32>
    %c0_3 = arith.constant 0 : index
    %c0_4 = arith.constant 0 : index
    %c0_5 = arith.constant 0 : index
    %c0_6 = arith.constant 0 : index
    %2 = vector.load %arg2[%c0_3, %c0_4, %c0_5, %c0_6] : memref<9x1x1x48xf32, #tpu.memory_space<vmem>>, vector<1x1x1x48xf32>
    %3 = vector.broadcast %2 : vector<1x1x1x48xf32> to vector<2x2x2x48xf32>
    %4 = arith.mulf %1, %3 : vector<2x2x2x48xf32>
    %5 = arith.addf %0, %4 : vector<2x2x2x48xf32>
    %c0_7 = arith.constant 0 : index
    %c0_8 = arith.constant 0 : index
    %c1 = arith.constant 1 : index
    %c0_9 = arith.constant 0 : index
    %6 = vector.load %arg1[%c0_7, %c0_8, %c1, %c0_9] : memref<2x4x4x48xf32, #tpu.memory_space<vmem>>, vector<2x2x2x48xf32>
    %c1_10 = arith.constant 1 : index
    %c0_11 = arith.constant 0 : index
    %c0_12 = arith.constant 0 : index
    %c0_13 = arith.constant 0 : index
    %7 = vector.load %arg2[%c1_10, %c0_11, %c0_12, %c0_13] : memref<9x1x1x48xf32, #tpu.memory_space<vmem>>, vector<1x1x1x48xf32>
    %8 = vector.broadcast %7 : vector<1x1x1x48xf32> to vector<2x2x2x48xf32>
    %9 = arith.mulf %6, %8 : vector<2x2x2x48xf32>
    %10 = arith.addf %5, %9 : vector<2x2x2x48xf32>
    %c0_14 = arith.constant 0 : index
    %c0_15 = arith.constant 0 : index
    %c2 = arith.constant 2 : index
    %c0_16 = arith.constant 0 : index
    %11 = vector.load %arg1[%c0_14, %c0_15, %c2, %c0_16] : memref<2x4x4x48xf32, #tpu.memory_space<vmem>>, vector<2x2x2x48xf32>
    %c2_17 = arith.constant 2 : index
    %c0_18 = arith.constant 0 : index
    %c0_19 = arith.constant 0 : index
    %c0_20 = arith.constant 0 : index
    %12 = vector.load %arg2[%c2_17, %c0_18, %c0_19, %c0_20] : memref<9x1x1x48xf32, #tpu.memory_space<vmem>>, vector<1x1x1x48xf32>
    %13 = vector.broadcast %12 : vector<1x1x1x48xf32> to vector<2x2x2x48xf32>
    %14 = arith.mulf %11, %13 : vector<2x2x2x48xf32>
    %15 = arith.addf %10, %14 : vector<2x2x2x48xf32>
    %c0_21 = arith.constant 0 : index
    %c1_22 = arith.constant 1 : index
    %c0_23 = arith.constant 0 : index
    %c0_24 = arith.constant 0 : index
    %16 = vector.load %arg1[%c0_21, %c1_22, %c0_23, %c0_24] : memref<2x4x4x48xf32, #tpu.memory_space<vmem>>, vector<2x2x2x48xf32>
    %c3 = arith.constant 3 : index
    %c0_25 = arith.constant 0 : index
    %c0_26 = arith.constant 0 : index
    %c0_27 = arith.constant 0 : index
    %17 = vector.load %arg2[%c3, %c0_25, %c0_26, %c0_27] : memref<9x1x1x48xf32, #tpu.memory_space<vmem>>, vector<1x1x1x48xf32>
    %18 = vector.broadcast %17 : vector<1x1x1x48xf32> to vector<2x2x2x48xf32>
    %19 = arith.mulf %16, %18 : vector<2x2x2x48xf32>
    %20 = arith.addf %15, %19 : vector<2x2x2x48xf32>
    %c0_28 = arith.constant 0 : index
    %c1_29 = arith.constant 1 : index
    %c1_30 = arith.constant 1 : index
    %c0_31 = arith.constant 0 : index
    %21 = vector.load %arg1[%c0_28, %c1_29, %c1_30, %c0_31] : memref<2x4x4x48xf32, #tpu.memory_space<vmem>>, vector<2x2x2x48xf32>
    %c4 = arith.constant 4 : index
    %c0_32 = arith.constant 0 : index
    %c0_33 = arith.constant 0 : index
    %c0_34 = arith.constant 0 : index
    %22 = vector.load %arg2[%c4, %c0_32, %c0_33, %c0_34] : memref<9x1x1x48xf32, #tpu.memory_space<vmem>>, vector<1x1x1x48xf32>
    %23 = vector.broadcast %22 : vector<1x1x1x48xf32> to vector<2x2x2x48xf32>
    %24 = arith.mulf %21, %23 : vector<2x2x2x48xf32>
    %25 = arith.addf %20, %24 : vector<2x2x2x48xf32>
    %c0_35 = arith.constant 0 : index
    %c1_36 = arith.constant 1 : index
    %c2_37 = arith.constant 2 : index
    %c0_38 = arith.constant 0 : index
    %26 = vector.load %arg1[%c0_35, %c1_36, %c2_37, %c0_38] : memref<2x4x4x48xf32, #tpu.memory_space<vmem>>, vector<2x2x2x48xf32>
    %c5 = arith.constant 5 : index
    %c0_39 = arith.constant 0 : index
    %c0_40 = arith.constant 0 : index
    %c0_41 = arith.constant 0 : index
    %27 = vector.load %arg2[%c5, %c0_39, %c0_40, %c0_41] : memref<9x1x1x48xf32, #tpu.memory_space<vmem>>, vector<1x1x1x48xf32>
    %28 = vector.broadcast %27 : vector<1x1x1x48xf32> to vector<2x2x2x48xf32>
    %29 = arith.mulf %26, %28 : vector<2x2x2x48xf32>
    %30 = arith.addf %25, %29 : vector<2x2x2x48xf32>
    %c0_42 = arith.constant 0 : index
    %c2_43 = arith.constant 2 : index
    %c0_44 = arith.constant 0 : index
    %c0_45 = arith.constant 0 : index
    %31 = vector.load %arg1[%c0_42, %c2_43, %c0_44, %c0_45] : memref<2x4x4x48xf32, #tpu.memory_space<vmem>>, vector<2x2x2x48xf32>
    %c6 = arith.constant 6 : index
    %c0_46 = arith.constant 0 : index
    %c0_47 = arith.constant 0 : index
    %c0_48 = arith.constant 0 : index
    %32 = vector.load %arg2[%c6, %c0_46, %c0_47, %c0_48] : memref<9x1x1x48xf32, #tpu.memory_space<vmem>>, vector<1x1x1x48xf32>
    %33 = vector.broadcast %32 : vector<1x1x1x48xf32> to vector<2x2x2x48xf32>
    %34 = arith.mulf %31, %33 : vector<2x2x2x48xf32>
    %35 = arith.addf %30, %34 : vector<2x2x2x48xf32>
    %c0_49 = arith.constant 0 : index
    %c2_50 = arith.constant 2 : index
    %c1_51 = arith.constant 1 : index
    %c0_52 = arith.constant 0 : index
    %36 = vector.load %arg1[%c0_49, %c2_50, %c1_51, %c0_52] : memref<2x4x4x48xf32, #tpu.memory_space<vmem>>, vector<2x2x2x48xf32>
    %c7 = arith.constant 7 : index
    %c0_53 = arith.constant 0 : index
    %c0_54 = arith.constant 0 : index
    %c0_55 = arith.constant 0 : index
    %37 = vector.load %arg2[%c7, %c0_53, %c0_54, %c0_55] : memref<9x1x1x48xf32, #tpu.memory_space<vmem>>, vector<1x1x1x48xf32>
    %38 = vector.broadcast %37 : vector<1x1x1x48xf32> to vector<2x2x2x48xf32>
    %39 = arith.mulf %36, %38 : vector<2x2x2x48xf32>
    %40 = arith.addf %35, %39 : vector<2x2x2x48xf32>
    %c0_56 = arith.constant 0 : index
    %c2_57 = arith.constant 2 : index
    %c2_58 = arith.constant 2 : index
    %c0_59 = arith.constant 0 : index
    %41 = vector.load %arg1[%c0_56, %c2_57, %c2_58, %c0_59] : memref<2x4x4x48xf32, #tpu.memory_space<vmem>>, vector<2x2x2x48xf32>
    %c8 = arith.constant 8 : index
    %c0_60 = arith.constant 0 : index
    %c0_61 = arith.constant 0 : index
    %c0_62 = arith.constant 0 : index
    %42 = vector.load %arg2[%c8, %c0_60, %c0_61, %c0_62] : memref<9x1x1x48xf32, #tpu.memory_space<vmem>>, vector<1x1x1x48xf32>
    %43 = vector.broadcast %42 : vector<1x1x1x48xf32> to vector<2x2x2x48xf32>
    %44 = arith.mulf %41, %43 : vector<2x2x2x48xf32>
    %45 = arith.addf %40, %44 : vector<2x2x2x48xf32>
    %c0_63 = arith.constant 0 : index
    %c0_64 = arith.constant 0 : index
    %c0_65 = arith.constant 0 : index
    %c0_66 = arith.constant 0 : index
    %46 = vector.load %arg3[%c0_63, %c0_64, %c0_65, %c0_66] : memref<1x1x1x48xf32, #tpu.memory_space<vmem>>, vector<1x1x1x48xf32>
    %47 = vector.broadcast %46 : vector<1x1x1x48xf32> to vector<2x2x2x48xf32>
    %48 = arith.addf %45, %47 : vector<2x2x2x48xf32>
    %c0_67 = arith.constant 0 : index
    %c0_68 = arith.constant 0 : index
    %c0_69 = arith.constant 0 : index
    %c0_70 = arith.constant 0 : index
    %49 = vector.load %arg4[%c0_67, %c0_68, %c0_69, %c0_70] : memref<2x2x2x48xf32, #tpu.memory_space<vmem>>, vector<2x2x2x48xf32>
    tpu.vector_store %arg4[%c0_67, %c0_68, %c0_69, %c0_70], %48 {strides = array<i32>} : memref<2x2x2x48xf32, #tpu.memory_space<vmem>>, vector<2x2x2x48xf32>,
    return
  }
  func.func @transform_0(%arg0: i32) -> (i32, i32, i32, i32) {
    %c0_i32 = arith.constant 0 : i32
    %c0_i32_0 = arith.constant 0 : i32
    %c0_i32_1 = arith.constant 0 : i32
    %c0_i32_2 = arith.constant 0 : i32
    %c0_i32_3 = arith.constant 0 : i32
    return %c0_i32, %c0_i32_0, %c0_i32_1, %c0_i32_2 : i32, i32, i32, i32
  }
  func.func @transform_1(%arg0: i32) -> (i32, i32, i32, i32) {
    %c0_i32 = arith.constant 0 : i32
    %c0_i32_0 = arith.constant 0 : i32
    %c0_i32_1 = arith.constant 0 : i32
    %c0_i32_2 = arith.constant 0 : i32
    %c0_i32_3 = arith.constant 0 : i32
    return %c0_i32, %c0_i32_0, %c0_i32_1, %c0_i32_2 : i32, i32, i32, i32
  }
  func.func @transform_2(%arg0: i32) -> (i32, i32, i32, i32) {
    %c0_i32 = arith.constant 0 : i32
    %c0_i32_0 = arith.constant 0 : i32
    %c0_i32_1 = arith.constant 0 : i32
    %c0_i32_2 = arith.constant 0 : i32
    %c0_i32_3 = arith.constant 0 : i32
    return %c0_i32, %c0_i32_0, %c0_i32_1, %c0_i32_2 : i32, i32, i32, i32
  }
  func.func @transform_3(%arg0: i32) -> (i32, i32, i32, i32) {
    %c0_i32 = arith.constant 0 : i32
    %c0_i32_0 = arith.constant 0 : i32
    %c0_i32_1 = arith.constant 0 : i32
    %c0_i32_2 = arith.constant 0 : i32
    %c0_i32_3 = arith.constant 0 : i32
    return %c0_i32, %c0_i32_0, %c0_i32_1, %c0_i32_2 : i32, i32, i32, i32
  }
}

module attributes {stable_mosaic.version = 11 : i64} {
  func.func @_dwconv_kernel(%arg0: i32, %arg1: memref<8x2x2x96xf32, #tpu.memory_space<vmem>>, %arg2: memref<9x1x1x96xf32, #tpu.memory_space<vmem>>, %arg3: memref<1x1x1x96xf32, #tpu.memory_space<vmem>>, %arg4: memref<2x1x1x96xf32, #tpu.memory_space<vmem>>) attributes {dimension_semantics = [#tpu.dimension_semantics<arbitrary>], iteration_bounds = array<i64: 1>, scalar_prefetch = 0 : i64, scratch_operands = 0 : i64, tpu.core_type = #tpu.core_type<tc>, window_params = [{pipeline_mode = #tpu.pipeline_mode<synchronous>, transform_indices = @transform_0, window_bounds = array<i64: 8, 2, 2, 96>}, {pipeline_mode = #tpu.pipeline_mode<synchronous>, transform_indices = @transform_1, window_bounds = array<i64: 9, 1, 1, 96>}, {pipeline_mode = #tpu.pipeline_mode<synchronous>, transform_indices = @transform_2, window_bounds = array<i64: 1, 1, 1, 96>}, {pipeline_mode = #tpu.pipeline_mode<synchronous>, transform_indices = @transform_3, window_bounds = array<i64: 2, 1, 1, 96>}]} {
    %cst = arith.constant 0.000000e+00 : f32
    %0 = vector.broadcast %cst : f32 to vector<2x1x1x96xf32>
    %c0 = arith.constant 0 : index
    %c0_0 = arith.constant 0 : index
    %c0_1 = arith.constant 0 : index
    %c0_2 = arith.constant 0 : index
    %1 = vector.load %arg1[%c0, %c0_0, %c0_1, %c0_2] : memref<8x2x2x96xf32, #tpu.memory_space<vmem>>, vector<2x1x1x96xf32>
    %c0_3 = arith.constant 0 : index
    %c0_4 = arith.constant 0 : index
    %c0_5 = arith.constant 0 : index
    %c0_6 = arith.constant 0 : index
    %2 = vector.load %arg2[%c0_3, %c0_4, %c0_5, %c0_6] : memref<9x1x1x96xf32, #tpu.memory_space<vmem>>, vector<1x1x1x96xf32>
    %3 = vector.broadcast %2 : vector<1x1x1x96xf32> to vector<2x1x1x96xf32>
    %4 = arith.mulf %1, %3 : vector<2x1x1x96xf32>
    %5 = arith.addf %0, %4 : vector<2x1x1x96xf32>
    %c2 = arith.constant 2 : index
    %c0_7 = arith.constant 0 : index
    %c0_8 = arith.constant 0 : index
    %c0_9 = arith.constant 0 : index
    %6 = vector.load %arg1[%c2, %c0_7, %c0_8, %c0_9] : memref<8x2x2x96xf32, #tpu.memory_space<vmem>>, vector<2x1x1x96xf32>
    %c1 = arith.constant 1 : index
    %c0_10 = arith.constant 0 : index
    %c0_11 = arith.constant 0 : index
    %c0_12 = arith.constant 0 : index
    %7 = vector.load %arg2[%c1, %c0_10, %c0_11, %c0_12] : memref<9x1x1x96xf32, #tpu.memory_space<vmem>>, vector<1x1x1x96xf32>
    %8 = vector.broadcast %7 : vector<1x1x1x96xf32> to vector<2x1x1x96xf32>
    %9 = arith.mulf %6, %8 : vector<2x1x1x96xf32>
    %10 = arith.addf %5, %9 : vector<2x1x1x96xf32>
    %c0_13 = arith.constant 0 : index
    %c0_14 = arith.constant 0 : index
    %c1_15 = arith.constant 1 : index
    %c0_16 = arith.constant 0 : index
    %11 = vector.load %arg1[%c0_13, %c0_14, %c1_15, %c0_16] : memref<8x2x2x96xf32, #tpu.memory_space<vmem>>, vector<2x1x1x96xf32>
    %c2_17 = arith.constant 2 : index
    %c0_18 = arith.constant 0 : index
    %c0_19 = arith.constant 0 : index
    %c0_20 = arith.constant 0 : index
    %12 = vector.load %arg2[%c2_17, %c0_18, %c0_19, %c0_20] : memref<9x1x1x96xf32, #tpu.memory_space<vmem>>, vector<1x1x1x96xf32>
    %13 = vector.broadcast %12 : vector<1x1x1x96xf32> to vector<2x1x1x96xf32>
    %14 = arith.mulf %11, %13 : vector<2x1x1x96xf32>
    %15 = arith.addf %10, %14 : vector<2x1x1x96xf32>
    %c4 = arith.constant 4 : index
    %c0_21 = arith.constant 0 : index
    %c0_22 = arith.constant 0 : index
    %c0_23 = arith.constant 0 : index
    %16 = vector.load %arg1[%c4, %c0_21, %c0_22, %c0_23] : memref<8x2x2x96xf32, #tpu.memory_space<vmem>>, vector<2x1x1x96xf32>
    %c3 = arith.constant 3 : index
    %c0_24 = arith.constant 0 : index
    %c0_25 = arith.constant 0 : index
    %c0_26 = arith.constant 0 : index
    %17 = vector.load %arg2[%c3, %c0_24, %c0_25, %c0_26] : memref<9x1x1x96xf32, #tpu.memory_space<vmem>>, vector<1x1x1x96xf32>
    %18 = vector.broadcast %17 : vector<1x1x1x96xf32> to vector<2x1x1x96xf32>
    %19 = arith.mulf %16, %18 : vector<2x1x1x96xf32>
    %20 = arith.addf %15, %19 : vector<2x1x1x96xf32>
    %c6 = arith.constant 6 : index
    %c0_27 = arith.constant 0 : index
    %c0_28 = arith.constant 0 : index
    %c0_29 = arith.constant 0 : index
    %21 = vector.load %arg1[%c6, %c0_27, %c0_28, %c0_29] : memref<8x2x2x96xf32, #tpu.memory_space<vmem>>, vector<2x1x1x96xf32>
    %c4_30 = arith.constant 4 : index
    %c0_31 = arith.constant 0 : index
    %c0_32 = arith.constant 0 : index
    %c0_33 = arith.constant 0 : index
    %22 = vector.load %arg2[%c4_30, %c0_31, %c0_32, %c0_33] : memref<9x1x1x96xf32, #tpu.memory_space<vmem>>, vector<1x1x1x96xf32>
    %23 = vector.broadcast %22 : vector<1x1x1x96xf32> to vector<2x1x1x96xf32>
    %24 = arith.mulf %21, %23 : vector<2x1x1x96xf32>
    %25 = arith.addf %20, %24 : vector<2x1x1x96xf32>
    %c4_34 = arith.constant 4 : index
    %c0_35 = arith.constant 0 : index
    %c1_36 = arith.constant 1 : index
    %c0_37 = arith.constant 0 : index
    %26 = vector.load %arg1[%c4_34, %c0_35, %c1_36, %c0_37] : memref<8x2x2x96xf32, #tpu.memory_space<vmem>>, vector<2x1x1x96xf32>
    %c5 = arith.constant 5 : index
    %c0_38 = arith.constant 0 : index
    %c0_39 = arith.constant 0 : index
    %c0_40 = arith.constant 0 : index
    %27 = vector.load %arg2[%c5, %c0_38, %c0_39, %c0_40] : memref<9x1x1x96xf32, #tpu.memory_space<vmem>>, vector<1x1x1x96xf32>
    %28 = vector.broadcast %27 : vector<1x1x1x96xf32> to vector<2x1x1x96xf32>
    %29 = arith.mulf %26, %28 : vector<2x1x1x96xf32>
    %30 = arith.addf %25, %29 : vector<2x1x1x96xf32>
    %c0_41 = arith.constant 0 : index
    %c1_42 = arith.constant 1 : index
    %c0_43 = arith.constant 0 : index
    %c0_44 = arith.constant 0 : index
    %31 = vector.load %arg1[%c0_41, %c1_42, %c0_43, %c0_44] : memref<8x2x2x96xf32, #tpu.memory_space<vmem>>, vector<2x1x1x96xf32>
    %c6_45 = arith.constant 6 : index
    %c0_46 = arith.constant 0 : index
    %c0_47 = arith.constant 0 : index
    %c0_48 = arith.constant 0 : index
    %32 = vector.load %arg2[%c6_45, %c0_46, %c0_47, %c0_48] : memref<9x1x1x96xf32, #tpu.memory_space<vmem>>, vector<1x1x1x96xf32>
    %33 = vector.broadcast %32 : vector<1x1x1x96xf32> to vector<2x1x1x96xf32>
    %34 = arith.mulf %31, %33 : vector<2x1x1x96xf32>
    %35 = arith.addf %30, %34 : vector<2x1x1x96xf32>
    %c2_49 = arith.constant 2 : index
    %c1_50 = arith.constant 1 : index
    %c0_51 = arith.constant 0 : index
    %c0_52 = arith.constant 0 : index
    %36 = vector.load %arg1[%c2_49, %c1_50, %c0_51, %c0_52] : memref<8x2x2x96xf32, #tpu.memory_space<vmem>>, vector<2x1x1x96xf32>
    %c7 = arith.constant 7 : index
    %c0_53 = arith.constant 0 : index
    %c0_54 = arith.constant 0 : index
    %c0_55 = arith.constant 0 : index
    %37 = vector.load %arg2[%c7, %c0_53, %c0_54, %c0_55] : memref<9x1x1x96xf32, #tpu.memory_space<vmem>>, vector<1x1x1x96xf32>
    %38 = vector.broadcast %37 : vector<1x1x1x96xf32> to vector<2x1x1x96xf32>
    %39 = arith.mulf %36, %38 : vector<2x1x1x96xf32>
    %40 = arith.addf %35, %39 : vector<2x1x1x96xf32>
    %c0_56 = arith.constant 0 : index
    %c1_57 = arith.constant 1 : index
    %c1_58 = arith.constant 1 : index
    %c0_59 = arith.constant 0 : index
    %41 = vector.load %arg1[%c0_56, %c1_57, %c1_58, %c0_59] : memref<8x2x2x96xf32, #tpu.memory_space<vmem>>, vector<2x1x1x96xf32>
    %c8 = arith.constant 8 : index
    %c0_60 = arith.constant 0 : index
    %c0_61 = arith.constant 0 : index
    %c0_62 = arith.constant 0 : index
    %42 = vector.load %arg2[%c8, %c0_60, %c0_61, %c0_62] : memref<9x1x1x96xf32, #tpu.memory_space<vmem>>, vector<1x1x1x96xf32>
    %43 = vector.broadcast %42 : vector<1x1x1x96xf32> to vector<2x1x1x96xf32>
    %44 = arith.mulf %41, %43 : vector<2x1x1x96xf32>
    %45 = arith.addf %40, %44 : vector<2x1x1x96xf32>
    %c0_63 = arith.constant 0 : index
    %c0_64 = arith.constant 0 : index
    %c0_65 = arith.constant 0 : index
    %c0_66 = arith.constant 0 : index
    %46 = vector.load %arg3[%c0_63, %c0_64, %c0_65, %c0_66] : memref<1x1x1x96xf32, #tpu.memory_space<vmem>>, vector<1x1x1x96xf32>
    %47 = vector.broadcast %46 : vector<1x1x1x96xf32> to vector<2x1x1x96xf32>
    %48 = arith.addf %45, %47 : vector<2x1x1x96xf32>
    %c0_67 = arith.constant 0 : index
    %c0_68 = arith.constant 0 : index
    %c0_69 = arith.constant 0 : index
    %c0_70 = arith.constant 0 : index
    %49 = vector.load %arg4[%c0_67, %c0_68, %c0_69, %c0_70] : memref<2x1x1x96xf32, #tpu.memory_space<vmem>>, vector<2x1x1x96xf32>
    tpu.vector_store %arg4[%c0_67, %c0_68, %c0_69, %c0_70], %48 {strides = array<i32>} : memref<2x1x1x96xf32, #tpu.memory_space<vmem>>, vector<2x1x1x96xf32>,
    return
  }
  func.func @transform_0(%arg0: i32) -> (i32, i32, i32, i32) {
    %c0_i32 = arith.constant 0 : i32
    %c0_i32_0 = arith.constant 0 : i32
    %c0_i32_1 = arith.constant 0 : i32
    %c0_i32_2 = arith.constant 0 : i32
    %c0_i32_3 = arith.constant 0 : i32
    return %c0_i32, %c0_i32_0, %c0_i32_1, %c0_i32_2 : i32, i32, i32, i32
  }
  func.func @transform_1(%arg0: i32) -> (i32, i32, i32, i32) {
    %c0_i32 = arith.constant 0 : i32
    %c0_i32_0 = arith.constant 0 : i32
    %c0_i32_1 = arith.constant 0 : i32
    %c0_i32_2 = arith.constant 0 : i32
    %c0_i32_3 = arith.constant 0 : i32
    return %c0_i32, %c0_i32_0, %c0_i32_1, %c0_i32_2 : i32, i32, i32, i32
  }
  func.func @transform_2(%arg0: i32) -> (i32, i32, i32, i32) {
    %c0_i32 = arith.constant 0 : i32
    %c0_i32_0 = arith.constant 0 : i32
    %c0_i32_1 = arith.constant 0 : i32
    %c0_i32_2 = arith.constant 0 : i32
    %c0_i32_3 = arith.constant 0 : i32
    return %c0_i32, %c0_i32_0, %c0_i32_1, %c0_i32_2 : i32, i32, i32, i32
  }
  func.func @transform_3(%arg0: i32) -> (i32, i32, i32, i32) {
    %c0_i32 = arith.constant 0 : i32
    %c0_i32_0 = arith.constant 0 : i32
    %c0_i32_1 = arith.constant 0 : i32
    %c0_i32_2 = arith.constant 0 : i32
    %c0_i32_3 = arith.constant 0 : i32
    return %c0_i32, %c0_i32_0, %c0_i32_1, %c0_i32_2 : i32, i32, i32, i32
  }
}

module attributes {stable_mosaic.version = 11 : i64} {
  func.func @_dwconv_kernel(%arg0: i32, %arg1: memref<2x3x3x96xf32, #tpu.memory_space<vmem>>, %arg2: memref<9x1x1x96xf32, #tpu.memory_space<vmem>>, %arg3: memref<1x1x1x96xf32, #tpu.memory_space<vmem>>, %arg4: memref<2x1x1x96xf32, #tpu.memory_space<vmem>>) attributes {dimension_semantics = [#tpu.dimension_semantics<arbitrary>], iteration_bounds = array<i64: 1>, scalar_prefetch = 0 : i64, scratch_operands = 0 : i64, tpu.core_type = #tpu.core_type<tc>, window_params = [{pipeline_mode = #tpu.pipeline_mode<synchronous>, transform_indices = @transform_0, window_bounds = array<i64: 2, 3, 3, 96>}, {pipeline_mode = #tpu.pipeline_mode<synchronous>, transform_indices = @transform_1, window_bounds = array<i64: 9, 1, 1, 96>}, {pipeline_mode = #tpu.pipeline_mode<synchronous>, transform_indices = @transform_2, window_bounds = array<i64: 1, 1, 1, 96>}, {pipeline_mode = #tpu.pipeline_mode<synchronous>, transform_indices = @transform_3, window_bounds = array<i64: 2, 1, 1, 96>}]} {
    %cst = arith.constant 0.000000e+00 : f32
    %0 = vector.broadcast %cst : f32 to vector<2x1x1x96xf32>
    %c0 = arith.constant 0 : index
    %c0_0 = arith.constant 0 : index
    %c0_1 = arith.constant 0 : index
    %c0_2 = arith.constant 0 : index
    %1 = vector.load %arg1[%c0, %c0_0, %c0_1, %c0_2] : memref<2x3x3x96xf32, #tpu.memory_space<vmem>>, vector<2x1x1x96xf32>
    %c0_3 = arith.constant 0 : index
    %c0_4 = arith.constant 0 : index
    %c0_5 = arith.constant 0 : index
    %c0_6 = arith.constant 0 : index
    %2 = vector.load %arg2[%c0_3, %c0_4, %c0_5, %c0_6] : memref<9x1x1x96xf32, #tpu.memory_space<vmem>>, vector<1x1x1x96xf32>
    %3 = vector.broadcast %2 : vector<1x1x1x96xf32> to vector<2x1x1x96xf32>
    %4 = arith.mulf %1, %3 : vector<2x1x1x96xf32>
    %5 = arith.addf %0, %4 : vector<2x1x1x96xf32>
    %c0_7 = arith.constant 0 : index
    %c0_8 = arith.constant 0 : index
    %c1 = arith.constant 1 : index
    %c0_9 = arith.constant 0 : index
    %6 = vector.load %arg1[%c0_7, %c0_8, %c1, %c0_9] : memref<2x3x3x96xf32, #tpu.memory_space<vmem>>, vector<2x1x1x96xf32>
    %c1_10 = arith.constant 1 : index
    %c0_11 = arith.constant 0 : index
    %c0_12 = arith.constant 0 : index
    %c0_13 = arith.constant 0 : index
    %7 = vector.load %arg2[%c1_10, %c0_11, %c0_12, %c0_13] : memref<9x1x1x96xf32, #tpu.memory_space<vmem>>, vector<1x1x1x96xf32>
    %8 = vector.broadcast %7 : vector<1x1x1x96xf32> to vector<2x1x1x96xf32>
    %9 = arith.mulf %6, %8 : vector<2x1x1x96xf32>
    %10 = arith.addf %5, %9 : vector<2x1x1x96xf32>
    %c0_14 = arith.constant 0 : index
    %c0_15 = arith.constant 0 : index
    %c2 = arith.constant 2 : index
    %c0_16 = arith.constant 0 : index
    %11 = vector.load %arg1[%c0_14, %c0_15, %c2, %c0_16] : memref<2x3x3x96xf32, #tpu.memory_space<vmem>>, vector<2x1x1x96xf32>
    %c2_17 = arith.constant 2 : index
    %c0_18 = arith.constant 0 : index
    %c0_19 = arith.constant 0 : index
    %c0_20 = arith.constant 0 : index
    %12 = vector.load %arg2[%c2_17, %c0_18, %c0_19, %c0_20] : memref<9x1x1x96xf32, #tpu.memory_space<vmem>>, vector<1x1x1x96xf32>
    %13 = vector.broadcast %12 : vector<1x1x1x96xf32> to vector<2x1x1x96xf32>
    %14 = arith.mulf %11, %13 : vector<2x1x1x96xf32>
    %15 = arith.addf %10, %14 : vector<2x1x1x96xf32>
    %c0_21 = arith.constant 0 : index
    %c1_22 = arith.constant 1 : index
    %c0_23 = arith.constant 0 : index
    %c0_24 = arith.constant 0 : index
    %16 = vector.load %arg1[%c0_21, %c1_22, %c0_23, %c0_24] : memref<2x3x3x96xf32, #tpu.memory_space<vmem>>, vector<2x1x1x96xf32>
    %c3 = arith.constant 3 : index
    %c0_25 = arith.constant 0 : index
    %c0_26 = arith.constant 0 : index
    %c0_27 = arith.constant 0 : index
    %17 = vector.load %arg2[%c3, %c0_25, %c0_26, %c0_27] : memref<9x1x1x96xf32, #tpu.memory_space<vmem>>, vector<1x1x1x96xf32>
    %18 = vector.broadcast %17 : vector<1x1x1x96xf32> to vector<2x1x1x96xf32>
    %19 = arith.mulf %16, %18 : vector<2x1x1x96xf32>
    %20 = arith.addf %15, %19 : vector<2x1x1x96xf32>
    %c0_28 = arith.constant 0 : index
    %c1_29 = arith.constant 1 : index
    %c1_30 = arith.constant 1 : index
    %c0_31 = arith.constant 0 : index
    %21 = vector.load %arg1[%c0_28, %c1_29, %c1_30, %c0_31] : memref<2x3x3x96xf32, #tpu.memory_space<vmem>>, vector<2x1x1x96xf32>
    %c4 = arith.constant 4 : index
    %c0_32 = arith.constant 0 : index
    %c0_33 = arith.constant 0 : index
    %c0_34 = arith.constant 0 : index
    %22 = vector.load %arg2[%c4, %c0_32, %c0_33, %c0_34] : memref<9x1x1x96xf32, #tpu.memory_space<vmem>>, vector<1x1x1x96xf32>
    %23 = vector.broadcast %22 : vector<1x1x1x96xf32> to vector<2x1x1x96xf32>
    %24 = arith.mulf %21, %23 : vector<2x1x1x96xf32>
    %25 = arith.addf %20, %24 : vector<2x1x1x96xf32>
    %c0_35 = arith.constant 0 : index
    %c1_36 = arith.constant 1 : index
    %c2_37 = arith.constant 2 : index
    %c0_38 = arith.constant 0 : index
    %26 = vector.load %arg1[%c0_35, %c1_36, %c2_37, %c0_38] : memref<2x3x3x96xf32, #tpu.memory_space<vmem>>, vector<2x1x1x96xf32>
    %c5 = arith.constant 5 : index
    %c0_39 = arith.constant 0 : index
    %c0_40 = arith.constant 0 : index
    %c0_41 = arith.constant 0 : index
    %27 = vector.load %arg2[%c5, %c0_39, %c0_40, %c0_41] : memref<9x1x1x96xf32, #tpu.memory_space<vmem>>, vector<1x1x1x96xf32>
    %28 = vector.broadcast %27 : vector<1x1x1x96xf32> to vector<2x1x1x96xf32>
    %29 = arith.mulf %26, %28 : vector<2x1x1x96xf32>
    %30 = arith.addf %25, %29 : vector<2x1x1x96xf32>
    %c0_42 = arith.constant 0 : index
    %c2_43 = arith.constant 2 : index
    %c0_44 = arith.constant 0 : index
    %c0_45 = arith.constant 0 : index
    %31 = vector.load %arg1[%c0_42, %c2_43, %c0_44, %c0_45] : memref<2x3x3x96xf32, #tpu.memory_space<vmem>>, vector<2x1x1x96xf32>
    %c6 = arith.constant 6 : index
    %c0_46 = arith.constant 0 : index
    %c0_47 = arith.constant 0 : index
    %c0_48 = arith.constant 0 : index
    %32 = vector.load %arg2[%c6, %c0_46, %c0_47, %c0_48] : memref<9x1x1x96xf32, #tpu.memory_space<vmem>>, vector<1x1x1x96xf32>
    %33 = vector.broadcast %32 : vector<1x1x1x96xf32> to vector<2x1x1x96xf32>
    %34 = arith.mulf %31, %33 : vector<2x1x1x96xf32>
    %35 = arith.addf %30, %34 : vector<2x1x1x96xf32>
    %c0_49 = arith.constant 0 : index
    %c2_50 = arith.constant 2 : index
    %c1_51 = arith.constant 1 : index
    %c0_52 = arith.constant 0 : index
    %36 = vector.load %arg1[%c0_49, %c2_50, %c1_51, %c0_52] : memref<2x3x3x96xf32, #tpu.memory_space<vmem>>, vector<2x1x1x96xf32>
    %c7 = arith.constant 7 : index
    %c0_53 = arith.constant 0 : index
    %c0_54 = arith.constant 0 : index
    %c0_55 = arith.constant 0 : index
    %37 = vector.load %arg2[%c7, %c0_53, %c0_54, %c0_55] : memref<9x1x1x96xf32, #tpu.memory_space<vmem>>, vector<1x1x1x96xf32>
    %38 = vector.broadcast %37 : vector<1x1x1x96xf32> to vector<2x1x1x96xf32>
    %39 = arith.mulf %36, %38 : vector<2x1x1x96xf32>
    %40 = arith.addf %35, %39 : vector<2x1x1x96xf32>
    %c0_56 = arith.constant 0 : index
    %c2_57 = arith.constant 2 : index
    %c2_58 = arith.constant 2 : index
    %c0_59 = arith.constant 0 : index
    %41 = vector.load %arg1[%c0_56, %c2_57, %c2_58, %c0_59] : memref<2x3x3x96xf32, #tpu.memory_space<vmem>>, vector<2x1x1x96xf32>
    %c8 = arith.constant 8 : index
    %c0_60 = arith.constant 0 : index
    %c0_61 = arith.constant 0 : index
    %c0_62 = arith.constant 0 : index
    %42 = vector.load %arg2[%c8, %c0_60, %c0_61, %c0_62] : memref<9x1x1x96xf32, #tpu.memory_space<vmem>>, vector<1x1x1x96xf32>
    %43 = vector.broadcast %42 : vector<1x1x1x96xf32> to vector<2x1x1x96xf32>
    %44 = arith.mulf %41, %43 : vector<2x1x1x96xf32>
    %45 = arith.addf %40, %44 : vector<2x1x1x96xf32>
    %c0_63 = arith.constant 0 : index
    %c0_64 = arith.constant 0 : index
    %c0_65 = arith.constant 0 : index
    %c0_66 = arith.constant 0 : index
    %46 = vector.load %arg3[%c0_63, %c0_64, %c0_65, %c0_66] : memref<1x1x1x96xf32, #tpu.memory_space<vmem>>, vector<1x1x1x96xf32>
    %47 = vector.broadcast %46 : vector<1x1x1x96xf32> to vector<2x1x1x96xf32>
    %48 = arith.addf %45, %47 : vector<2x1x1x96xf32>
    %c0_67 = arith.constant 0 : index
    %c0_68 = arith.constant 0 : index
    %c0_69 = arith.constant 0 : index
    %c0_70 = arith.constant 0 : index
    %49 = vector.load %arg4[%c0_67, %c0_68, %c0_69, %c0_70] : memref<2x1x1x96xf32, #tpu.memory_space<vmem>>, vector<2x1x1x96xf32>
    tpu.vector_store %arg4[%c0_67, %c0_68, %c0_69, %c0_70], %48 {strides = array<i32>} : memref<2x1x1x96xf32, #tpu.memory_space<vmem>>, vector<2x1x1x96xf32>,
    return
  }
  func.func @transform_0(%arg0: i32) -> (i32, i32, i32, i32) {
    %c0_i32 = arith.constant 0 : i32
    %c0_i32_0 = arith.constant 0 : i32
    %c0_i32_1 = arith.constant 0 : i32
    %c0_i32_2 = arith.constant 0 : i32
    %c0_i32_3 = arith.constant 0 : i32
    return %c0_i32, %c0_i32_0, %c0_i32_1, %c0_i32_2 : i32, i32, i32, i32
  }
  func.func @transform_1(%arg0: i32) -> (i32, i32, i32, i32) {
    %c0_i32 = arith.constant 0 : i32
    %c0_i32_0 = arith.constant 0 : i32
    %c0_i32_1 = arith.constant 0 : i32
    %c0_i32_2 = arith.constant 0 : i32
    %c0_i32_3 = arith.constant 0 : i32
    return %c0_i32, %c0_i32_0, %c0_i32_1, %c0_i32_2 : i32, i32, i32, i32
  }
  func.func @transform_2(%arg0: i32) -> (i32, i32, i32, i32) {
    %c0_i32 = arith.constant 0 : i32
    %c0_i32_0 = arith.constant 0 : i32
    %c0_i32_1 = arith.constant 0 : i32
    %c0_i32_2 = arith.constant 0 : i32
    %c0_i32_3 = arith.constant 0 : i32
    return %c0_i32, %c0_i32_0, %c0_i32_1, %c0_i32_2 : i32, i32, i32, i32
  }
  func.func @transform_3(%arg0: i32) -> (i32, i32, i32, i32) {
    %c0_i32 = arith.constant 0 : i32
    %c0_i32_0 = arith.constant 0 : i32
    %c0_i32_1 = arith.constant 0 : i32
    %c0_i32_2 = arith.constant 0 : i32
    %c0_i32_3 = arith.constant 0 : i32
    return %c0_i32, %c0_i32_0, %c0_i32_1, %c0_i32_2 : i32, i32, i32, i32
  }
}

module attributes {stable_mosaic.version = 11 : i64} {
  func.func @_avgpool_kernel(%arg0: i32, %arg1: memref<2x1x1024xf32, #tpu.memory_space<vmem>>, %arg2: memref<2x1024xf32, #tpu.memory_space<vmem>>) attributes {dimension_semantics = [#tpu.dimension_semantics<arbitrary>], iteration_bounds = array<i64: 1>, scalar_prefetch = 0 : i64, scratch_operands = 0 : i64, tpu.core_type = #tpu.core_type<tc>, window_params = [{pipeline_mode = #tpu.pipeline_mode<synchronous>, transform_indices = @transform_0, window_bounds = array<i64: 2, 1, 1024>}, {pipeline_mode = #tpu.pipeline_mode<synchronous>, transform_indices = @transform_1, window_bounds = array<i64: 2, 1024>}]} {
    %c0 = arith.constant 0 : index
    %c0_0 = arith.constant 0 : index
    %c0_1 = arith.constant 0 : index
    %0 = vector.load %arg1[%c0, %c0_0, %c0_1] : memref<2x1x1024xf32, #tpu.memory_space<vmem>>, vector<2x1x1024xf32>
    %cst = arith.constant dense<0.000000e+00> : vector<2x1024xf32>
    %1 = vector.multi_reduction <add>, %0, %cst [1] : vector<2x1x1024xf32> to vector<2x1024xf32>
    %cst_2 = arith.constant 1.000000e+00 : f32
    %2 = vector.broadcast %cst_2 : f32 to vector<2x1024xf32>
    %3 = arith.mulf %1, %2 : vector<2x1024xf32>
    %c0_3 = arith.constant 0 : index
    %c0_4 = arith.constant 0 : index
    %4 = vector.load %arg2[%c0_3, %c0_4] : memref<2x1024xf32, #tpu.memory_space<vmem>>, vector<2x1024xf32>
    tpu.vector_store %arg2[%c0_3, %c0_4], %3 {strides = array<i32>} : memref<2x1024xf32, #tpu.memory_space<vmem>>, vector<2x1024xf32>,
    return
  }
  func.func @transform_0(%arg0: i32) -> (i32, i32, i32) {
    %c0_i32 = arith.constant 0 : i32
    %c0_i32_0 = arith.constant 0 : i32
    %c0_i32_1 = arith.constant 0 : i32
    %c0_i32_2 = arith.constant 0 : i32
    return %c0_i32, %c0_i32_0, %c0_i32_1 : i32, i32, i32
  }
  func.func @transform_1(%arg0: i32) -> (i32, i32) {
    %c0_i32 = arith.constant 0 : i32
    %c0_i32_0 = arith.constant 0 : i32
    %c0_i32_1 = arith.constant 0 : i32
    return %c0_i32, %c0_i32_0 : i32, i32
  }
}

module attributes {stable_mosaic.version = 11 : i64} {
  func.func @_matmul_kernel(%arg0: i32, %arg1: i32, %arg2: i32, %arg3: memref<8x256xbf16, #tpu.memory_space<vmem>>, %arg4: memref<256x256xbf16, #tpu.memory_space<vmem>>, %arg5: memref<1x256xf32, #tpu.memory_space<vmem>>, %arg6: memref<8x256xf32, #tpu.memory_space<vmem>>, %arg7: memref<8x256xf32, #tpu.memory_space<vmem>>) attributes {dimension_semantics = [#tpu.dimension_semantics<parallel>, #tpu.dimension_semantics<parallel>, #tpu.dimension_semantics<arbitrary>], iteration_bounds = array<i64: 1, 4, 1>, scalar_prefetch = 0 : i64, scratch_operands = 1 : i64, tpu.core_type = #tpu.core_type<tc>, window_params = [{transform_indices = @transform_0, window_bounds = array<i64: 8, 256>}, {transform_indices = @transform_1, window_bounds = array<i64: 256, 256>}, {transform_indices = @transform_2, window_bounds = array<i64: 1, 256>}, {transform_indices = @transform_3, window_bounds = array<i64: 8, 256>}]} {
    %c0_i32 = arith.constant 0 : i32
    %0 = arith.cmpi eq, %arg2, %c0_i32 : i32
    %1 = arith.extui %0 : i1 to i32
    %c0_i32_0 = arith.constant 0 : i32
    %2 = arith.cmpi ne, %1, %c0_i32_0 : i32
    scf.if %2 {
      %cst_10 = arith.constant 0.000000e+00 : f32
      %12 = vector.broadcast %cst_10 : f32 to vector<8x256xf32>
      %c0_11 = arith.constant 0 : index
      %c0_12 = arith.constant 0 : index
      %13 = vector.load %arg7[%c0_11, %c0_12] : memref<8x256xf32, #tpu.memory_space<vmem>>, vector<8x256xf32>
      tpu.vector_store %arg7[%c0_11, %c0_12], %12 {strides = array<i32>} : memref<8x256xf32, #tpu.memory_space<vmem>>, vector<8x256xf32>,
    } else {
    }
    %c0 = arith.constant 0 : index
    %c0_1 = arith.constant 0 : index
    %3 = vector.load %arg7[%c0, %c0_1] : memref<8x256xf32, #tpu.memory_space<vmem>>, vector<8x256xf32>
    %c0_2 = arith.constant 0 : index
    %c0_3 = arith.constant 0 : index
    %4 = vector.load %arg3[%c0_2, %c0_3] : memref<8x256xbf16, #tpu.memory_space<vmem>>, vector<8x256xbf16>
    %c0_4 = arith.constant 0 : index
    %c0_5 = arith.constant 0 : index
    %5 = vector.load %arg4[%c0_4, %c0_5] : memref<256x256xbf16, #tpu.memory_space<vmem>>, vector<256x256xbf16>
    %cst = arith.constant dense<0.000000e+00> : vector<8x256xf32>
    %6 = tpu.matmul %4, %5, %cst {dimension_numbers = #tpu.dot_dimension_numbers<[1], [0], [0], [1], [0, 0, 1, 1], [], []>} : vector<8x256xbf16>, vector<256x256xbf16>, vector<8x256xf32> -> vector<8x256xf32>
    %7 = arith.addf %3, %6 : vector<8x256xf32>
    %c0_6 = arith.constant 0 : index
    %c0_7 = arith.constant 0 : index
    %8 = vector.load %arg7[%c0_6, %c0_7] : memref<8x256xf32, #tpu.memory_space<vmem>>, vector<8x256xf32>
    tpu.vector_store %arg7[%c0_6, %c0_7], %7 {strides = array<i32>} : memref<8x256xf32, #tpu.memory_space<vmem>>, vector<8x256xf32>,
    %c0_i32_8 = arith.constant 0 : i32
    %9 = arith.cmpi eq, %arg2, %c0_i32_8 : i32
    %10 = arith.extui %9 : i1 to i32
    %c0_i32_9 = arith.constant 0 : i32
    %11 = arith.cmpi ne, %10, %c0_i32_9 : i32
    scf.if %11 {
      %c0_10 = arith.constant 0 : index
      %c0_11 = arith.constant 0 : index
      %12 = vector.load %arg7[%c0_10, %c0_11] : memref<8x256xf32, #tpu.memory_space<vmem>>, vector<8x256xf32>
      %c0_12 = arith.constant 0 : index
      %c0_13 = arith.constant 0 : index
      %13 = vector.load %arg5[%c0_12, %c0_13] : memref<1x256xf32, #tpu.memory_space<vmem>>, vector<1x256xf32>
      %14 = vector.broadcast %13 : vector<1x256xf32> to vector<8x256xf32>
      %15 = arith.addf %12, %14 : vector<8x256xf32>
      %cst_14 = arith.constant 0.000000e+00 : f32
      %16 = vector.broadcast %cst_14 : f32 to vector<8x256xf32>
      %17 = arith.maximumf %15, %16 : vector<8x256xf32>
      %c0_15 = arith.constant 0 : index
      %c0_16 = arith.constant 0 : index
      %18 = vector.load %arg6[%c0_15, %c0_16] : memref<8x256xf32, #tpu.memory_space<vmem>>, vector<8x256xf32>
      tpu.vector_store %arg6[%c0_15, %c0_16], %17 {strides = array<i32>} : memref<8x256xf32, #tpu.memory_space<vmem>>, vector<8x256xf32>,
    } else {
    }
    return
  }
  func.func @transform_0(%arg0: i32, %arg1: i32, %arg2: i32) -> (i32, i32) {
    %c0_i32 = arith.constant 0 : i32
    return %arg0, %arg2 : i32, i32
  }
  func.func @transform_1(%arg0: i32, %arg1: i32, %arg2: i32) -> (i32, i32) {
    %c0_i32 = arith.constant 0 : i32
    return %arg2, %arg1 : i32, i32
  }
  func.func @transform_2(%arg0: i32, %arg1: i32, %arg2: i32) -> (i32, i32) {
    %c0_i32 = arith.constant 0 : i32
    %c0_i32_0 = arith.constant 0 : i32
    return %c0_i32, %arg1 : i32, i32
  }
  func.func @transform_3(%arg0: i32, %arg1: i32, %arg2: i32) -> (i32, i32) {
    %c0_i32 = arith.constant 0 : i32
    return %arg0, %arg1 : i32, i32
  }
}

module attributes {stable_mosaic.version = 11 : i64} {
  func.func @_matmul_kernel(%arg0: i32, %arg1: i32, %arg2: i32, %arg3: memref<8x512xbf16, #tpu.memory_space<vmem>>, %arg4: memref<512x128xbf16, #tpu.memory_space<vmem>>, %arg5: memref<1x128xf32, #tpu.memory_space<vmem>>, %arg6: memref<8x128xf32, #tpu.memory_space<vmem>>, %arg7: memref<8x128xf32, #tpu.memory_space<vmem>>) attributes {dimension_semantics = [#tpu.dimension_semantics<parallel>, #tpu.dimension_semantics<parallel>, #tpu.dimension_semantics<arbitrary>], iteration_bounds = array<i64: 1, 1, 2>, scalar_prefetch = 0 : i64, scratch_operands = 1 : i64, tpu.core_type = #tpu.core_type<tc>, window_params = [{transform_indices = @transform_0, window_bounds = array<i64: 8, 512>}, {transform_indices = @transform_1, window_bounds = array<i64: 512, 128>}, {transform_indices = @transform_2, window_bounds = array<i64: 1, 128>}, {transform_indices = @transform_3, window_bounds = array<i64: 8, 128>}]} {
    %c0_i32 = arith.constant 0 : i32
    %0 = arith.cmpi eq, %arg2, %c0_i32 : i32
    %1 = arith.extui %0 : i1 to i32
    %c0_i32_0 = arith.constant 0 : i32
    %2 = arith.cmpi ne, %1, %c0_i32_0 : i32
    scf.if %2 {
      %cst_9 = arith.constant 0.000000e+00 : f32
      %12 = vector.broadcast %cst_9 : f32 to vector<8x128xf32>
      %c0_10 = arith.constant 0 : index
      %c0_11 = arith.constant 0 : index
      %13 = vector.load %arg7[%c0_10, %c0_11] : memref<8x128xf32, #tpu.memory_space<vmem>>, vector<8x128xf32>
      tpu.vector_store %arg7[%c0_10, %c0_11], %12 {strides = array<i32>} : memref<8x128xf32, #tpu.memory_space<vmem>>, vector<8x128xf32>,
    } else {
    }
    %c0 = arith.constant 0 : index
    %c0_1 = arith.constant 0 : index
    %3 = vector.load %arg7[%c0, %c0_1] : memref<8x128xf32, #tpu.memory_space<vmem>>, vector<8x128xf32>
    %c0_2 = arith.constant 0 : index
    %c0_3 = arith.constant 0 : index
    %4 = vector.load %arg3[%c0_2, %c0_3] : memref<8x512xbf16, #tpu.memory_space<vmem>>, vector<8x512xbf16>
    %c0_4 = arith.constant 0 : index
    %c0_5 = arith.constant 0 : index
    %5 = vector.load %arg4[%c0_4, %c0_5] : memref<512x128xbf16, #tpu.memory_space<vmem>>, vector<512x128xbf16>
    %cst = arith.constant dense<0.000000e+00> : vector<8x128xf32>
    %6 = tpu.matmul %4, %5, %cst {dimension_numbers = #tpu.dot_dimension_numbers<[1], [0], [0], [1], [0, 0, 1, 1], [], []>} : vector<8x512xbf16>, vector<512x128xbf16>, vector<8x128xf32> -> vector<8x128xf32>
    %7 = arith.addf %3, %6 : vector<8x128xf32>
    %c0_6 = arith.constant 0 : index
    %c0_7 = arith.constant 0 : index
    %8 = vector.load %arg7[%c0_6, %c0_7] : memref<8x128xf32, #tpu.memory_space<vmem>>, vector<8x128xf32>
    tpu.vector_store %arg7[%c0_6, %c0_7], %7 {strides = array<i32>} : memref<8x128xf32, #tpu.memory_space<vmem>>, vector<8x128xf32>,
    %c1_i32 = arith.constant 1 : i32
    %9 = arith.cmpi eq, %arg2, %c1_i32 : i32
    %10 = arith.extui %9 : i1 to i32
    %c0_i32_8 = arith.constant 0 : i32
    %11 = arith.cmpi ne, %10, %c0_i32_8 : i32
    scf.if %11 {
      %c0_9 = arith.constant 0 : index
      %c0_10 = arith.constant 0 : index
      %12 = vector.load %arg7[%c0_9, %c0_10] : memref<8x128xf32, #tpu.memory_space<vmem>>, vector<8x128xf32>
      %c0_11 = arith.constant 0 : index
      %c0_12 = arith.constant 0 : index
      %13 = vector.load %arg5[%c0_11, %c0_12] : memref<1x128xf32, #tpu.memory_space<vmem>>, vector<1x128xf32>
      %14 = vector.broadcast %13 : vector<1x128xf32> to vector<8x128xf32>
      %15 = arith.addf %12, %14 : vector<8x128xf32>
      %c0_13 = arith.constant 0 : index
      %c0_14 = arith.constant 0 : index
      %16 = vector.load %arg6[%c0_13, %c0_14] : memref<8x128xf32, #tpu.memory_space<vmem>>, vector<8x128xf32>
      tpu.vector_store %arg6[%c0_13, %c0_14], %15 {strides = array<i32>} : memref<8x128xf32, #tpu.memory_space<vmem>>, vector<8x128xf32>,
    } else {
    }
    return
  }
  func.func @transform_0(%arg0: i32, %arg1: i32, %arg2: i32) -> (i32, i32) {
    %c0_i32 = arith.constant 0 : i32
    return %arg0, %arg2 : i32, i32
  }
  func.func @transform_1(%arg0: i32, %arg1: i32, %arg2: i32) -> (i32, i32) {
    %c0_i32 = arith.constant 0 : i32
    return %arg2, %arg1 : i32, i32
  }
  func.func @transform_2(%arg0: i32, %arg1: i32, %arg2: i32) -> (i32, i32) {
    %c0_i32 = arith.constant 0 : i32
    %c0_i32_0 = arith.constant 0 : i32
    return %c0_i32, %arg1 : i32, i32
  }
  func.func @transform_3(%arg0: i32, %arg1: i32, %arg2: i32) -> (i32, i32) {
    %c0_i32 = arith.constant 0 : i32
    return %arg0, %arg1 : i32, i32
  }
}

</mosaic_0001>

<bundles_post_ra>
// kernel: _lambda_.59
= control target key start
LH: loop header
LB: loop body
LE: loop exit
PB: predicated region body
PF: predicated region fallthrough
CT: control target
= control target key end

     0   :  { %s1144_s12 = smov 0   ;;  %s1146_s13 = smov 0   ;;  %s1297_s0 = inlined_call_operand.vmem [shape: bf16[512,128], index: 0, kind: input, shape index: {}]   ;;  %s1298_s1 = inlined_call_operand.vmem [shape: bf16[128,128], index: 1, kind: input, shape index: {}]   ;;  %s1299_s2 = inlined_call_operand.vmem [shape: f32[1,128], index: 2, kind: input, shape index: {}]   ;;  %s1300_s3 = inlined_call_operand.vmem [shape: f32[512,128], index: 3, kind: output, shape index: {}]  }
   0x1   :  { %s1148_s14 = smov 0  }
   0x2 LB: > { %s32_s15 = sadd.s32 1, %s1118_s13  ;;  %p924_p0 = scmp.ge.s32.totalorder %s1122_s14, 1  ;;  %s1122_s14 = sphi %s1148_s14, %s13_s14   ;;  %s1118_s13 = sphi %s1146_s13, %s1302_s13   ;;  %s1114_s12 = sphi %s1144_s12, %s1301_s12  }
   0x3   : > { %p34_p1 = scmp.ge.s32.totalorder %s32_s15, 2  ;;  %p188_p2 = scmp.lt.s32.totalorder %s1122_s14, 3 }
   0x5   : > { %s1304_s15 = smov (%p34_p1, %s32_s15), 0  ;;  %p189_p3 = pnand %p924_p0, %p188_p2 }
   0x6   : > { %s925_s24 = sshll.u32 (!%p189_p3), %s1114_s12, 5 }
   0x7   : > { %192 = sbr.rel (%p189_p3) target bundleno = 239 (0xef), region = 32  ;;  %p230_p4 = scmp.lt.s32.totalorder (!%p189_p3), %s925_s24, 63 }
   0xc   : > { %v1050_v0 = vld [vmem:[%s1298_s1 + $0x38] sm:$0xff]  ;;  %v1049_v1 = vld [vmem:[%s1298_s1 + $0x30] sm:$0xff]  ;;  %v1048_v2 = vld [vmem:[%s1298_s1 + $0x28] sm:$0xff]  ;;  %s1306_s24 = smov (!%p230_p4, %s925_s24), 63 }
   0xd   : > { %519 = vmatpush.bf16.msra.mxu0 %v1050_v0  ;;  %1051 = vmatpush.bf16.msra.mxu1 %v1050_v0  ;;  %v1047_v3 = vld [vmem:[%s1298_s1 + $0x20] sm:$0xff]  ;;  %v1046_v4 = vld [vmem:[%s1298_s1 + $0x18] sm:$0xff]  ;;  %v1045_v5 = vld [vmem:[%s1298_s1 + $0x10] sm:$0xff]  ;;  %s926_s4 = sshll.u32 %s1306_s24, 2  ;;  %s928_s12 = sshll.u32 %s1306_s24, 3 }
   0xe   : > { %1052 = vmatpush.bf16.msra.mxu2 %v1050_v0  ;;  %1053 = vmatpush.bf16.msra.mxu3 %v1050_v0  ;;  %v1044_v6 = vld [vmem:[%s1298_s1 + $0x8] sm:$0xff]  ;;  %v1043_v7 = vld [vmem:[%s1298_s1] sm:$0xff]  ;;  %s1195_s9 = scalar_lea.vmem %s1297_s0, %s926_s4  ;;  %s1224_s18 = scalar_lea.vmem %s1300_s3, %s928_s12 }
   0xf   : > { %v1027_v8 = vld [vmem:[%s1195_s9] sm:$0xff]  ;;  %v1028_v12 = vld [vmem:[%s1195_s9 + $0x8] sm:$0xff]  ;;  %v1029_v16 = vld [vmem:[%s1195_s9 + $0x10] sm:$0xff] }
  0x10   : > { %v1031_v9 = vld [vmem:[%s1195_s9 + $0x20] sm:$0xff]  ;;  %v1032_v13 = vld [vmem:[%s1195_s9 + $0x28] sm:$0xff]  ;;  %v1033_v17 = vld [vmem:[%s1195_s9 + $0x30] sm:$0xff] }
  0x11   : > { %520 = vmatpush.bf16.msra.mxu0 %v1049_v1  ;;  %1054 = vmatpush.bf16.msra.mxu1 %v1049_v1  ;;  %v1035_v10 = vld [vmem:[%s1195_s9 + $0x40] sm:$0xff]  ;;  %v1036_v14 = vld [vmem:[%s1195_s9 + $0x48] sm:$0xff]  ;;  %v1037_v18 = vld [vmem:[%s1195_s9 + $0x50] sm:$0xff] }
  0x12   : > { %1055 = vmatpush.bf16.msra.mxu2 %v1049_v1  ;;  %1056 = vmatpush.bf16.msra.mxu3 %v1049_v1  ;;  %v1039_v11 = vld [vmem:[%s1195_s9 + $0x60] sm:$0xff]  ;;  %v1040_v15 = vld [vmem:[%s1195_s9 + $0x68] sm:$0xff]  ;;  %v1041_v19 = vld [vmem:[%s1195_s9 + $0x70] sm:$0xff] }
  0x13   : > { %v1030_v20 = vld [vmem:[%s1195_s9 + $0x18] sm:$0xff]  ;;  %v1216_v24 = vld [vmem:[%s1299_s2] ss:$0 sm:$0xff] }
  0x14   : > { %v1034_v21 = vld [vmem:[%s1195_s9 + $0x38] sm:$0xff] }
  0x15   : > { %521 = vmatpush.bf16.msra.mxu0 %v1048_v2  ;;  %1057 = vmatpush.bf16.msra.mxu1 %v1048_v2  ;;  %v1038_v22 = vld [vmem:[%s1195_s9 + $0x58] sm:$0xff] }
  0x16   : > { %1058 = vmatpush.bf16.msra.mxu2 %v1048_v2  ;;  %1059 = vmatpush.bf16.msra.mxu3 %v1048_v2  ;;  %v1042_v23 = vld [vmem:[%s1195_s9 + $0x78] sm:$0xff] }
  0x19   : > { %522 = vmatpush.bf16.msra.mxu0 %v1047_v3  ;;  %1060 = vmatpush.bf16.msra.mxu1 %v1047_v3 }
  0x1a   : > { %1061 = vmatpush.bf16.msra.mxu2 %v1047_v3  ;;  %1062 = vmatpush.bf16.msra.mxu3 %v1047_v3 }
  0x1d   : > { %523 = vmatpush.bf16.msra.mxu0 %v1046_v4  ;;  %1063 = vmatpush.bf16.msra.mxu1 %v1046_v4 }
  0x1e   : > { %1064 = vmatpush.bf16.msra.mxu2 %v1046_v4  ;;  %1065 = vmatpush.bf16.msra.mxu3 %v1046_v4 }
  0x21   : > { %524 = vmatpush.bf16.msra.mxu0 %v1045_v5  ;;  %1066 = vmatpush.bf16.msra.mxu1 %v1045_v5 }
  0x22   : > { %1067 = vmatpush.bf16.msra.mxu2 %v1045_v5  ;;  %1068 = vmatpush.bf16.msra.mxu3 %v1045_v5 }
  0x25   : > { %525 = vmatpush.bf16.msra.mxu0 %v1044_v6  ;;  %1069 = vmatpush.bf16.msra.mxu1 %v1044_v6 }
  0x26   : > { %1070 = vmatpush.bf16.msra.mxu2 %v1044_v6  ;;  %1071 = vmatpush.bf16.msra.mxu3 %v1044_v6 }
  0x29   : > { %526 = vmatpush.bf16.msra.mxu0 %v1043_v7  ;;  %1072 = vmatpush.bf16.msra.mxu1 %v1043_v7 }
  0x2a   : > { %1073 = vmatpush.bf16.msra.mxu2 %v1043_v7  ;;  %1074 = vmatpush.bf16.msra.mxu3 %v1043_v7 }
  0x2c   : > { %527 = vmatmul.bf16.vlgmr.msra.gmra.mxu0 %v1027_v8  ;;  %547 = vmatmul.bf16.vlgmr.msra.gmra.mxu1 %v1031_v9 }
  0x2d   : > { %567 = vmatmul.bf16.vlgmr.msra.gmra.mxu2 %v1035_v10  ;;  %587 = vmatmul.bf16.vlgmr.msra.gmra.mxu3 %v1039_v11 }
  0x3c   : > { %532 = vmatmul.bf16.gmra.mxu0 %v1028_v12  ;;  %552 = vmatmul.bf16.gmra.mxu1 %v1032_v13 }
  0x3d   : > { %572 = vmatmul.bf16.gmra.mxu2 %v1036_v14  ;;  %592 = vmatmul.bf16.gmra.mxu3 %v1040_v15 }
  0x4c   : > { %537 = vmatmul.bf16.gmra.mxu0 %v1029_v16  ;;  %557 = vmatmul.bf16.gmra.mxu1 %v1033_v17 }
  0x4d   : > { %577 = vmatmul.bf16.gmra.mxu2 %v1037_v18  ;;  %597 = vmatmul.bf16.gmra.mxu3 %v1041_v19 }
  0x5c   : > { %542 = vmatmul.bf16.gmra.mxu0 %v1030_v20  ;;  %562 = vmatmul.bf16.gmra.mxu1 %v1034_v21 }
  0x5d   : > { %582 = vmatmul.bf16.gmra.mxu2 %v1038_v22  ;;  %602 = vmatmul.bf16.gmra.mxu3 %v1042_v23 }
  0xa9   : > { %v528_v25 = vpop.f32.mrf.mxu0  ;;  %v548_v26 = vpop.f32.mrf.mxu1 }
  0xaa   : > { %v711_v27 = vadd.f32 %v1216_v24, %v528_v25  ;;  %v719_v28 = vadd.f32 %v1216_v24, %v548_v26 }
  0xac   : > { %v743_v29 = vmax.f32 %v711_v27, 0.0  ;;  %v751_v30 = vmax.f32 %v719_v28, 0.0 }
  0xae   : > { %775 = vst [vmem:[%s1224_s18] sm:$0xff] %v743_v29 }
  0xaf   : > { %783 = vst [vmem:[%s1224_s18 + $0x40] sm:$0xff] %v751_v30 }
  0xb0   : > { %v568_v31 = vpop.f32.mrf.mxu2  ;;  %v588_v32 = vpop.f32.mrf.mxu3 }
  0xb1   : > { %v727_v33 = vadd.f32 %v1216_v24, %v568_v31  ;;  %v735_v34 = vadd.f32 %v1216_v24, %v588_v32  ;;  %v530_v35 = vpop.f32.mrf.mxu0  ;;  %v550_v36 = vpop.f32.mrf.mxu1 }
  0xb2   : > { %v712_v37 = vadd.f32 %v1216_v24, %v530_v35  ;;  %v720_v38 = vadd.f32 %v1216_v24, %v550_v36 }
  0xb3   : > { %v759_v39 = vmax.f32 %v727_v33, 0.0  ;;  %v767_v40 = vmax.f32 %v735_v34, 0.0 }
  0xb4   : > { %v744_v41 = vmax.f32 %v712_v37, 0.0  ;;  %v752_v42 = vmax.f32 %v720_v38, 0.0 }
  0xb5   : > { %791 = vst [vmem:[%s1224_s18 + $0x80] sm:$0xff] %v759_v39 }
  0xb6   : > { %799 = vst [vmem:[%s1224_s18 + $0xc0] sm:$0xff] %v767_v40 }
  0xb7   : > { %776 = vst [vmem:[%s1224_s18 + $0x8] sm:$0xff] %v744_v41 }
  0xb8   : > { %784 = vst [vmem:[%s1224_s18 + $0x48] sm:$0xff] %v752_v42  ;;  %v570_v43 = vpop.f32.mrf.mxu2  ;;  %v590_v44 = vpop.f32.mrf.mxu3 }
  0xb9   : > { %v728_v45 = vadd.f32 %v1216_v24, %v570_v43  ;;  %v736_v46 = vadd.f32 %v1216_v24, %v590_v44  ;;  %v533_v47 = vpop.f32.mrf.mxu0  ;;  %v553_v48 = vpop.f32.mrf.mxu1 }
  0xba   : > { %v713_v49 = vadd.f32 %v1216_v24, %v533_v47  ;;  %v721_v50 = vadd.f32 %v1216_v24, %v553_v48 }
  0xbb   : > { %v760_v51 = vmax.f32 %v728_v45, 0.0  ;;  %v768_v52 = vmax.f32 %v736_v46, 0.0 }
  0xbc   : > { %v745_v53 = vmax.f32 %v713_v49, 0.0  ;;  %v753_v54 = vmax.f32 %v721_v50, 0.0 }
  0xbd   : > { %792 = vst [vmem:[%s1224_s18 + $0x88] sm:$0xff] %v760_v51 }
  0xbe   : > { %800 = vst [vmem:[%s1224_s18 + $0xc8] sm:$0xff] %v768_v52 }
  0xbf   : > { %777 = vst [vmem:[%s1224_s18 + $0x10] sm:$0xff] %v745_v53 }
  0xc0   : > { %785 = vst [vmem:[%s1224_s18 + $0x50] sm:$0xff] %v753_v54  ;;  %v573_v55 = vpop.f32.mrf.mxu2  ;;  %v593_v56 = vpop.f32.mrf.mxu3 }
  0xc1   : > { %v729_v57 = vadd.f32 %v1216_v24, %v573_v55  ;;  %v737_v58 = vadd.f32 %v1216_v24, %v593_v56  ;;  %v535_v59 = vpop.f32.mrf.mxu0  ;;  %v555_v60 = vpop.f32.mrf.mxu1 }
  0xc2   : > { %v714_v61 = vadd.f32 %v1216_v24, %v535_v59  ;;  %v722_v62 = vadd.f32 %v1216_v24, %v555_v60 }
  0xc3   : > { %v761_v63 = vmax.f32 %v729_v57, 0.0  ;;  %v769_v0 = vmax.f32 %v737_v58, 0.0 }
  0xc4   : > { %v746_v1 = vmax.f32 %v714_v61, 0.0  ;;  %v754_v2 = vmax.f32 %v722_v62, 0.0 }
  0xc5   : > { %793 = vst [vmem:[%s1224_s18 + $0x90] sm:$0xff] %v761_v63 }
  0xc6   : > { %801 = vst [vmem:[%s1224_s18 + $0xd0] sm:$0xff] %v769_v0 }
  0xc7   : > { %778 = vst [vmem:[%s1224_s18 + $0x18] sm:$0xff] %v746_v1 }
  0xc8   : > { %786 = vst [vmem:[%s1224_s18 + $0x58] sm:$0xff] %v754_v2  ;;  %v575_v3 = vpop.f32.mrf.mxu2  ;;  %v595_v4 = vpop.f32.mrf.mxu3 }
  0xc9   : > { %v730_v5 = vadd.f32 %v1216_v24, %v575_v3  ;;  %v738_v6 = vadd.f32 %v1216_v24, %v595_v4  ;;  %v538_v7 = vpop.f32.mrf.mxu0  ;;  %v558_v8 = vpop.f32.mrf.mxu1 }
  0xca   : > { %v715_v9 = vadd.f32 %v1216_v24, %v538_v7  ;;  %v723_v10 = vadd.f32 %v1216_v24, %v558_v8 }
  0xcb   : > { %v762_v11 = vmax.f32 %v730_v5, 0.0  ;;  %v770_v12 = vmax.f32 %v738_v6, 0.0 }
  0xcc   : > { %v747_v13 = vmax.f32 %v715_v9, 0.0  ;;  %v755_v14 = vmax.f32 %v723_v10, 0.0 }
  0xcd   : > { %794 = vst [vmem:[%s1224_s18 + $0x98] sm:$0xff] %v762_v11 }
  0xce   : > { %802 = vst [vmem:[%s1224_s18 + $0xd8] sm:$0xff] %v770_v12 }
  0xcf   : > { %779 = vst [vmem:[%s1224_s18 + $0x20] sm:$0xff] %v747_v13 }
  0xd0   : > { %787 = vst [vmem:[%s1224_s18 + $0x60] sm:$0xff] %v755_v14  ;;  %v578_v15 = vpop.f32.mrf.mxu2  ;;  %v598_v16 = vpop.f32.mrf.mxu3 }
  0xd1   : > { %v731_v17 = vadd.f32 %v1216_v24, %v578_v15  ;;  %v739_v18 = vadd.f32 %v1216_v24, %v598_v16  ;;  %v540_v19 = vpop.f32.mrf.mxu0  ;;  %v560_v20 = vpop.f32.mrf.mxu1 }
  0xd2   : > { %v716_v21 = vadd.f32 %v1216_v24, %v540_v19  ;;  %v724_v22 = vadd.f32 %v1216_v24, %v560_v20 }
  0xd3   : > { %v763_v23 = vmax.f32 %v731_v17, 0.0  ;;  %v771_v25 = vmax.f32 %v739_v18, 0.0 }
  0xd4   : > { %v748_v26 = vmax.f32 %v716_v21, 0.0  ;;  %v756_v27 = vmax.f32 %v724_v22, 0.0 }
  0xd5   : > { %795 = vst [vmem:[%s1224_s18 + $0xa0] sm:$0xff] %v763_v23 }
  0xd6   : > { %803 = vst [vmem:[%s1224_s18 + $0xe0] sm:$0xff] %v771_v25 }
  0xd7   : > { %780 = vst [vmem:[%s1224_s18 + $0x28] sm:$0xff] %v748_v26 }
  0xd8   : > { %788 = vst [vmem:[%s1224_s18 + $0x68] sm:$0xff] %v756_v27  ;;  %v580_v28 = vpop.f32.mrf.mxu2  ;;  %v600_v29 = vpop.f32.mrf.mxu3 }
  0xd9   : > { %v732_v30 = vadd.f32 %v1216_v24, %v580_v28  ;;  %v740_v31 = vadd.f32 %v1216_v24, %v600_v29  ;;  %v543_v32 = vpop.f32.mrf.mxu0  ;;  %v563_v33 = vpop.f32.mrf.mxu1 }
  0xda   : > { %v717_v34 = vadd.f32 %v1216_v24, %v543_v32  ;;  %v725_v35 = vadd.f32 %v1216_v24, %v563_v33 }
  0xdb   : > { %v764_v36 = vmax.f32 %v732_v30, 0.0  ;;  %v772_v37 = vmax.f32 %v740_v31, 0.0 }
  0xdc   : > { %v749_v38 = vmax.f32 %v717_v34, 0.0  ;;  %v757_v39 = vmax.f32 %v725_v35, 0.0 }
  0xdd   : > { %796 = vst [vmem:[%s1224_s18 + $0xa8] sm:$0xff] %v764_v36 }
  0xde   : > { %804 = vst [vmem:[%s1224_s18 + $0xe8] sm:$0xff] %v772_v37 }
  0xdf   : > { %781 = vst [vmem:[%s1224_s18 + $0x30] sm:$0xff] %v749_v38 }
  0xe0   : > { %789 = vst [vmem:[%s1224_s18 + $0x70] sm:$0xff] %v757_v39  ;;  %v583_v40 = vpop.f32.mrf.mxu2  ;;  %v603_v41 = vpop.f32.mrf.mxu3 }
  0xe1   : > { %v733_v42 = vadd.f32 %v1216_v24, %v583_v40  ;;  %v741_v43 = vadd.f32 %v1216_v24, %v603_v41  ;;  %v545_v44 = vpop.f32.mrf.mxu0  ;;  %v565_v45 = vpop.f32.mrf.mxu1 }
  0xe2   : > { %v718_v46 = vadd.f32 %v1216_v24, %v545_v44  ;;  %v726_v47 = vadd.f32 %v1216_v24, %v565_v45 }
  0xe3   : > { %v765_v48 = vmax.f32 %v733_v42, 0.0  ;;  %v773_v49 = vmax.f32 %v741_v43, 0.0 }
  0xe4   : > { %v750_v50 = vmax.f32 %v718_v46, 0.0  ;;  %v758_v51 = vmax.f32 %v726_v47, 0.0 }
  0xe5   : > { %797 = vst [vmem:[%s1224_s18 + $0xb0] sm:$0xff] %v765_v48 }
  0xe6   : > { %805 = vst [vmem:[%s1224_s18 + $0xf0] sm:$0xff] %v773_v49 }
  0xe7   : > { %782 = vst [vmem:[%s1224_s18 + $0x38] sm:$0xff] %v750_v50 }
  0xe8   : > { %790 = vst [vmem:[%s1224_s18 + $0x78] sm:$0xff] %v758_v51  ;;  %v585_v52 = vpop.f32.mrf.mxu2  ;;  %v605_v53 = vpop.f32.mrf.mxu3 }
  0xe9   : > { %v734_v54 = vadd.f32 %v1216_v24, %v585_v52  ;;  %v742_v55 = vadd.f32 %v1216_v24, %v605_v53 }
  0xeb   : > { %v766_v56 = vmax.f32 %v734_v54, 0.0  ;;  %v774_v57 = vmax.f32 %v742_v55, 0.0 }
  0xed   : > { %798 = vst [vmem:[%s1224_s18 + $0xb8] sm:$0xff] %v766_v56 }
  0xee   : > { %806 = vst [vmem:[%s1224_s18 + $0xf8] sm:$0xff] %v774_v57 }
  0xef PF: > { %s13_s14 = sadd.s32 1, %s1122_s14   ;;  %s1301_s12 = smov %s1118_s13 }
  0xf0   : > { %p10_p5 = scmp.ge.s32.totalorder %s13_s14, 4   ;;  %s1302_s13 = smov %s1304_s15 }
  0xf2   :  { %12 = sbr.rel (!%p10_p5) target bundleno = 2 (0x2), region = 76 }

// kernel: _lambda_.60
= control target key start
LH: loop header
LB: loop body
LE: loop exit
PB: predicated region body
PF: predicated region fallthrough
CT: control target
= control target key end

     0   :  { %vm285_vm0 = vcmask 195584   ;;  %s914_s0 = inlined_call_operand.vmem [shape: f32[8,9,9,24], index: 0, kind: input, shape index: {}]   ;;  %s915_s1 = inlined_call_operand.vmem [shape: f32[2,8,8,24], index: 1, kind: output, shape index: {}]  }
   0x1   :  { %v8_v0 = vld [vmem:[%s914_s0] sm:$0xff]  ;;  %v370_v5 = vld [vmem:[%s914_s0 + $0x10] sm:$0xff] }
   0x2   :  { %v306_v1 = vld [vmem:[%s914_s0 + $0x120] sm:$0xff]  ;;  %v446_v6 = vld [vmem:[%s914_s0 + $0x130] sm:$0xff] }
   0x3   :  { %v57_v2 = vld [vmem:[%s914_s0 + $0x1] sm:$0xff]  ;;  %v41_v3 = vmax.f32 %v8_v0, %v306_v1  ;;  %v402_v7 = vld [vmem:[%s914_s0 + $0x11] sm:$0xff]  ;;  %v42_v10 = vmax.f32 %v370_v5, %v446_v6 }
   0x4   :  { %v322_v4 = vld [vmem:[%s914_s0 + $0x240] sm:$0xff]  ;;  %v323_v11 = vld [vmem:[%s914_s0 + $0x250] sm:$0xff] }
   0x5   :  { %v73_v8 = vmax.f32 %v41_v3, %v57_v2  ;;  %v338_v9 = vld [vmem:[%s914_s0 + $0x360] sm:$0xff]  ;;  %v74_v17 = vmax.f32 %v42_v10, %v402_v7  ;;  %v339_v18 = vld [vmem:[%s914_s0 + $0x370] sm:$0xff] }
   0x6   :  { %v371_v12 = vld [vmem:[%s914_s0 + $0x20] sm:$0xff]  ;;  %v372_v21 = vld [vmem:[%s914_s0 + $0x30] sm:$0xff] }
   0x7   :  { %v464_v13 = vld [vmem:[%s914_s0 + $0x140] sm:$0xff]  ;;  %v106_v15 = vmax.f32 %v73_v8, %v322_v4  ;;  %v487_v22 = vld [vmem:[%s914_s0 + $0x150] sm:$0xff]  ;;  %v107_v25 = vmax.f32 %v74_v17, %v323_v11 }
   0x8   :  { %v469_v14 = vld [vmem:[%s914_s0 + $0x21] sm:$0xff]  ;;  %v43_v19 = vmax.f32 %v371_v12, %v464_v13  ;;  %v492_v23 = vld [vmem:[%s914_s0 + $0x31] sm:$0xff]  ;;  %v44_v29 = vmax.f32 %v372_v21, %v487_v22 }
   0x9   :  { %v354_v16 = vld [vmem:[%s914_s0 + $0x241] sm:$0xff]  ;;  %v139_v24 = vmax.f32 %v106_v15, %v338_v9  ;;  %v355_v26 = vld [vmem:[%s914_s0 + $0x251] sm:$0xff]  ;;  %v140_v34 = vmax.f32 %v107_v25, %v339_v18 }
   0xa   :  { %v324_v20 = vld [vmem:[%s914_s0 + $0x260] sm:$0xff]  ;;  %v75_v27 = vmax.f32 %v43_v19, %v469_v14  ;;  %v325_v30 = vld [vmem:[%s914_s0 + $0x270] sm:$0xff]  ;;  %v76_v37 = vmax.f32 %v44_v29, %v492_v23 }
   0xb   :  { %v340_v28 = vld [vmem:[%s914_s0 + $0x380] sm:$0xff]  ;;  %v171_v33 = vmax.f32 %v139_v24, %v354_v16  ;;  %v341_v39 = vld [vmem:[%s914_s0 + $0x390] sm:$0xff]  ;;  %v172_v44 = vmax.f32 %v140_v34, %v355_v26 }
   0xc   :  { %v373_v31 = vld [vmem:[%s914_s0 + $0x40] sm:$0xff]  ;;  %v108_v35 = vmax.f32 %v75_v27, %v324_v20  ;;  %v374_v41 = vld [vmem:[%s914_s0 + $0x50] sm:$0xff]  ;;  %v109_v46 = vmax.f32 %v76_v37, %v325_v30 }
   0xd   :  { %v511_v32 = vld [vmem:[%s914_s0 + $0x160] sm:$0xff]  ;;  %v532_v42 = vld [vmem:[%s914_s0 + $0x170] sm:$0xff]  ;;  %v204_v43 = vmax.f32 %v171_v33, %v370_v5  ;;  %v205_v55 = vmax.f32 %v172_v44, %v371_v12 }
   0xe   :  { %v356_v36 = vld [vmem:[%s914_s0 + $0x261] sm:$0xff]  ;;  %v45_v40 = vmax.f32 %v373_v31, %v511_v32  ;;  %v141_v45 = vmax.f32 %v108_v35, %v340_v28  ;;  %v540_v48 = vld [vmem:[%s914_s0 + $0x51] sm:$0xff]  ;;  %v46_v51 = vmax.f32 %v374_v41, %v532_v42  ;;  %v142_v57 = vmax.f32 %v109_v46, %v341_v39 }
   0xf   :  { %v520_v38 = vld [vmem:[%s914_s0 + $0x41] sm:$0xff]  ;;  %v357_v49 = vld [vmem:[%s914_s0 + $0x271] sm:$0xff]  ;;  %v237_v54 = vmax.f32 %v204_v43, %v446_v6  ;;  %v238_v4 = vmax.f32 %v205_v55, %v464_v13 }
  0x10   :  { %v326_v47 = vld [vmem:[%s914_s0 + $0x280] sm:$0xff]  ;;  %v77_v50 = vmax.f32 %v45_v40, %v520_v38  ;;  %v173_v56 = vmax.f32 %v141_v45, %v356_v36  ;;  %v327_v59 = vld [vmem:[%s914_s0 + $0x290] sm:$0xff]  ;;  %v78_v63 = vmax.f32 %v46_v51, %v540_v48  ;;  %v174_v6 = vmax.f32 %v142_v57, %v357_v49 }
  0x11   :  { %v550_v52 = vld [vmem:[%s914_s0 + $0x60] sm:$0xff]  ;;  %v578_v1 = vld [vmem:[%s914_s0 + $0x70] sm:$0xff]  ;;  %v269_v3 = vmax.f32 %v237_v54, %v402_v7  ;;  %v270_v17 = vmax.f32 %v238_v4, %v469_v14 }
  0x12   :  { %v555_v53 = vld [vmem:[%s914_s0 + $0x180] sm:$0xff]  ;;  %v110_v61 = vmax.f32 %v77_v50, %v326_v47  ;;  %v583_v2 = vld [vmem:[%s914_s0 + $0x190] sm:$0xff]  ;;  %v206_v5 = vmax.f32 %v173_v56, %v372_v21  ;;  %v111_v12 = vmax.f32 %v78_v63, %v327_v59  ;;  %v207_v19 = vmax.f32 %v174_v6, %v373_v31 }
  0x13   :  { %v342_v58 = vld [vmem:[%s914_s0 + $0x3a0] sm:$0xff]  ;;  %v47_v0 = vmax.f32 %v550_v52, %v555_v53  ;;  %v343_v8 = vld [vmem:[%s914_s0 + $0x3b0] sm:$0xff]  ;;  %v48_v16 = vmax.f32 %v578_v1, %v583_v2  ;;  %286 = vst.msk [vmem:[%s915_s1] sm:$0xff] %vm285_vm0, %v269_v3 }
  0x14   :  { %v567_v60 = vld [vmem:[%s914_s0 + $0x61] sm:$0xff]  ;;  %v595_v10 = vld [vmem:[%s914_s0 + $0x71] sm:$0xff]  ;;  %v143_v11 = vmax.f32 %v110_v61, %v342_v58  ;;  %v239_v18 = vmax.f32 %v206_v5, %v487_v22  ;;  %v144_v26 = vmax.f32 %v111_v12, %v343_v8  ;;  %287 = vst.msk [vmem:[%s915_s1 + $0x8] sm:$0xff] %vm285_vm0, %v270_v17  ;;  %v240_v30 = vmax.f32 %v207_v19, %v511_v32 }
  0x15   :  { %v358_v62 = vld [vmem:[%s914_s0 + $0x281] sm:$0xff]  ;;  %v359_v7 = vld [vmem:[%s914_s0 + $0x291] sm:$0xff]  ;;  %v79_v13 = vmax.f32 %v47_v0, %v567_v60  ;;  %v80_v22 = vmax.f32 %v48_v16, %v595_v10 }
  0x16   :  { %v328_v9 = vld [vmem:[%s914_s0 + $0x2a0] sm:$0xff]  ;;  %v329_v20 = vld [vmem:[%s914_s0 + $0x2b0] sm:$0xff]  ;;  %v175_v25 = vmax.f32 %v143_v11, %v358_v62  ;;  %v271_v29 = vmax.f32 %v239_v18, %v492_v23  ;;  %v176_v37 = vmax.f32 %v144_v26, %v359_v7 }
  0x17   :  { %v344_v15 = vld [vmem:[%s914_s0 + $0x3c0] sm:$0xff]  ;;  %v16_v21 = vld [vmem:[%s914_s0 + $0x90] sm:$0xff]  ;;  %v112_v27 = vmax.f32 %v79_v13, %v328_v9  ;;  %v113_v39 = vmax.f32 %v80_v22, %v329_v20 }
  0x18   :  { %v314_v24 = vld [vmem:[%s914_s0 + $0x1b0] sm:$0xff]  ;;  %v360_v14 = vld [vmem:[%s914_s0 + $0x2a1] sm:$0xff]  ;;  %v208_v36 = vmax.f32 %v175_v25, %v374_v41  ;;  %288 = vst.msk [vmem:[%s915_s1 + $0x10] sm:$0xff] %vm285_vm0, %v271_v29  ;;  %v272_v41 = vmax.f32 %v240_v30, %v520_v38  ;;  %v209_v51 = vmax.f32 %v176_v37, %v550_v52 }
  0x19   :  { %v65_v28 = vld [vmem:[%s914_s0 + $0x91] sm:$0xff]  ;;  %v49_v33 = vmax.f32 %v16_v21, %v314_v24  ;;  %v640_v34 = vld [vmem:[%s914_s0 + $0xa0] sm:$0xff]  ;;  %v145_v23 = vmax.f32 %v112_v27, %v344_v15 }
  0x1a   :  { %v345_v31 = vld [vmem:[%s914_s0 + $0x3d0] sm:$0xff]  ;;  %v645_v35 = vld [vmem:[%s914_s0 + $0x1c0] sm:$0xff]  ;;  %v241_v50 = vmax.f32 %v208_v36, %v532_v42  ;;  %289 = vst.msk [vmem:[%s915_s1 + $0x18] sm:$0xff] %vm285_vm0, %v272_v41  ;;  %v242_v4 = vmax.f32 %v209_v51, %v555_v53 }
  0x1b   :  { %v361_v32 = vld [vmem:[%s914_s0 + $0x2b1] sm:$0xff]  ;;  %v656_v43 = vld [vmem:[%s914_s0 + $0xa1] sm:$0xff]  ;;  %v81_v45 = vmax.f32 %v49_v33, %v65_v28  ;;  %v50_v47 = vmax.f32 %v640_v34, %v645_v35  ;;  %v177_v54 = vmax.f32 %v145_v23, %v360_v14  ;;  %v146_v55 = vmax.f32 %v113_v39, %v345_v31 }
  0x1c   :  { %v330_v40 = vld [vmem:[%s914_s0 + $0x2d0] sm:$0xff]  ;;  %v377_v44 = vld [vmem:[%s914_s0 + $0x80] sm:$0xff]  ;;  %v273_v3 = vmax.f32 %v241_v50, %v540_v48  ;;  %v274_v18 = vmax.f32 %v242_v4, %v567_v60 }
  0x1d   :  { %v346_v46 = vld [vmem:[%s914_s0 + $0x3f0] sm:$0xff]  ;;  %v331_v57 = vld [vmem:[%s914_s0 + $0x2e0] sm:$0xff]  ;;  %v114_v52 = vmax.f32 %v81_v45, %v330_v40  ;;  %v82_v59 = vmax.f32 %v50_v47, %v656_v43  ;;  %v210_v5 = vmax.f32 %v177_v54, %v578_v1  ;;  %v178_v6 = vmax.f32 %v146_v55, %v361_v32 }
  0x1e   :  { %v674_v49 = vld [vmem:[%s914_s0 + $0xb0] sm:$0xff]  ;;  %v393_v42 = vld [vmem:[%s914_s0 + $0x1a0] sm:$0xff]  ;;  %290 = vst.msk [vmem:[%s915_s1 + $0x20] sm:$0xff] %vm285_vm0, %v273_v3 }
  0x1f   :  { %v679_v38 = vld [vmem:[%s914_s0 + $0x1d0] sm:$0xff]  ;;  %v347_v61 = vld [vmem:[%s914_s0 + $0x400] sm:$0xff]  ;;  %v147_v1 = vmax.f32 %v114_v52, %v346_v46  ;;  %v115_v12 = vmax.f32 %v82_v59, %v331_v57  ;;  %v243_v19 = vmax.f32 %v210_v5, %v583_v2  ;;  %v211_v20 = vmax.f32 %v178_v6, %v377_v44  ;;  %291 = vst.msk [vmem:[%s915_s1 + $0x28] sm:$0xff] %vm285_vm0, %v274_v18 }
  0x20   :  { %v362_v56 = vld [vmem:[%s914_s0 + $0x2d1] sm:$0xff]  ;;  %v51_v62 = vmax.f32 %v674_v49, %v679_v38  ;;  %v710_v63 = vld [vmem:[%s914_s0 + $0xc0] sm:$0xff] }
  0x21   :  { %v692_v58 = vld [vmem:[%s914_s0 + $0xb1] sm:$0xff]  ;;  %v715_v0 = vld [vmem:[%s914_s0 + $0x1e0] sm:$0xff]  ;;  %v179_v2 = vmax.f32 %v147_v1, %v362_v56  ;;  %v148_v27 = vmax.f32 %v115_v12, %v347_v61  ;;  %v275_v31 = vmax.f32 %v243_v19, %v595_v10  ;;  %v244_v33 = vmax.f32 %v211_v20, %v393_v42 }
  0x22   :  { %v363_v8 = vld [vmem:[%s914_s0 + $0x2e1] sm:$0xff]  ;;  %v332_v9 = vld [vmem:[%s914_s0 + $0x2f0] sm:$0xff]  ;;  %v83_v7 = vmax.f32 %v51_v62, %v692_v58  ;;  %v52_v13 = vmax.f32 %v710_v63, %v715_v0 }
  0x23   :  { %v348_v11 = vld [vmem:[%s914_s0 + $0x410] sm:$0xff]  ;;  %v732_v48 = vld [vmem:[%s914_s0 + $0xc1] sm:$0xff]  ;;  %v212_v40 = vmax.f32 %v179_v2, %v640_v34  ;;  %v180_v10 = vmax.f32 %v148_v27, %v363_v8  ;;  %292 = vst.msk [vmem:[%s915_s1 + $0x30] sm:$0xff] %vm285_vm0, %v275_v31 }
  0x24   :  { %v409_v53 = vld [vmem:[%s914_s0 + $0x81] sm:$0xff]  ;;  %v743_v15 = vld [vmem:[%s914_s0 + $0xd0] sm:$0xff]  ;;  %v116_v14 = vmax.f32 %v83_v7, %v332_v9  ;;  %v84_v22 = vmax.f32 %v52_v13, %v732_v48 }
  0x25   :  { %v748_v16 = vld [vmem:[%s914_s0 + $0x1f0] sm:$0xff]  ;;  %v333_v24 = vld [vmem:[%s914_s0 + $0x300] sm:$0xff]  ;;  %v276_v34 = vmax.f32 %v244_v33, %v409_v53  ;;  %v245_v42 = vmax.f32 %v212_v40, %v645_v35  ;;  %v213_v52 = vmax.f32 %v180_v10, %v674_v49 }
  0x26   :  { %v753_v17 = vld [vmem:[%s914_s0 + $0xd1] sm:$0xff]  ;;  %v349_v25 = vld [vmem:[%s914_s0 + $0x420] sm:$0xff]  ;;  %v53_v26 = vmax.f32 %v743_v15, %v748_v16  ;;  %v149_v41 = vmax.f32 %v116_v14, %v348_v11  ;;  %v117_v44 = vmax.f32 %v84_v22, %v333_v24 }
  0x27   :  { %v364_v21 = vld [vmem:[%s914_s0 + $0x2f1] sm:$0xff]  ;;  %v382_v28 = vld [vmem:[%s914_s0 + $0xe0] sm:$0xff]  ;;  %293 = vst.msk [vmem:[%s915_s1 + $0x38] sm:$0xff] %vm285_vm0, %v276_v34  ;;  %v277_v8 = vmax.f32 %v245_v42, %v656_v43  ;;  %v246_v9 = vmax.f32 %v213_v52, %v679_v38 }
  0x28   :  { %v334_v60 = vld [vmem:[%s914_s0 + $0x310] sm:$0xff]  ;;  %v782_v29 = vld [vmem:[%s914_s0 + $0x200] sm:$0xff]  ;;  %v85_v37 = vmax.f32 %v53_v26, %v753_v17  ;;  %v181_v59 = vmax.f32 %v149_v41, %v364_v21  ;;  %v150_v61 = vmax.f32 %v117_v44, %v349_v25 }
  0x29   :  { %v787_v30 = vld [vmem:[%s914_s0 + $0xe1] sm:$0xff]  ;;  %v350_v23 = vld [vmem:[%s914_s0 + $0x430] sm:$0xff]  ;;  %v54_v39 = vmax.f32 %v382_v28, %v782_v29  ;;  %294 = vst.msk [vmem:[%s915_s1 + $0x40] sm:$0xff] %vm285_vm0, %v277_v8  ;;  %v278_v38 = vmax.f32 %v246_v9, %v692_v58 }
  0x2a   :  { %v365_v36 = vld [vmem:[%s914_s0 + $0x301] sm:$0xff]  ;;  %v383_v45 = vld [vmem:[%s914_s0 + $0xf0] sm:$0xff]  ;;  %v118_v50 = vmax.f32 %v85_v37, %v334_v60  ;;  %v214_v11 = vmax.f32 %v181_v59, %v710_v63 }
  0x2b   :  { %v335_v32 = vld [vmem:[%s914_s0 + $0x320] sm:$0xff]  ;;  %v399_v46 = vld [vmem:[%s914_s0 + $0x210] sm:$0xff]  ;;  %v86_v54 = vmax.f32 %v54_v39, %v787_v30  ;;  %v182_v53 = vmax.f32 %v150_v61, %v365_v36  ;;  %295 = vst.msk [vmem:[%s915_s1 + $0x48] sm:$0xff] %vm285_vm0, %v278_v38 }
  0x2c   :  { %v415_v47 = vld [vmem:[%s914_s0 + $0xf1] sm:$0xff]  ;;  %v351_v55 = vld [vmem:[%s914_s0 + $0x440] sm:$0xff]  ;;  %v55_v56 = vmax.f32 %v383_v45, %v399_v46  ;;  %v151_v35 = vmax.f32 %v118_v50, %v350_v23  ;;  %v247_v63 = vmax.f32 %v214_v11, %v715_v0 }
  0x2d   :  { %v366_v51 = vld [vmem:[%s914_s0 + $0x311] sm:$0xff]  ;;  %v384_v62 = vld [vmem:[%s914_s0 + $0x100] sm:$0xff]  ;;  %v119_v49 = vmax.f32 %v86_v54, %v335_v32  ;;  %v215_v20 = vmax.f32 %v182_v53, %v743_v15 }
  0x2e   :  { %v336_v57 = vld [vmem:[%s914_s0 + $0x330] sm:$0xff]  ;;  %v400_v3 = vld [vmem:[%s914_s0 + $0x220] sm:$0xff]  ;;  %v87_v5 = vmax.f32 %v55_v56, %v415_v47  ;;  %v183_v13 = vmax.f32 %v151_v35, %v366_v51  ;;  %v279_v58 = vmax.f32 %v247_v63, %v732_v48 }
  0x2f   :  { %v416_v4 = vld [vmem:[%s914_s0 + $0x101] sm:$0xff]  ;;  %v56_v6 = vmax.f32 %v384_v62, %v400_v3  ;;  %v352_v12 = vld [vmem:[%s914_s0 + $0x450] sm:$0xff]  ;;  %v152_v18 = vmax.f32 %v119_v49, %v351_v55  ;;  %v248_v0 = vmax.f32 %v215_v20, %v748_v16 }
  0x30   :  { %v367_v1 = vld [vmem:[%s914_s0 + $0x321] sm:$0xff]  ;;  %v120_v43 = vmax.f32 %v87_v5, %v336_v57  ;;  %v368_v21 = vld [vmem:[%s914_s0 + $0x331] sm:$0xff]  ;;  %v216_v25 = vmax.f32 %v183_v13, %v382_v28  ;;  %296 = vst.msk [vmem:[%s915_s1 + $0x50] sm:$0xff] %vm285_vm0, %v279_v58 }
  0x31   :  { %v337_v7 = vld [vmem:[%s914_s0 + $0x340] sm:$0xff]  ;;  %v88_v19 = vmax.f32 %v56_v6, %v416_v4  ;;  %v184_v26 = vmax.f32 %v152_v18, %v367_v1  ;;  %v280_v31 = vmax.f32 %v248_v0, %v753_v17  ;;  %v385_v48 = vld [vmem:[%s914_s0 + $0x110] sm:$0xff] }
  0x32   :  { %v353_v24 = vld [vmem:[%s914_s0 + $0x460] sm:$0xff]  ;;  %v153_v60 = vmax.f32 %v120_v43, %v352_v12  ;;  %v249_v27 = vmax.f32 %v216_v25, %v782_v29  ;;  %v401_v29 = vld [vmem:[%s914_s0 + $0x230] sm:$0xff] }
  0x33   :  { %v121_v2 = vmax.f32 %v88_v19, %v337_v7  ;;  %v369_v15 = vld [vmem:[%s914_s0 + $0x341] sm:$0xff]  ;;  %v217_v14 = vmax.f32 %v184_v26, %v383_v45  ;;  %297 = vst.msk [vmem:[%s915_s1 + $0x58] sm:$0xff] %vm285_vm0, %v280_v31  ;;  %v417_v39 = vld [vmem:[%s914_s0 + $0x111] sm:$0xff] }
  0x34   :  { %v185_v22 = vmax.f32 %v153_v60, %v368_v21  ;;  %v281_v16 = vmax.f32 %v249_v27, %v787_v30 }
  0x35   :  { %v154_v28 = vmax.f32 %v121_v2, %v353_v24  ;;  %v250_v33 = vmax.f32 %v217_v14, %v399_v46 }
  0x36   :  { %v218_v36 = vmax.f32 %v185_v22, %v384_v62  ;;  %298 = vst.msk [vmem:[%s915_s1 + $0x60] sm:$0xff] %vm285_vm0, %v281_v16 }
  0x37   :  { %v186_v37 = vmax.f32 %v154_v28, %v369_v15  ;;  %v282_v17 = vmax.f32 %v250_v33, %v415_v47 }
  0x38   :  { %v251_v23 = vmax.f32 %v218_v36, %v400_v3 }
  0x39   :  { %v219_v30 = vmax.f32 %v186_v37, %v385_v48  ;;  %299 = vst.msk [vmem:[%s915_s1 + $0x68] sm:$0xff] %vm285_vm0, %v282_v17 }
  0x3a   :  { %v283_v32 = vmax.f32 %v251_v23, %v416_v4 }
  0x3b   :  { %v252_v40 = vmax.f32 %v219_v30, %v401_v29 }
  0x3c   :  { %300 = vst.msk [vmem:[%s915_s1 + $0x70] sm:$0xff] %vm285_vm0, %v283_v32 }
  0x3d   :  { %v284_v10 = vmax.f32 %v252_v40, %v417_v39 }
  0x3f   :  { %301 = vst.msk [vmem:[%s915_s1 + $0x78] sm:$0xff] %vm285_vm0, %v284_v10 }

// kernel: _lambda_.63
= control target key start
LH: loop header
LB: loop body
LE: loop exit
PB: predicated region body
PF: predicated region fallthrough
CT: control target
= control target key end

     0   :  { %s558_s1 = inlined_call_operand.vmem [shape: bf16[128,128], index: 1, kind: input, shape index: {}]   ;;  %s559_s2 = inlined_call_operand.vmem [shape: f32[1,128], index: 2, kind: input, shape index: {}]   ;;  %s560_s0 = inlined_call_operand.vmem [shape: bf16[128,128], index: 0, kind: input, shape index: {}]   ;;  %s561_s3 = inlined_call_operand.vmem [shape: f32[128,128], index: 3, kind: output, shape index: {}]  }
   0x1   :  { %v413_v0 = vld [vmem:[%s558_s1 + $0x38] sm:$0xff]  ;;  %v412_v1 = vld [vmem:[%s558_s1 + $0x30] sm:$0xff]  ;;  %v411_v2 = vld [vmem:[%s558_s1 + $0x28] sm:$0xff] }
   0x2   :  { %178 = vmatpush.bf16.msra.mxu0 %v413_v0  ;;  %414 = vmatpush.bf16.msra.mxu1 %v413_v0  ;;  %v410_v3 = vld [vmem:[%s558_s1 + $0x20] sm:$0xff]  ;;  %v409_v4 = vld [vmem:[%s558_s1 + $0x18] sm:$0xff]  ;;  %v408_v5 = vld [vmem:[%s558_s1 + $0x10] sm:$0xff] }
   0x3   :  { %415 = vmatpush.bf16.msra.mxu2 %v413_v0  ;;  %416 = vmatpush.bf16.msra.mxu3 %v413_v0  ;;  %v407_v6 = vld [vmem:[%s558_s1 + $0x8] sm:$0xff]  ;;  %v406_v7 = vld [vmem:[%s558_s1] sm:$0xff]  ;;  %v400_v9 = vld [vmem:[%s560_s0 + $0x10] sm:$0xff] }
   0x4   :  { %v398_v8 = vld [vmem:[%s560_s0] sm:$0xff]  ;;  %v404_v11 = vld [vmem:[%s560_s0 + $0x30] sm:$0xff]  ;;  %v399_v12 = vld [vmem:[%s560_s0 + $0x8] sm:$0xff] }
   0x5   :  { %v402_v10 = vld [vmem:[%s560_s0 + $0x20] sm:$0xff]  ;;  %v401_v13 = vld [vmem:[%s560_s0 + $0x18] sm:$0xff]  ;;  %v403_v14 = vld [vmem:[%s560_s0 + $0x28] sm:$0xff] }
   0x6   :  { %179 = vmatpush.bf16.msra.mxu0 %v412_v1  ;;  %417 = vmatpush.bf16.msra.mxu1 %v412_v1  ;;  %v405_v15 = vld [vmem:[%s560_s0 + $0x38] sm:$0xff]  ;;  %v438_v16 = vld [vmem:[%s559_s2] ss:$0 sm:$0xff] }
   0x7   :  { %418 = vmatpush.bf16.msra.mxu2 %v412_v1  ;;  %419 = vmatpush.bf16.msra.mxu3 %v412_v1 }
   0xa   :  { %180 = vmatpush.bf16.msra.mxu0 %v411_v2  ;;  %420 = vmatpush.bf16.msra.mxu1 %v411_v2 }
   0xb   :  { %421 = vmatpush.bf16.msra.mxu2 %v411_v2  ;;  %422 = vmatpush.bf16.msra.mxu3 %v411_v2 }
   0xe   :  { %181 = vmatpush.bf16.msra.mxu0 %v410_v3  ;;  %423 = vmatpush.bf16.msra.mxu1 %v410_v3 }
   0xf   :  { %424 = vmatpush.bf16.msra.mxu2 %v410_v3  ;;  %425 = vmatpush.bf16.msra.mxu3 %v410_v3 }
  0x12   :  { %182 = vmatpush.bf16.msra.mxu0 %v409_v4  ;;  %426 = vmatpush.bf16.msra.mxu1 %v409_v4 }
  0x13   :  { %427 = vmatpush.bf16.msra.mxu2 %v409_v4  ;;  %428 = vmatpush.bf16.msra.mxu3 %v409_v4 }
  0x16   :  { %183 = vmatpush.bf16.msra.mxu0 %v408_v5  ;;  %429 = vmatpush.bf16.msra.mxu1 %v408_v5 }
  0x17   :  { %430 = vmatpush.bf16.msra.mxu2 %v408_v5  ;;  %431 = vmatpush.bf16.msra.mxu3 %v408_v5 }
  0x1a   :  { %184 = vmatpush.bf16.msra.mxu0 %v407_v6  ;;  %432 = vmatpush.bf16.msra.mxu1 %v407_v6 }
  0x1b   :  { %433 = vmatpush.bf16.msra.mxu2 %v407_v6  ;;  %434 = vmatpush.bf16.msra.mxu3 %v407_v6 }
  0x1e   :  { %185 = vmatpush.bf16.msra.mxu0 %v406_v7  ;;  %435 = vmatpush.bf16.msra.mxu1 %v406_v7 }
  0x1f   :  { %436 = vmatpush.bf16.msra.mxu2 %v406_v7  ;;  %437 = vmatpush.bf16.msra.mxu3 %v406_v7 }
  0x21   :  { %186 = vmatmul.bf16.vlgmr.msra.gmra.mxu0 %v398_v8  ;;  %196 = vmatmul.bf16.vlgmr.msra.gmra.mxu1 %v400_v9 }
  0x22   :  { %206 = vmatmul.bf16.vlgmr.msra.gmra.mxu2 %v402_v10  ;;  %216 = vmatmul.bf16.vlgmr.msra.gmra.mxu3 %v404_v11 }
  0x31   :  { %191 = vmatmul.bf16.gmra.mxu0 %v399_v12  ;;  %201 = vmatmul.bf16.gmra.mxu1 %v401_v13 }
  0x32   :  { %211 = vmatmul.bf16.gmra.mxu2 %v403_v14  ;;  %221 = vmatmul.bf16.gmra.mxu3 %v405_v15 }
  0x9e   :  { %v187_v17 = vpop.f32.mrf.mxu0  ;;  %v197_v18 = vpop.f32.mrf.mxu1 }
  0x9f   :  { %v282_v19 = vadd.f32 %v438_v16, %v187_v17  ;;  %v286_v20 = vadd.f32 %v438_v16, %v197_v18 }
  0xa1   :  { %v298_v21 = vmax.f32 %v282_v19, 0.0  ;;  %v302_v22 = vmax.f32 %v286_v20, 0.0 }
  0xa3   :  { %314 = vst [vmem:[%s561_s3] sm:$0xff] %v298_v21 }
  0xa4   :  { %318 = vst [vmem:[%s561_s3 + $0x20] sm:$0xff] %v302_v22 }
  0xa5   :  { %v207_v23 = vpop.f32.mrf.mxu2  ;;  %v217_v24 = vpop.f32.mrf.mxu3 }
  0xa6   :  { %v290_v25 = vadd.f32 %v438_v16, %v207_v23  ;;  %v294_v26 = vadd.f32 %v438_v16, %v217_v24  ;;  %v189_v27 = vpop.f32.mrf.mxu0  ;;  %v199_v28 = vpop.f32.mrf.mxu1 }
  0xa7   :  { %v283_v29 = vadd.f32 %v438_v16, %v189_v27  ;;  %v287_v30 = vadd.f32 %v438_v16, %v199_v28 }
  0xa8   :  { %v306_v31 = vmax.f32 %v290_v25, 0.0  ;;  %v310_v32 = vmax.f32 %v294_v26, 0.0 }
  0xa9   :  { %v299_v33 = vmax.f32 %v283_v29, 0.0  ;;  %v303_v34 = vmax.f32 %v287_v30, 0.0 }
  0xaa   :  { %322 = vst [vmem:[%s561_s3 + $0x40] sm:$0xff] %v306_v31 }
  0xab   :  { %326 = vst [vmem:[%s561_s3 + $0x60] sm:$0xff] %v310_v32 }
  0xac   :  { %315 = vst [vmem:[%s561_s3 + $0x8] sm:$0xff] %v299_v33 }
  0xad   :  { %319 = vst [vmem:[%s561_s3 + $0x28] sm:$0xff] %v303_v34  ;;  %v209_v35 = vpop.f32.mrf.mxu2  ;;  %v219_v36 = vpop.f32.mrf.mxu3 }
  0xae   :  { %v291_v37 = vadd.f32 %v438_v16, %v209_v35  ;;  %v295_v38 = vadd.f32 %v438_v16, %v219_v36  ;;  %v192_v39 = vpop.f32.mrf.mxu0  ;;  %v202_v40 = vpop.f32.mrf.mxu1 }
  0xaf   :  { %v284_v41 = vadd.f32 %v438_v16, %v192_v39  ;;  %v288_v42 = vadd.f32 %v438_v16, %v202_v40 }
  0xb0   :  { %v307_v43 = vmax.f32 %v291_v37, 0.0  ;;  %v311_v44 = vmax.f32 %v295_v38, 0.0 }
  0xb1   :  { %v300_v45 = vmax.f32 %v284_v41, 0.0  ;;  %v304_v46 = vmax.f32 %v288_v42, 0.0 }
  0xb2   :  { %323 = vst [vmem:[%s561_s3 + $0x48] sm:$0xff] %v307_v43 }
  0xb3   :  { %327 = vst [vmem:[%s561_s3 + $0x68] sm:$0xff] %v311_v44 }
  0xb4   :  { %316 = vst [vmem:[%s561_s3 + $0x10] sm:$0xff] %v300_v45 }
  0xb5   :  { %320 = vst [vmem:[%s561_s3 + $0x30] sm:$0xff] %v304_v46  ;;  %v212_v47 = vpop.f32.mrf.mxu2  ;;  %v222_v48 = vpop.f32.mrf.mxu3 }
  0xb6   :  { %v292_v49 = vadd.f32 %v438_v16, %v212_v47  ;;  %v296_v50 = vadd.f32 %v438_v16, %v222_v48  ;;  %v194_v51 = vpop.f32.mrf.mxu0  ;;  %v204_v52 = vpop.f32.mrf.mxu1 }
  0xb7   :  { %v285_v53 = vadd.f32 %v438_v16, %v194_v51  ;;  %v289_v54 = vadd.f32 %v438_v16, %v204_v52 }
  0xb8   :  { %v308_v55 = vmax.f32 %v292_v49, 0.0  ;;  %v312_v56 = vmax.f32 %v296_v50, 0.0 }
  0xb9   :  { %v301_v57 = vmax.f32 %v285_v53, 0.0  ;;  %v305_v58 = vmax.f32 %v289_v54, 0.0 }
  0xba   :  { %324 = vst [vmem:[%s561_s3 + $0x50] sm:$0xff] %v308_v55 }
  0xbb   :  { %328 = vst [vmem:[%s561_s3 + $0x70] sm:$0xff] %v312_v56 }
  0xbc   :  { %317 = vst [vmem:[%s561_s3 + $0x18] sm:$0xff] %v301_v57 }
  0xbd   :  { %321 = vst [vmem:[%s561_s3 + $0x38] sm:$0xff] %v305_v58  ;;  %v214_v59 = vpop.f32.mrf.mxu2  ;;  %v224_v60 = vpop.f32.mrf.mxu3 }
  0xbe   :  { %v293_v61 = vadd.f32 %v438_v16, %v214_v59  ;;  %v297_v62 = vadd.f32 %v438_v16, %v224_v60 }
  0xc0   :  { %v309_v63 = vmax.f32 %v293_v61, 0.0  ;;  %v313_v0 = vmax.f32 %v297_v62, 0.0 }
  0xc2   :  { %325 = vst [vmem:[%s561_s3 + $0x58] sm:$0xff] %v309_v63 }
  0xc3   :  { %329 = vst [vmem:[%s561_s3 + $0x78] sm:$0xff] %v313_v0 }

// kernel: _lambda_.64
= control target key start
LH: loop header
LB: loop body
LE: loop exit
PB: predicated region body
PF: predicated region fallthrough
CT: control target
= control target key end

     0   :  { %vm291_vm0 = vcmask 191488   ;;  %s779_s0 = inlined_call_operand.vmem [shape: f32[8,5,5,24], index: 0, kind: input, shape index: {}]   ;;  %s780_s1 = inlined_call_operand.vmem [shape: f32[9,1,1,24], index: 1, kind: input, shape index: {}]   ;;  %s781_s2 = inlined_call_operand.vmem [shape: f32[1,1,1,24], index: 2, kind: input, shape index: {}]   ;;  %s782_s3 = inlined_call_operand.vmem [shape: f32[2,4,4,24], index: 3, kind: output, shape index: {}]  }
   0x1   :  { %v14_v0 = vld [vmem:[%s779_s0] sm:$0xf]  ;;  %v304_v2 = vld [vmem:[%s779_s0 + $0x50] sm:$0xf]  ;;  %v439_v12 = vld [vmem:[%s780_s1 + $0x4] ss:$0 sm:$0xff] }
   0x2   :  { %v404_v1 = vld [vmem:[%s780_s1] ss:$0 sm:$0xff]  ;;  %v412_v3 = vld [vmem:[%s780_s1 + $0x1] ss:$0 sm:$0xff]  ;;  %v421_v6 = vld [vmem:[%s780_s1 + $0x2] ss:$0 sm:$0xff] }
   0x3   :  { %v26_v4 = vmul.f32 %v404_v1, %v14_v0  ;;  %v72_v5 = vld [vmem:[%s779_s0 + $0x1] sm:$0xf]  ;;  %v56_v7 = vmul.f32 %v412_v3, %v304_v2  ;;  %v323_v11 = vld [vmem:[%s779_s0 + $0xf0] sm:$0xf]  ;;  %v445_v15 = vld [vmem:[%s780_s1 + $0x5] ss:$0 sm:$0xff] }
   0x4   :  { %v314_v8 = vld [vmem:[%s779_s0 + $0xa0] sm:$0xf]  ;;  %v85_v10 = vmul.f32 %v421_v6, %v72_v5  ;;  %v341_v17 = vld [vmem:[%s779_s0 + $0x8] sm:$0xf]  ;;  %v145_v19 = vmul.f32 %v439_v12, %v323_v11  ;;  %v457_v20 = vld [vmem:[%s780_s1 + $0x6] ss:$0 sm:$0xff] }
   0x5   :  { %v430_v9 = vld [vmem:[%s780_s1 + $0x3] ss:$0 sm:$0xff]  ;;  %v64_v13 = vadd.f32 %v56_v7, %v26_v4  ;;  %v350_v21 = vld [vmem:[%s779_s0 + $0x58] sm:$0xf]  ;;  %v465_v22 = vld [vmem:[%s780_s1 + $0x7] ss:$0 sm:$0xff]  ;;  %v204_v33 = vmul.f32 %v457_v20, %v341_v17 }
   0x6   :  { %v115_v14 = vmul.f32 %v430_v9, %v314_v8  ;;  %v332_v16 = vld [vmem:[%s779_s0 + $0xa1] sm:$0xf]  ;;  %v359_v23 = vld [vmem:[%s779_s0 + $0x9] sm:$0xf]  ;;  %v474_v26 = vld [vmem:[%s780_s1 + $0x8] ss:$0 sm:$0xff]  ;;  %v234_v39 = vmul.f32 %v465_v22, %v350_v21 }
   0x7   :  { %v93_v18 = vadd.f32 %v85_v10, %v64_v13  ;;  %v174_v25 = vmul.f32 %v445_v15, %v332_v16  ;;  %v15_v27 = vld [vmem:[%s779_s0 + $0x8] sm:$0xf]  ;;  %v305_v29 = vld [vmem:[%s779_s0 + $0x58] sm:$0xf]  ;;  %v342_v38 = vld [vmem:[%s779_s0 + $0x10] sm:$0xf]  ;;  %v263_v44 = vmul.f32 %v474_v26, %v359_v23 }
   0x8   :  { %v27_v28 = vmul.f32 %v404_v1, %v15_v27  ;;  %v73_v30 = vld [vmem:[%s779_s0 + $0x9] sm:$0xf]  ;;  %v57_v34 = vmul.f32 %v412_v3, %v305_v29  ;;  %v324_v36 = vld [vmem:[%s779_s0 + $0xf8] sm:$0xf]  ;;  %v351_v40 = vld [vmem:[%s779_s0 + $0x60] sm:$0xf]  ;;  %v205_v58 = vmul.f32 %v457_v20, %v342_v38 }
   0x9   :  { %v123_v24 = vadd.f32 %v115_v14, %v93_v18  ;;  %v315_v31 = vld [vmem:[%s779_s0 + $0xa8] sm:$0xf]  ;;  %v86_v35 = vmul.f32 %v421_v6, %v73_v30  ;;  %v360_v41 = vld [vmem:[%s779_s0 + $0x11] sm:$0xf]  ;;  %v306_v47 = vld [vmem:[%s779_s0 + $0x60] sm:$0xf]  ;;  %v146_v50 = vmul.f32 %v439_v12, %v324_v36  ;;  %v235_v62 = vmul.f32 %v465_v22, %v351_v40 }
   0xa   :  { %v333_v37 = vld [vmem:[%s779_s0 + $0xa9] sm:$0xf]  ;;  %v16_v42 = vld [vmem:[%s779_s0 + $0x10] sm:$0xf]  ;;  %v65_v45 = vadd.f32 %v57_v34, %v27_v28  ;;  %v116_v46 = vmul.f32 %v430_v9, %v315_v31  ;;  %v58_v52 = vmul.f32 %v412_v3, %v306_v47  ;;  %v529_v55 = vld [vmem:[%s781_s2] ss:$0 sm:$0xff]  ;;  %v544_v63 = vmul.f32 %v474_v26, %v360_v41 }
   0xb   :  { %v153_v32 = vadd.f32 %v145_v19, %v123_v24  ;;  %v74_v48 = vld [vmem:[%s779_s0 + $0x11] sm:$0xf]  ;;  %v28_v51 = vmul.f32 %v404_v1, %v16_v42  ;;  %v175_v57 = vmul.f32 %v445_v15, %v333_v37  ;;  %v325_v59 = vld [vmem:[%s779_s0 + $0x100] sm:$0xf]  ;;  %v17_v61 = vld [vmem:[%s779_s0 + $0x18] sm:$0xf] }
   0xc   :  { %v316_v49 = vld [vmem:[%s779_s0 + $0xb0] sm:$0xf]  ;;  %v87_v53 = vmul.f32 %v421_v6, %v74_v48  ;;  %v94_v56 = vadd.f32 %v86_v35, %v65_v45  ;;  %v307_v4 = vld [vmem:[%s779_s0 + $0x68] sm:$0xf]  ;;  %v75_v5 = vld [vmem:[%s779_s0 + $0x19] sm:$0xf]  ;;  %v29_v14 = vmul.f32 %v404_v1, %v17_v61  ;;  %v147_v19 = vmul.f32 %v439_v12, %v325_v59 }
   0xd   :  { %v182_v43 = vadd.f32 %v174_v25, %v153_v32  ;;  %v334_v60 = vld [vmem:[%s779_s0 + $0xb1] sm:$0xf]  ;;  %v66_v0 = vadd.f32 %v58_v52, %v28_v51  ;;  %v117_v2 = vmul.f32 %v430_v9, %v316_v49  ;;  %v317_v7 = vld [vmem:[%s779_s0 + $0xb8] sm:$0xf]  ;;  %v352_v13 = vld [vmem:[%s779_s0 + $0x68] sm:$0xf]  ;;  %v59_v16 = vmul.f32 %v412_v3, %v307_v4 }
   0xe   :  { %v124_v10 = vadd.f32 %v116_v46, %v94_v56  ;;  %v343_v11 = vld [vmem:[%s779_s0 + $0x18] sm:$0xf]  ;;  %v326_v17 = vld [vmem:[%s779_s0 + $0x108] sm:$0xf]  ;;  %v176_v21 = vmul.f32 %v445_v15, %v334_v60  ;;  %v88_v23 = vmul.f32 %v421_v6, %v75_v5  ;;  %v118_v30 = vmul.f32 %v430_v9, %v317_v7  ;;  %v344_v38 = vld [vmem:[%s779_s0 + $0x20] sm:$0xf] }
   0xf   :  { %v212_v54 = vadd.f32 %v204_v33, %v182_v43  ;;  %v95_v18 = vadd.f32 %v87_v53, %v66_v0  ;;  %v18_v24 = vld [vmem:[%s779_s0 + $0x28] sm:$0xf]  ;;  %v361_v28 = vld [vmem:[%s779_s0 + $0x19] sm:$0xf]  ;;  %v67_v29 = vadd.f32 %v59_v16, %v29_v14  ;;  %v206_v34 = vmul.f32 %v457_v20, %v343_v11  ;;  %v353_v42 = vld [vmem:[%s779_s0 + $0x70] sm:$0xf] }
  0x10   :  { %v154_v27 = vadd.f32 %v146_v50, %v124_v10  ;;  %v308_v31 = vld [vmem:[%s779_s0 + $0x78] sm:$0xf]  ;;  %v76_v32 = vld [vmem:[%s779_s0 + $0x29] sm:$0xf]  ;;  %v236_v35 = vmul.f32 %v465_v22, %v352_v13  ;;  %v148_v36 = vmul.f32 %v439_v12, %v326_v17  ;;  %v30_v43 = vmul.f32 %v404_v1, %v18_v24  ;;  %v19_v50 = vld [vmem:[%s779_s0 + $0x30] sm:$0xf] }
  0x11   :  { %v242_v8 = vadd.f32 %v234_v39, %v212_v54  ;;  %v125_v33 = vadd.f32 %v117_v2, %v95_v18  ;;  %v335_v37 = vld [vmem:[%s779_s0 + $0xb9] sm:$0xf]  ;;  %v96_v41 = vadd.f32 %v88_v23, %v67_v29  ;;  %v265_v46 = vmul.f32 %v474_v26, %v361_v28  ;;  %v309_v56 = vld [vmem:[%s779_s0 + $0x80] sm:$0xf]  ;;  %v336_v2 = vld [vmem:[%s779_s0 + $0xc9] sm:$0xf] }
  0x12   :  { %v183_v40 = vadd.f32 %v175_v57, %v154_v27  ;;  %v60_v47 = vmul.f32 %v412_v3, %v308_v31  ;;  %v89_v48 = vmul.f32 %v421_v6, %v76_v32  ;;  %v327_v49 = vld [vmem:[%s779_s0 + $0x118] sm:$0xf]  ;;  %v177_v53 = vmul.f32 %v445_v15, %v335_v37  ;;  %v77_v57 = vld [vmem:[%s779_s0 + $0x31] sm:$0xf]  ;;  %v354_v16 = vld [vmem:[%s779_s0 + $0x80] sm:$0xf] }
  0x13   :  { %v271_v25 = vadd.f32 %v263_v44, %v242_v8  ;;  %v318_v44 = vld [vmem:[%s779_s0 + $0xc8] sm:$0xf]  ;;  %v155_v45 = vadd.f32 %v147_v19, %v125_v33  ;;  %v126_v52 = vadd.f32 %v118_v30, %v96_v41  ;;  %v207_v54 = vmul.f32 %v457_v20, %v344_v38  ;;  %v319_v10 = vld [vmem:[%s779_s0 + $0xd0] sm:$0xf]  ;;  %v328_v24 = vld [vmem:[%s779_s0 + $0x120] sm:$0xf] }
  0x14   :  { %v213_v51 = vadd.f32 %v205_v58, %v183_v40  ;;  %v237_v60 = vmul.f32 %v465_v22, %v353_v42  ;;  %v362_v58 = vld [vmem:[%s779_s0 + $0x21] sm:$0xf]  ;;  %v68_v61 = vadd.f32 %v60_v47, %v30_v43  ;;  %v119_v0 = vmul.f32 %v430_v9, %v318_v44  ;;  %v345_v14 = vld [vmem:[%s779_s0 + $0x30] sm:$0xf]  ;;  %v20_v30 = vld [vmem:[%s779_s0 + $0x38] sm:$0xf] }
  0x15   :  { %v283_v39 = vadd.f32 %v529_v55, %v271_v25  ;;  %v184_v59 = vadd.f32 %v176_v21, %v155_v45  ;;  %v156_v5 = vadd.f32 %v148_v36, %v126_v52  ;;  %v149_v7 = vmul.f32 %v439_v12, %v327_v49  ;;  %v78_v31 = vld [vmem:[%s779_s0 + $0x39] sm:$0xf]  ;;  %v337_v36 = vld [vmem:[%s779_s0 + $0xd1] sm:$0xf]  ;;  %v355_v45 = vld [vmem:[%s779_s0 + $0x88] sm:$0xf] }
  0x16   :  { %v243_v4 = vadd.f32 %v235_v62, %v213_v51  ;;  %v31_v8 = vmul.f32 %v404_v1, %v19_v50  ;;  %v97_v13 = vadd.f32 %v89_v48, %v68_v61  ;;  %v61_v62 = vmul.f32 %v412_v3, %v309_v56  ;;  %v320_v42 = vld [vmem:[%s779_s0 + $0xd8] sm:$0xf]  ;;  %v79_v61 = vld [vmem:[%s779_s0 + $0x41] sm:$0xf] }
  0x17   :  { %292 = vst.msk [vmem:[%s782_s3] sm:$0xf] %vm291_vm0, %v283_v39  ;;  %v214_v11 = vadd.f32 %v206_v34, %v184_v59  ;;  %v90_v17 = vmul.f32 %v421_v6, %v77_v57  ;;  %v185_v19 = vadd.f32 %v177_v53, %v156_v5  ;;  %v266_v21 = vmul.f32 %v474_v26, %v362_v58  ;;  %v363_v39 = vld [vmem:[%s779_s0 + $0x31] sm:$0xf]  ;;  %v346_v44 = vld [vmem:[%s779_s0 + $0x38] sm:$0xf] }
  0x18   :  { %v272_v18 = vadd.f32 %v544_v63, %v243_v4  ;;  %v178_v23 = vmul.f32 %v445_v15, %v336_v2  ;;  %v127_v27 = vadd.f32 %v119_v0, %v97_v13  ;;  %v69_v28 = vadd.f32 %v61_v62, %v31_v8  ;;  %v310_v63 = vld [vmem:[%s779_s0 + $0x88] sm:$0xf]  ;;  %v311_v58 = vld [vmem:[%s779_s0 + $0x90] sm:$0xf]  ;;  %v338_v8 = vld [vmem:[%s779_s0 + $0xd9] sm:$0xf] }
  0x19   :  { %v244_v25 = vadd.f32 %v236_v35, %v214_v11  ;;  %v120_v29 = vmul.f32 %v430_v9, %v319_v10  ;;  %v215_v33 = vadd.f32 %v207_v54, %v185_v19  ;;  %v208_v34 = vmul.f32 %v457_v20, %v345_v14  ;;  %v329_v53 = vld [vmem:[%s779_s0 + $0x128] sm:$0xf]  ;;  %v21_v54 = vld [vmem:[%s779_s0 + $0x40] sm:$0xf] }
  0x1a   :  { %v284_v32 = vadd.f32 %v529_v55, %v272_v18  ;;  %v238_v35 = vmul.f32 %v465_v22, %v354_v16  ;;  %v157_v38 = vadd.f32 %v149_v7, %v127_v27  ;;  %v98_v40 = vadd.f32 %v90_v17, %v69_v28  ;;  %v364_v7 = vld [vmem:[%s779_s0 + $0x39] sm:$0xf]  ;;  %v321_v16 = vld [vmem:[%s779_s0 + $0xe0] sm:$0xf] }
  0x1b   :  { %v273_v37 = vadd.f32 %v265_v46, %v244_v25  ;;  %v150_v41 = vmul.f32 %v439_v12, %v328_v24  ;;  %v245_v43 = vadd.f32 %v237_v60, %v215_v33  ;;  %v32_v46 = vmul.f32 %v404_v1, %v20_v30  ;;  %v347_v18 = vld [vmem:[%s779_s0 + $0x40] sm:$0xf]  ;;  %v330_v25 = vld [vmem:[%s779_s0 + $0x130] sm:$0xf] }
  0x1c   :  { %293 = vst.msk [vmem:[%s782_s3 + $0x4] sm:$0xf] %vm291_vm0, %v284_v32  ;;  %v62_v47 = vmul.f32 %v412_v3, %v310_v63  ;;  %v91_v48 = vmul.f32 %v421_v6, %v78_v31  ;;  %v186_v50 = vadd.f32 %v178_v23, %v157_v38  ;;  %v128_v51 = vadd.f32 %v120_v29, %v98_v40  ;;  %v339_v31 = vld [vmem:[%s779_s0 + $0xe1] sm:$0xf]  ;;  %v348_v38 = vld [vmem:[%s779_s0 + $0x48] sm:$0xf] }
  0x1d   :  { %v285_v49 = vadd.f32 %v529_v55, %v273_v37  ;;  %v179_v52 = vmul.f32 %v445_v15, %v337_v36  ;;  %v274_v56 = vadd.f32 %v266_v21, %v245_v43  ;;  %v267_v57 = vmul.f32 %v474_v26, %v363_v39 }
  0x1e   :  { %v70_v59 = vadd.f32 %v62_v47, %v32_v46  ;;  %v121_v60 = vmul.f32 %v430_v9, %v320_v42  ;;  %v216_v0 = vadd.f32 %v208_v34, %v186_v50  ;;  %v158_v2 = vadd.f32 %v150_v41, %v128_v51  ;;  %v365_v34 = vld [vmem:[%s779_s0 + $0x41] sm:$0xf] }
  0x1f   :  { %294 = vst.msk [vmem:[%s782_s3 + $0x8] sm:$0xf] %vm291_vm0, %v285_v49  ;;  %v209_v4 = vmul.f32 %v457_v20, %v346_v44  ;;  %v239_v5 = vmul.f32 %v465_v22, %v355_v45  ;;  %v286_v10 = vadd.f32 %v529_v55, %v274_v56  ;;  %v151_v13 = vmul.f32 %v439_v12, %v329_v53 }
  0x20   :  { %v99_v11 = vadd.f32 %v91_v48, %v70_v59  ;;  %v33_v14 = vmul.f32 %v404_v1, %v21_v54  ;;  %v246_v62 = vadd.f32 %v238_v35, %v216_v0  ;;  %v187_v17 = vadd.f32 %v179_v52, %v158_v2  ;;  %v366_v48 = vld [vmem:[%s779_s0 + $0x49] sm:$0xf] }
  0x21   :  { %v63_v19 = vmul.f32 %v412_v3, %v311_v58  ;;  %v92_v21 = vmul.f32 %v421_v6, %v79_v61  ;;  %295 = vst.msk [vmem:[%s782_s3 + $0xc] sm:$0xf] %vm291_vm0, %v286_v10  ;;  %v268_v1 = vmul.f32 %v474_v26, %v364_v7  ;;  %v180_v24 = vmul.f32 %v445_v15, %v338_v8  ;;  %v356_v3 = vld [vmem:[%s779_s0 + $0x90] sm:$0xf] }
  0x22   :  { %v129_v23 = vadd.f32 %v121_v60, %v99_v11  ;;  %v275_v27 = vadd.f32 %v267_v57, %v246_v62  ;;  %v217_v28 = vadd.f32 %v209_v4, %v187_v17  ;;  %v122_v29 = vmul.f32 %v430_v9, %v321_v16 }
  0x23   :  { %v71_v6 = vadd.f32 %v63_v19, %v33_v14  ;;  %v210_v63 = vmul.f32 %v457_v20, %v347_v18  ;;  %v152_v36 = vmul.f32 %v439_v12, %v330_v25  ;;  %v240_v9 = vmul.f32 %v465_v22, %v356_v3  ;;  %v357_v12 = vld [vmem:[%s779_s0 + $0x98] sm:$0xf] }
  0x24   :  { %v159_v30 = vadd.f32 %v151_v13, %v129_v23  ;;  %v287_v32 = vadd.f32 %v529_v55, %v275_v27  ;;  %v247_v33 = vadd.f32 %v239_v5, %v217_v28  ;;  %v181_v41 = vmul.f32 %v445_v15, %v339_v31 }
  0x25   :  { %v100_v35 = vadd.f32 %v92_v21, %v71_v6  ;;  %v269_v43 = vmul.f32 %v474_v26, %v365_v34  ;;  %v211_v46 = vmul.f32 %v457_v20, %v348_v38  ;;  %v241_v49 = vmul.f32 %v465_v22, %v357_v12 }
  0x26   :  { %v188_v37 = vadd.f32 %v180_v24, %v159_v30  ;;  %296 = vst.msk [vmem:[%s782_s3 + $0x10] sm:$0xf] %vm291_vm0, %v287_v32  ;;  %v276_v39 = vadd.f32 %v268_v1, %v247_v33  ;;  %v270_v52 = vmul.f32 %v474_v26, %v366_v48 }
  0x27   :  { %v130_v40 = vadd.f32 %v122_v29, %v100_v35 }
  0x28   :  { %v218_v42 = vadd.f32 %v210_v63, %v188_v37  ;;  %v288_v44 = vadd.f32 %v529_v55, %v276_v39 }
  0x29   :  { %v160_v45 = vadd.f32 %v152_v36, %v130_v40 }
  0x2a   :  { %v248_v47 = vadd.f32 %v240_v9, %v218_v42  ;;  %297 = vst.msk [vmem:[%s782_s3 + $0x14] sm:$0xf] %vm291_vm0, %v288_v44 }
  0x2b   :  { %v189_v15 = vadd.f32 %v181_v41, %v160_v45 }
  0x2c   :  { %v277_v50 = vadd.f32 %v269_v43, %v248_v47 }
  0x2d   :  { %v219_v51 = vadd.f32 %v211_v46, %v189_v15 }
  0x2e   :  { %v289_v53 = vadd.f32 %v529_v55, %v277_v50 }
  0x2f   :  { %v249_v20 = vadd.f32 %v241_v49, %v219_v51 }
  0x30   :  { %298 = vst.msk [vmem:[%s782_s3 + $0x18] sm:$0xf] %vm291_vm0, %v289_v53 }
  0x31   :  { %v278_v54 = vadd.f32 %v270_v52, %v249_v20 }
  0x33   :  { %v290_v56 = vadd.f32 %v529_v55, %v278_v54 }
  0x35   :  { %299 = vst.msk [vmem:[%s782_s3 + $0x1c] sm:$0xf] %vm291_vm0, %v290_v56 }

// kernel: _lambda_.65
= control target key start
LH: loop header
LB: loop body
LE: loop exit
PB: predicated region body
PF: predicated region fallthrough
CT: control target
= control target key end

     0   :  { %s284_s1 = inlined_call_operand.vmem [shape: bf16[128,128], index: 1, kind: input, shape index: {}]   ;;  %s285_s2 = inlined_call_operand.vmem [shape: f32[1,128], index: 2, kind: input, shape index: {}]   ;;  %s286_s0 = inlined_call_operand.vmem [shape: bf16[32,128], index: 0, kind: input, shape index: {}]   ;;  %s287_s3 = inlined_call_operand.vmem [shape: f32[32,128], index: 3, kind: output, shape index: {}]  }
   0x1   :  { %v209_v0 = vld [vmem:[%s284_s1 + $0x38] sm:$0xff]  ;;  %v208_v1 = vld [vmem:[%s284_s1 + $0x30] sm:$0xff]  ;;  %v207_v2 = vld [vmem:[%s284_s1 + $0x28] sm:$0xff] }
   0x2   :  { %106 = vmatpush.bf16.msra.mxu0 %v209_v0  ;;  %210 = vmatpush.bf16.msra.mxu1 %v209_v0  ;;  %v206_v3 = vld [vmem:[%s284_s1 + $0x20] sm:$0xff]  ;;  %v205_v4 = vld [vmem:[%s284_s1 + $0x18] sm:$0xff]  ;;  %v204_v5 = vld [vmem:[%s284_s1 + $0x10] sm:$0xff] }
   0x3   :  { %v203_v6 = vld [vmem:[%s284_s1 + $0x8] sm:$0xff]  ;;  %v202_v7 = vld [vmem:[%s284_s1] sm:$0xff] }
   0x4   :  { %v200_v8 = vld [vmem:[%s286_s0] sm:$0xff]  ;;  %v201_v9 = vld [vmem:[%s286_s0 + $0x8] sm:$0xff] }
   0x5   :  { %v218_v10 = vld [vmem:[%s285_s2] ss:$0 sm:$0xff] }
   0x6   :  { %107 = vmatpush.bf16.msra.mxu0 %v208_v1  ;;  %211 = vmatpush.bf16.msra.mxu1 %v208_v1 }
   0xa   :  { %108 = vmatpush.bf16.msra.mxu0 %v207_v2  ;;  %212 = vmatpush.bf16.msra.mxu1 %v207_v2 }
   0xe   :  { %109 = vmatpush.bf16.msra.mxu0 %v206_v3  ;;  %213 = vmatpush.bf16.msra.mxu1 %v206_v3 }
  0x12   :  { %110 = vmatpush.bf16.msra.mxu0 %v205_v4  ;;  %214 = vmatpush.bf16.msra.mxu1 %v205_v4 }
  0x16   :  { %111 = vmatpush.bf16.msra.mxu0 %v204_v5  ;;  %215 = vmatpush.bf16.msra.mxu1 %v204_v5 }
  0x1a   :  { %112 = vmatpush.bf16.msra.mxu0 %v203_v6  ;;  %216 = vmatpush.bf16.msra.mxu1 %v203_v6 }
  0x1e   :  { %113 = vmatpush.bf16.msra.mxu0 %v202_v7  ;;  %217 = vmatpush.bf16.msra.mxu1 %v202_v7 }
  0x21   :  { %114 = vmatmul.bf16.vlgmr.msra.gmra.mxu0 %v200_v8  ;;  %119 = vmatmul.bf16.vlgmr.msra.gmra.mxu1 %v201_v9 }
  0x9e   :  { %v115_v11 = vpop.f32.mrf.mxu0  ;;  %v120_v12 = vpop.f32.mrf.mxu1 }
  0x9f   :  { %v144_v13 = vadd.f32 %v218_v10, %v115_v11  ;;  %v146_v14 = vadd.f32 %v218_v10, %v120_v12 }
  0xa1   :  { %v148_v15 = vmax.f32 %v144_v13, 0.0  ;;  %v150_v16 = vmax.f32 %v146_v14, 0.0 }
  0xa3   :  { %152 = vst [vmem:[%s287_s3] sm:$0xff] %v148_v15 }
  0xa4   :  { %154 = vst [vmem:[%s287_s3 + $0x10] sm:$0xff] %v150_v16 }
  0xa6   :  { %v117_v17 = vpop.f32.mrf.mxu0  ;;  %v122_v18 = vpop.f32.mrf.mxu1 }
  0xa7   :  { %v145_v19 = vadd.f32 %v218_v10, %v117_v17  ;;  %v147_v20 = vadd.f32 %v218_v10, %v122_v18 }
  0xa9   :  { %v149_v21 = vmax.f32 %v145_v19, 0.0  ;;  %v151_v22 = vmax.f32 %v147_v20, 0.0 }
  0xab   :  { %153 = vst [vmem:[%s287_s3 + $0x8] sm:$0xff] %v149_v21 }
  0xac   :  { %155 = vst [vmem:[%s287_s3 + $0x18] sm:$0xff] %v151_v22 }

// kernel: _lambda_.67
= control target key start
LH: loop header
LB: loop body
LE: loop exit
PB: predicated region body
PF: predicated region fallthrough
CT: control target
= control target key end

     0   :  { %vm288_vm0 = vcmask 191488   ;;  %s768_s0 = inlined_call_operand.vmem [shape: f32[2,6,6,24], index: 0, kind: input, shape index: {}]   ;;  %s769_s1 = inlined_call_operand.vmem [shape: f32[9,1,1,24], index: 1, kind: input, shape index: {}]   ;;  %s770_s2 = inlined_call_operand.vmem [shape: f32[1,1,1,24], index: 2, kind: input, shape index: {}]   ;;  %s771_s3 = inlined_call_operand.vmem [shape: f32[2,4,4,24], index: 3, kind: output, shape index: {}]  }
   0x1   :  { %v14_v0 = vld [vmem:[%s768_s0] sm:$0xf]  ;;  %v303_v8 = vld [vmem:[%s768_s0 + $0x8] sm:$0xf]  ;;  %v428_v12 = vld [vmem:[%s769_s1 + $0x4] ss:$0 sm:$0xff] }
   0x2   :  { %v393_v1 = vld [vmem:[%s769_s1] ss:$0 sm:$0xff]  ;;  %v42_v2 = vld [vmem:[%s768_s0 + $0x1] sm:$0xf]  ;;  %v312_v11 = vld [vmem:[%s768_s0 + $0x9] sm:$0xf] }
   0x3   :  { %v401_v3 = vld [vmem:[%s769_s1 + $0x1] ss:$0 sm:$0xff]  ;;  %v26_v4 = vmul.f32 %v393_v1, %v14_v0  ;;  %v71_v5 = vld [vmem:[%s768_s0 + $0x2] sm:$0xf]  ;;  %v321_v16 = vld [vmem:[%s768_s0 + $0xa] sm:$0xf]  ;;  %v143_v19 = vmul.f32 %v428_v12, %v312_v11 }
   0x4   :  { %v410_v6 = vld [vmem:[%s769_s1 + $0x2] ss:$0 sm:$0xff]  ;;  %v55_v7 = vmul.f32 %v401_v3, %v42_v2  ;;  %v419_v9 = vld [vmem:[%s769_s1 + $0x3] ss:$0 sm:$0xff]  ;;  %v434_v15 = vld [vmem:[%s769_s1 + $0x5] ss:$0 sm:$0xff] }
   0x5   :  { %v84_v10 = vmul.f32 %v410_v6, %v71_v5  ;;  %v114_v14 = vmul.f32 %v419_v9, %v303_v8  ;;  %v330_v17 = vld [vmem:[%s768_s0 + $0x10] sm:$0xf]  ;;  %v446_v20 = vld [vmem:[%s769_s1 + $0x6] ss:$0 sm:$0xff]  ;;  %v454_v22 = vld [vmem:[%s769_s1 + $0x7] ss:$0 sm:$0xff]  ;;  %v172_v25 = vmul.f32 %v434_v15, %v321_v16 }
   0x6   :  { %v63_v13 = vadd.f32 %v55_v7, %v26_v4  ;;  %v339_v21 = vld [vmem:[%s768_s0 + $0x11] sm:$0xf]  ;;  %v463_v26 = vld [vmem:[%s769_s1 + $0x8] ss:$0 sm:$0xff]  ;;  %v43_v29 = vld [vmem:[%s768_s0 + $0x9] sm:$0xf]  ;;  %v202_v33 = vmul.f32 %v446_v20, %v330_v17 }
   0x7   :  { %v348_v23 = vld [vmem:[%s768_s0 + $0x12] sm:$0xf]  ;;  %v15_v27 = vld [vmem:[%s768_s0 + $0x8] sm:$0xf]  ;;  %v56_v34 = vmul.f32 %v401_v3, %v43_v29  ;;  %v331_v38 = vld [vmem:[%s768_s0 + $0x18] sm:$0xf]  ;;  %v231_v39 = vmul.f32 %v454_v22, %v339_v21 }
   0x8   :  { %v92_v18 = vadd.f32 %v84_v10, %v63_v13  ;;  %v27_v28 = vmul.f32 %v393_v1, %v15_v27  ;;  %v72_v30 = vld [vmem:[%s768_s0 + $0xa] sm:$0xf]  ;;  %v304_v31 = vld [vmem:[%s768_s0 + $0x10] sm:$0xf]  ;;  %v340_v40 = vld [vmem:[%s768_s0 + $0x19] sm:$0xf]  ;;  %v260_v44 = vmul.f32 %v463_v26, %v348_v23  ;;  %v203_v58 = vmul.f32 %v446_v20, %v331_v38 }
   0x9   :  { %v85_v35 = vmul.f32 %v410_v6, %v72_v30  ;;  %v313_v36 = vld [vmem:[%s768_s0 + $0x11] sm:$0xf]  ;;  %v349_v41 = vld [vmem:[%s768_s0 + $0x1a] sm:$0xf]  ;;  %v115_v46 = vmul.f32 %v419_v9, %v304_v31  ;;  %v518_v55 = vld [vmem:[%s770_s2] ss:$0 sm:$0xff]  ;;  %v232_v62 = vmul.f32 %v454_v22, %v340_v40 }
   0xa   :  { %v122_v24 = vadd.f32 %v114_v14, %v92_v18  ;;  %v322_v37 = vld [vmem:[%s768_s0 + $0x12] sm:$0xf]  ;;  %v64_v45 = vadd.f32 %v56_v34, %v27_v28  ;;  %v305_v49 = vld [vmem:[%s768_s0 + $0x18] sm:$0xf]  ;;  %v144_v50 = vmul.f32 %v428_v12, %v313_v36  ;;  %v533_v63 = vmul.f32 %v463_v26, %v349_v41  ;;  %v306_v7 = vld [vmem:[%s768_s0 + $0x20] sm:$0xf] }
   0xb   :  { %v16_v42 = vld [vmem:[%s768_s0 + $0x10] sm:$0xf]  ;;  %v173_v57 = vmul.f32 %v434_v15, %v322_v37  ;;  %v314_v59 = vld [vmem:[%s768_s0 + $0x19] sm:$0xf]  ;;  %v116_v2 = vmul.f32 %v419_v9, %v305_v49  ;;  %v332_v11 = vld [vmem:[%s768_s0 + $0x20] sm:$0xf]  ;;  %v117_v30 = vmul.f32 %v419_v9, %v306_v7 }
   0xc   :  { %v151_v32 = vadd.f32 %v143_v19, %v122_v24  ;;  %v44_v47 = vld [vmem:[%s768_s0 + $0x11] sm:$0xf]  ;;  %v28_v51 = vmul.f32 %v393_v1, %v16_v42  ;;  %v93_v56 = vadd.f32 %v85_v35, %v64_v45  ;;  %v323_v60 = vld [vmem:[%s768_s0 + $0x1a] sm:$0xf]  ;;  %v341_v13 = vld [vmem:[%s768_s0 + $0x21] sm:$0xf]  ;;  %v145_v19 = vmul.f32 %v428_v12, %v314_v59 }
   0xd   :  { %v73_v48 = vld [vmem:[%s768_s0 + $0x12] sm:$0xf]  ;;  %v57_v52 = vmul.f32 %v401_v3, %v44_v47  ;;  %v17_v61 = vld [vmem:[%s768_s0 + $0x18] sm:$0xf]  ;;  %v315_v17 = vld [vmem:[%s768_s0 + $0x21] sm:$0xf]  ;;  %v174_v21 = vmul.f32 %v434_v15, %v323_v60  ;;  %v204_v34 = vmul.f32 %v446_v20, %v332_v11  ;;  %v233_v35 = vmul.f32 %v454_v22, %v341_v13 }
   0xe   :  { %v180_v43 = vadd.f32 %v172_v25, %v151_v32  ;;  %v86_v53 = vmul.f32 %v410_v6, %v73_v48  ;;  %v45_v4 = vld [vmem:[%s768_s0 + $0x19] sm:$0xf]  ;;  %v123_v10 = vadd.f32 %v115_v46, %v93_v56  ;;  %v29_v14 = vmul.f32 %v393_v1, %v17_v61  ;;  %v18_v24 = vld [vmem:[%s768_s0 + $0x30] sm:$0xf]  ;;  %v350_v28 = vld [vmem:[%s768_s0 + $0x22] sm:$0xf] }
   0xf   :  { %v65_v0 = vadd.f32 %v57_v52, %v28_v51  ;;  %v74_v5 = vld [vmem:[%s768_s0 + $0x1a] sm:$0xf]  ;;  %v58_v16 = vmul.f32 %v401_v3, %v45_v4  ;;  %v46_v31 = vld [vmem:[%s768_s0 + $0x31] sm:$0xf]  ;;  %v146_v36 = vmul.f32 %v428_v12, %v315_v17  ;;  %v324_v37 = vld [vmem:[%s768_s0 + $0x22] sm:$0xf]  ;;  %v262_v46 = vmul.f32 %v463_v26, %v350_v28 }
  0x10   :  { %v210_v54 = vadd.f32 %v202_v33, %v180_v43  ;;  %v87_v23 = vmul.f32 %v410_v6, %v74_v5  ;;  %v152_v27 = vadd.f32 %v144_v50, %v123_v10  ;;  %v75_v32 = vld [vmem:[%s768_s0 + $0x32] sm:$0xf]  ;;  %v333_v38 = vld [vmem:[%s768_s0 + $0x28] sm:$0xf]  ;;  %v30_v43 = vmul.f32 %v393_v1, %v18_v24  ;;  %v316_v49 = vld [vmem:[%s768_s0 + $0x39] sm:$0xf] }
  0x11   :  { %v94_v18 = vadd.f32 %v86_v53, %v65_v0  ;;  %v66_v29 = vadd.f32 %v58_v16, %v29_v14  ;;  %v342_v42 = vld [vmem:[%s768_s0 + $0x29] sm:$0xf]  ;;  %v59_v47 = vmul.f32 %v401_v3, %v46_v31  ;;  %v88_v48 = vmul.f32 %v410_v6, %v75_v32  ;;  %v19_v50 = vld [vmem:[%s768_s0 + $0x38] sm:$0xf]  ;;  %v308_v10 = vld [vmem:[%s768_s0 + $0x40] sm:$0xf] }
  0x12   :  { %v239_v8 = vadd.f32 %v231_v39, %v210_v54  ;;  %v181_v40 = vadd.f32 %v173_v57, %v152_v27  ;;  %v175_v53 = vmul.f32 %v434_v15, %v324_v37  ;;  %v205_v54 = vmul.f32 %v446_v20, %v333_v38  ;;  %v47_v56 = vld [vmem:[%s768_s0 + $0x39] sm:$0xf]  ;;  %v334_v14 = vld [vmem:[%s768_s0 + $0x40] sm:$0xf] }
  0x13   :  { %v124_v33 = vadd.f32 %v116_v2, %v94_v18  ;;  %v95_v41 = vadd.f32 %v87_v23, %v66_v29  ;;  %v76_v57 = vld [vmem:[%s768_s0 + $0x3a] sm:$0xf]  ;;  %v234_v60 = vmul.f32 %v454_v22, %v342_v42  ;;  %v67_v61 = vadd.f32 %v59_v47, %v30_v43  ;;  %v343_v16 = vld [vmem:[%s768_s0 + $0x41] sm:$0xf]  ;;  %v309_v42 = vld [vmem:[%s768_s0 + $0x48] sm:$0xf] }
  0x14   :  { %v268_v25 = vadd.f32 %v260_v44, %v239_v8  ;;  %v307_v44 = vld [vmem:[%s768_s0 + $0x38] sm:$0xf]  ;;  %v211_v51 = vadd.f32 %v203_v58, %v181_v40  ;;  %v351_v58 = vld [vmem:[%s768_s0 + $0x2a] sm:$0xf]  ;;  %v147_v7 = vmul.f32 %v428_v12, %v316_v49  ;;  %v31_v8 = vmul.f32 %v393_v1, %v19_v50  ;;  %v317_v24 = vld [vmem:[%s768_s0 + $0x41] sm:$0xf] }
  0x15   :  { %v153_v45 = vadd.f32 %v145_v19, %v124_v33  ;;  %v125_v52 = vadd.f32 %v117_v30, %v95_v41  ;;  %v118_v0 = vmul.f32 %v419_v9, %v307_v44  ;;  %v325_v2 = vld [vmem:[%s768_s0 + $0x3a] sm:$0xf]  ;;  %v96_v13 = vadd.f32 %v88_v48, %v67_v61  ;;  %v20_v30 = vld [vmem:[%s768_s0 + $0x40] sm:$0xf]  ;;  %v335_v44 = vld [vmem:[%s768_s0 + $0x48] sm:$0xf] }
  0x16   :  { %v280_v39 = vadd.f32 %v518_v55, %v268_v25  ;;  %v240_v4 = vadd.f32 %v232_v62, %v211_v51  ;;  %v60_v62 = vmul.f32 %v401_v3, %v47_v56  ;;  %v89_v17 = vmul.f32 %v410_v6, %v76_v57  ;;  %v77_v31 = vld [vmem:[%s768_s0 + $0x42] sm:$0xf]  ;;  %v78_v61 = vld [vmem:[%s768_s0 + $0x4a] sm:$0xf] }
  0x17   :  { %v182_v59 = vadd.f32 %v174_v21, %v153_v45  ;;  %v154_v5 = vadd.f32 %v146_v36, %v125_v52  ;;  %v263_v21 = vmul.f32 %v463_v26, %v351_v58  ;;  %v176_v23 = vmul.f32 %v434_v15, %v325_v2  ;;  %v326_v36 = vld [vmem:[%s768_s0 + $0x42] sm:$0xf]  ;;  %v344_v45 = vld [vmem:[%s768_s0 + $0x49] sm:$0xf] }
  0x18   :  { %289 = vst.msk [vmem:[%s771_s3] sm:$0xf] %vm288_vm0, %v280_v39  ;;  %v269_v18 = vadd.f32 %v533_v63, %v240_v4  ;;  %v126_v27 = vadd.f32 %v118_v0, %v96_v13  ;;  %v68_v28 = vadd.f32 %v60_v62, %v31_v8  ;;  %v119_v29 = vmul.f32 %v419_v9, %v308_v10  ;;  %v48_v63 = vld [vmem:[%s768_s0 + $0x41] sm:$0xf]  ;;  %v49_v58 = vld [vmem:[%s768_s0 + $0x49] sm:$0xf] }
  0x19   :  { %v212_v11 = vadd.f32 %v204_v34, %v182_v59  ;;  %v183_v19 = vadd.f32 %v175_v53, %v154_v5  ;;  %v206_v34 = vmul.f32 %v446_v20, %v334_v14  ;;  %v352_v39 = vld [vmem:[%s768_s0 + $0x42] sm:$0xf]  ;;  %v148_v41 = vmul.f32 %v428_v12, %v317_v24  ;;  %v318_v53 = vld [vmem:[%s768_s0 + $0x49] sm:$0xf] }
  0x1a   :  { %v281_v32 = vadd.f32 %v518_v55, %v269_v18  ;;  %v155_v38 = vadd.f32 %v147_v7, %v126_v27  ;;  %v97_v40 = vadd.f32 %v89_v17, %v68_v28  ;;  %v61_v47 = vmul.f32 %v401_v3, %v48_v63  ;;  %v353_v7 = vld [vmem:[%s768_s0 + $0x4a] sm:$0xf]  ;;  %v336_v18 = vld [vmem:[%s768_s0 + $0x50] sm:$0xf] }
  0x1b   :  { %v241_v25 = vadd.f32 %v233_v35, %v212_v11  ;;  %v213_v33 = vadd.f32 %v205_v54, %v183_v19  ;;  %v235_v35 = vmul.f32 %v454_v22, %v343_v16  ;;  %v90_v48 = vmul.f32 %v410_v6, %v77_v31  ;;  %v21_v54 = vld [vmem:[%s768_s0 + $0x48] sm:$0xf]  ;;  %v310_v16 = vld [vmem:[%s768_s0 + $0x50] sm:$0xf] }
  0x1c   :  { %290 = vst.msk [vmem:[%s771_s3 + $0x4] sm:$0xf] %vm288_vm0, %v281_v32  ;;  %v184_v50 = vadd.f32 %v176_v23, %v155_v38  ;;  %v127_v51 = vadd.f32 %v119_v29, %v97_v40  ;;  %v177_v52 = vmul.f32 %v434_v15, %v326_v36  ;;  %v264_v57 = vmul.f32 %v463_v26, %v352_v39  ;;  %v327_v8 = vld [vmem:[%s768_s0 + $0x4a] sm:$0xf]  ;;  %v328_v31 = vld [vmem:[%s768_s0 + $0x52] sm:$0xf] }
  0x1d   :  { %v270_v37 = vadd.f32 %v262_v46, %v241_v25  ;;  %v242_v43 = vadd.f32 %v234_v60, %v213_v33  ;;  %v32_v46 = vmul.f32 %v393_v1, %v20_v30  ;;  %v120_v60 = vmul.f32 %v419_v9, %v309_v42  ;;  %v319_v25 = vld [vmem:[%s768_s0 + $0x51] sm:$0xf]  ;;  %v337_v38 = vld [vmem:[%s768_s0 + $0x58] sm:$0xf] }
  0x1e   :  { %v214_v0 = vadd.f32 %v206_v34, %v184_v50  ;;  %v156_v2 = vadd.f32 %v148_v41, %v127_v51  ;;  %v207_v4 = vmul.f32 %v446_v20, %v335_v44  ;;  %v236_v5 = vmul.f32 %v454_v22, %v344_v45  ;;  %v354_v34 = vld [vmem:[%s768_s0 + $0x52] sm:$0xf] }
  0x1f   :  { %v282_v49 = vadd.f32 %v518_v55, %v270_v37  ;;  %v271_v56 = vadd.f32 %v263_v21, %v242_v43  ;;  %v69_v59 = vadd.f32 %v61_v47, %v32_v46  ;;  %v149_v13 = vmul.f32 %v428_v12, %v318_v53 }
  0x20   :  { %v33_v14 = vmul.f32 %v393_v1, %v21_v54  ;;  %v243_v62 = vadd.f32 %v235_v35, %v214_v0  ;;  %v185_v17 = vadd.f32 %v177_v52, %v156_v2  ;;  %v62_v19 = vmul.f32 %v401_v3, %v49_v58  ;;  %v345_v3 = vld [vmem:[%s768_s0 + $0x51] sm:$0xf] }
  0x21   :  { %291 = vst.msk [vmem:[%s771_s3 + $0x8] sm:$0xf] %vm288_vm0, %v282_v49  ;;  %v283_v10 = vadd.f32 %v518_v55, %v271_v56  ;;  %v98_v11 = vadd.f32 %v90_v48, %v69_v59  ;;  %v91_v21 = vmul.f32 %v410_v6, %v78_v61  ;;  %v265_v1 = vmul.f32 %v463_v26, %v353_v7  ;;  %v355_v48 = vld [vmem:[%s768_s0 + $0x5a] sm:$0xf] }
  0x22   :  { %v178_v24 = vmul.f32 %v434_v15, %v327_v8  ;;  %v272_v27 = vadd.f32 %v264_v57, %v243_v62  ;;  %v215_v28 = vadd.f32 %v207_v4, %v185_v17  ;;  %v70_v6 = vadd.f32 %v62_v19, %v33_v14 }
  0x23   :  { %292 = vst.msk [vmem:[%s771_s3 + $0xc] sm:$0xf] %vm288_vm0, %v283_v10  ;;  %v128_v23 = vadd.f32 %v120_v60, %v98_v11  ;;  %v121_v29 = vmul.f32 %v419_v9, %v310_v16  ;;  %v208_v63 = vmul.f32 %v446_v20, %v336_v18  ;;  %v150_v36 = vmul.f32 %v428_v12, %v319_v25  ;;  %v346_v12 = vld [vmem:[%s768_s0 + $0x59] sm:$0xf] }
  0x24   :  { %v284_v32 = vadd.f32 %v518_v55, %v272_v27  ;;  %v244_v33 = vadd.f32 %v236_v5, %v215_v28  ;;  %v99_v35 = vadd.f32 %v91_v21, %v70_v6  ;;  %v237_v9 = vmul.f32 %v454_v22, %v345_v3 }
  0x25   :  { %v157_v30 = vadd.f32 %v149_v13, %v128_v23  ;;  %v179_v41 = vmul.f32 %v434_v15, %v328_v31  ;;  %v266_v43 = vmul.f32 %v463_v26, %v354_v34  ;;  %v209_v46 = vmul.f32 %v446_v20, %v337_v38 }
  0x26   :  { %293 = vst.msk [vmem:[%s771_s3 + $0x10] sm:$0xf] %vm288_vm0, %v284_v32  ;;  %v273_v39 = vadd.f32 %v265_v1, %v244_v33  ;;  %v129_v40 = vadd.f32 %v121_v29, %v99_v35  ;;  %v238_v49 = vmul.f32 %v454_v22, %v346_v12  ;;  %v267_v52 = vmul.f32 %v463_v26, %v355_v48 }
  0x27   :  { %v186_v37 = vadd.f32 %v178_v24, %v157_v30 }
  0x28   :  { %v285_v44 = vadd.f32 %v518_v55, %v273_v39  ;;  %v158_v45 = vadd.f32 %v150_v36, %v129_v40 }
  0x29   :  { %v216_v42 = vadd.f32 %v208_v63, %v186_v37 }
  0x2a   :  { %294 = vst.msk [vmem:[%s771_s3 + $0x14] sm:$0xf] %vm288_vm0, %v285_v44  ;;  %v187_v15 = vadd.f32 %v179_v41, %v158_v45 }
  0x2b   :  { %v245_v47 = vadd.f32 %v237_v9, %v216_v42 }
  0x2c   :  { %v217_v51 = vadd.f32 %v209_v46, %v187_v15 }
  0x2d   :  { %v274_v50 = vadd.f32 %v266_v43, %v245_v47 }
  0x2e   :  { %v246_v20 = vadd.f32 %v238_v49, %v217_v51 }
  0x2f   :  { %v286_v53 = vadd.f32 %v518_v55, %v274_v50 }
  0x30   :  { %v275_v54 = vadd.f32 %v267_v52, %v246_v20 }
  0x31   :  { %295 = vst.msk [vmem:[%s771_s3 + $0x18] sm:$0xf] %vm288_vm0, %v286_v53 }
  0x32   :  { %v287_v56 = vadd.f32 %v518_v55, %v275_v54 }
  0x34   :  { %296 = vst.msk [vmem:[%s771_s3 + $0x1c] sm:$0xf] %vm288_vm0, %v287_v56 }

// kernel: _lambda_.79
= control target key start
LH: loop header
LB: loop body
LE: loop exit
PB: predicated region body
PF: predicated region fallthrough
CT: control target
= control target key end

     0   :  { %s209_s1 = inlined_call_operand.vmem [shape: bf16[128,128], index: 1, kind: input, shape index: {}]   ;;  %s210_s2 = inlined_call_operand.vmem [shape: f32[1,128], index: 2, kind: input, shape index: {}]   ;;  %s211_s0 = inlined_call_operand.vmem [shape: bf16[8,128], index: 0, kind: input, shape index: {}]   ;;  %s212_s3 = inlined_call_operand.vmem [shape: f32[8,128], index: 3, kind: output, shape index: {}]  }
   0x1   :  { %v154_v0 = vld [vmem:[%s209_s1 + $0x38] sm:$0xff]  ;;  %v153_v1 = vld [vmem:[%s209_s1 + $0x30] sm:$0xff]  ;;  %v152_v2 = vld [vmem:[%s209_s1 + $0x28] sm:$0xff] }
   0x2   :  { %85 = vmatpush.bf16.msra.mxu0 %v154_v0  ;;  %v151_v3 = vld [vmem:[%s209_s1 + $0x20] sm:$0xff]  ;;  %v150_v4 = vld [vmem:[%s209_s1 + $0x18] sm:$0xff]  ;;  %v149_v5 = vld [vmem:[%s209_s1 + $0x10] sm:$0xff] }
   0x3   :  { %v148_v6 = vld [vmem:[%s209_s1 + $0x8] sm:$0xff]  ;;  %v147_v7 = vld [vmem:[%s209_s1] sm:$0xff] }
   0x4   :  { %v20_v8 = vld [vmem:[%s211_s0] sm:$0xf] }
   0x5   :  { %v155_v9 = vld [vmem:[%s210_s2] ss:$0 sm:$0xff] }
   0x6   :  { %86 = vmatpush.bf16.msra.mxu0 %v153_v1 }
   0xa   :  { %87 = vmatpush.bf16.msra.mxu0 %v152_v2 }
   0xe   :  { %88 = vmatpush.bf16.msra.mxu0 %v151_v3 }
  0x12   :  { %89 = vmatpush.bf16.msra.mxu0 %v150_v4 }
  0x16   :  { %90 = vmatpush.bf16.msra.mxu0 %v149_v5 }
  0x1a   :  { %91 = vmatpush.bf16.msra.mxu0 %v148_v6 }
  0x1e   :  { %92 = vmatpush.bf16.msra.mxu0 %v147_v7 }
  0x21   :  { %93 = vmatmul.bf16.vlgmr.msra.gmra.mxu0 %v20_v8 }
  0x9e   :  { %v94_v10 = vpop.f32.mrf.mxu0 }
  0x9f   :  { %v108_v11 = vadd.f32 %v155_v9, %v94_v10 }
  0xa1   :  { %v109_v12 = vmax.f32 %v108_v11, 0.0 }
  0xa3   :  { %110 = vst [vmem:[%s212_s3] sm:$0xff] %v109_v12 }
  0xa6   :  { %v96_v13 = vpop.f32.mrf.mxu0 }

// kernel: _lambda_.78
= control target key start
LH: loop header
LB: loop body
LE: loop exit
PB: predicated region body
PF: predicated region fallthrough
CT: control target
= control target key end

     0   :  { %vm179_vm0 = vcmask 386048   ;;  %s462_s0 = inlined_call_operand.vmem [shape: f32[8,3,3,48], index: 0, kind: input, shape index: {}]   ;;  %s463_s1 = inlined_call_operand.vmem [shape: f32[9,1,1,48], index: 1, kind: input, shape index: {}]   ;;  %s464_s2 = inlined_call_operand.vmem [shape: f32[1,1,1,48], index: 2, kind: input, shape index: {}]   ;;  %s465_s3 = inlined_call_operand.vmem [shape: f32[2,2,2,48], index: 3, kind: output, shape index: {}]  }
   0x1   :  { %v14_v0 = vld [vmem:[%s462_s0] sm:$0x3]  ;;  %v188_v2 = vld [vmem:[%s462_s0 + $0x18] sm:$0x3]  ;;  %v277_v6 = vld [vmem:[%s463_s1 + $0x2] ss:$0 sm:$0xff] }
   0x2   :  { %v260_v1 = vld [vmem:[%s463_s1] ss:$0 sm:$0xff]  ;;  %v268_v3 = vld [vmem:[%s463_s1 + $0x1] ss:$0 sm:$0xff]  ;;  %v194_v8 = vld [vmem:[%s462_s0 + $0x30] sm:$0x3] }
   0x3   :  { %v22_v4 = vmul.f32 %v260_v1, %v14_v0  ;;  %v48_v5 = vld [vmem:[%s462_s0 + $0x1] sm:$0x3]  ;;  %v40_v7 = vmul.f32 %v268_v3, %v188_v2  ;;  %v286_v9 = vld [vmem:[%s463_s1 + $0x3] ss:$0 sm:$0xff]  ;;  %v199_v11 = vld [vmem:[%s462_s0 + $0x48] sm:$0x3] }
   0x4   :  { %v57_v10 = vmul.f32 %v277_v6, %v48_v5  ;;  %v295_v12 = vld [vmem:[%s463_s1 + $0x4] ss:$0 sm:$0xff]  ;;  %v75_v14 = vmul.f32 %v286_v9, %v194_v8  ;;  %v301_v15 = vld [vmem:[%s463_s1 + $0x5] ss:$0 sm:$0xff]  ;;  %v204_v16 = vld [vmem:[%s462_s0 + $0x31] sm:$0x3] }
   0x5   :  { %v44_v13 = vadd.f32 %v40_v7, %v22_v4  ;;  %v93_v18 = vmul.f32 %v295_v12, %v199_v11  ;;  %v310_v19 = vld [vmem:[%s463_s1 + $0x6] ss:$0 sm:$0xff]  ;;  %v209_v20 = vld [vmem:[%s462_s0 + $0x4] sm:$0x3]  ;;  %v214_v21 = vld [vmem:[%s462_s0 + $0x1c] sm:$0x3]  ;;  %v110_v23 = vmul.f32 %v301_v15, %v204_v16 }
   0x6   :  { %v322_v24 = vld [vmem:[%s463_s1 + $0x7] ss:$0 sm:$0xff]  ;;  %v15_v25 = vld [vmem:[%s462_s0 + $0x4] sm:$0x3]  ;;  %v189_v27 = vld [vmem:[%s462_s0 + $0x1c] sm:$0x3]  ;;  %v128_v31 = vmul.f32 %v310_v19, %v209_v20 }
   0x7   :  { %v61_v17 = vadd.f32 %v57_v10, %v44_v13  ;;  %v23_v26 = vmul.f32 %v260_v1, %v15_v25  ;;  %v49_v28 = vld [vmem:[%s462_s0 + $0x5] sm:$0x3]  ;;  %v195_v29 = vld [vmem:[%s462_s0 + $0x34] sm:$0x3]  ;;  %v344_v33 = vld [vmem:[%s463_s1 + $0x8] ss:$0 sm:$0xff]  ;;  %v41_v34 = vmul.f32 %v268_v3, %v189_v27  ;;  %v146_v40 = vmul.f32 %v322_v24, %v214_v21 }
   0x8   :  { %v219_v32 = vld [vmem:[%s462_s0 + $0x5] sm:$0x3]  ;;  %v58_v35 = vmul.f32 %v277_v6, %v49_v28  ;;  %v200_v36 = vld [vmem:[%s462_s0 + $0x4c] sm:$0x3]  ;;  %v205_v37 = vld [vmem:[%s462_s0 + $0x35] sm:$0x3]  ;;  %v76_v42 = vmul.f32 %v286_v9, %v195_v29 }
   0x9   :  { %v79_v22 = vadd.f32 %v75_v14, %v61_v17  ;;  %v16_v38 = vld [vmem:[%s462_s0 + $0xc] sm:$0x3]  ;;  %v45_v41 = vadd.f32 %v41_v34, %v23_v26  ;;  %v190_v43 = vld [vmem:[%s462_s0 + $0x24] sm:$0x3]  ;;  %v196_v45 = vld [vmem:[%s462_s0 + $0x3c] sm:$0x3]  ;;  %v163_v50 = vmul.f32 %v344_v33, %v219_v32  ;;  %v94_v52 = vmul.f32 %v295_v12, %v200_v36 }
   0xa   :  { %v50_v44 = vld [vmem:[%s462_s0 + $0xd] sm:$0x3]  ;;  %v24_v46 = vmul.f32 %v260_v1, %v16_v38  ;;  %v42_v47 = vmul.f32 %v268_v3, %v190_v43  ;;  %v210_v53 = vld [vmem:[%s462_s0 + $0x8] sm:$0x3]  ;;  %v201_v54 = vld [vmem:[%s462_s0 + $0x54] sm:$0x3]  ;;  %v111_v56 = vmul.f32 %v301_v15, %v205_v37  ;;  %v77_v58 = vmul.f32 %v286_v9, %v196_v45 }
   0xb   :  { %v97_v30 = vadd.f32 %v93_v18, %v79_v22  ;;  %v59_v48 = vmul.f32 %v277_v6, %v50_v44  ;;  %v62_v51 = vadd.f32 %v58_v35, %v45_v41  ;;  %v17_v55 = vld [vmem:[%s462_s0 + $0x10] sm:$0x3]  ;;  %v191_v59 = vld [vmem:[%s462_s0 + $0x28] sm:$0x3]  ;;  %v197_v61 = vld [vmem:[%s462_s0 + $0x40] sm:$0x3]  ;;  %v129_v8 = vmul.f32 %v310_v19, %v210_v53 }
   0xc   :  { %v46_v57 = vadd.f32 %v42_v47, %v24_v46  ;;  %v51_v60 = vld [vmem:[%s462_s0 + $0x11] sm:$0x3]  ;;  %v233_v63 = vld [vmem:[%s464_s2] ss:$0 sm:$0xff]  ;;  %v206_v4 = vld [vmem:[%s462_s0 + $0x3d] sm:$0x3]  ;;  %v25_v5 = vmul.f32 %v260_v1, %v17_v55  ;;  %v43_v7 = vmul.f32 %v268_v3, %v191_v59  ;;  %v95_v11 = vmul.f32 %v295_v12, %v201_v54 }
   0xd   :  { %v114_v39 = vadd.f32 %v110_v23, %v97_v30  ;;  %v80_v0 = vadd.f32 %v76_v42, %v62_v51  ;;  %v215_v2 = vld [vmem:[%s462_s0 + $0x20] sm:$0x3]  ;;  %v60_v13 = vmul.f32 %v277_v6, %v51_v60  ;;  %v202_v14 = vld [vmem:[%s462_s0 + $0x58] sm:$0x3]  ;;  %v211_v18 = vld [vmem:[%s462_s0 + $0x10] sm:$0x3]  ;;  %v78_v3 = vmul.f32 %v286_v9, %v197_v61 }
   0xe   :  { %v63_v10 = vadd.f32 %v59_v48, %v46_v57  ;;  %v47_v1 = vadd.f32 %v43_v7, %v25_v5  ;;  %v147_v20 = vmul.f32 %v322_v24, %v215_v2  ;;  %v220_v6 = vld [vmem:[%s462_s0 + $0x9] sm:$0x3]  ;;  %v112_v22 = vmul.f32 %v301_v15, %v206_v4  ;;  %v207_v23 = vld [vmem:[%s462_s0 + $0x41] sm:$0x3]  ;;  %v221_v35 = vld [vmem:[%s462_s0 + $0x11] sm:$0x3] }
   0xf   :  { %v132_v49 = vadd.f32 %v128_v31, %v114_v39  ;;  %v98_v17 = vadd.f32 %v94_v52, %v80_v0  ;;  %v216_v9 = vld [vmem:[%s462_s0 + $0x28] sm:$0x3]  ;;  %v96_v28 = vmul.f32 %v295_v12, %v202_v14  ;;  %v130_v30 = vmul.f32 %v310_v19, %v211_v18  ;;  %v212_v31 = vld [vmem:[%s462_s0 + $0x14] sm:$0x3]  ;;  %v217_v39 = vld [vmem:[%s462_s0 + $0x2c] sm:$0x3] }
  0x10   :  { %v81_v21 = vadd.f32 %v77_v58, %v63_v10  ;;  %v64_v27 = vadd.f32 %v60_v13, %v47_v1  ;;  %v164_v34 = vmul.f32 %v344_v33, %v220_v6  ;;  %v113_v36 = vmul.f32 %v301_v15, %v207_v23  ;;  %v222_v45 = vld [vmem:[%s462_s0 + $0x15] sm:$0x3] }
  0x11   :  { %v150_v62 = vadd.f32 %v146_v40, %v132_v49  ;;  %v115_v26 = vadd.f32 %v111_v56, %v98_v17  ;;  %v148_v38 = vmul.f32 %v322_v24, %v216_v9  ;;  %v131_v42 = vmul.f32 %v310_v19, %v212_v31 }
  0x12   :  { %v99_v29 = vadd.f32 %v95_v11, %v81_v21  ;;  %v82_v12 = vadd.f32 %v78_v3, %v64_v27  ;;  %v165_v44 = vmul.f32 %v344_v33, %v221_v35  ;;  %v149_v47 = vmul.f32 %v322_v24, %v217_v39 }
  0x13   :  { %v167_v16 = vadd.f32 %v163_v50, %v150_v62  ;;  %v133_v32 = vadd.f32 %v129_v8, %v115_v26  ;;  %v166_v51 = vmul.f32 %v344_v33, %v222_v45 }
  0x14   :  { %v116_v37 = vadd.f32 %v112_v22, %v99_v29  ;;  %v100_v41 = vadd.f32 %v96_v28, %v82_v12 }
  0x15   :  { %v175_v25 = vadd.f32 %v233_v63, %v167_v16  ;;  %v151_v40 = vadd.f32 %v147_v20, %v133_v32 }
  0x16   :  { %v134_v43 = vadd.f32 %v130_v30, %v116_v37  ;;  %v117_v15 = vadd.f32 %v113_v36, %v100_v41 }
  0x17   :  { %180 = vst.msk [vmem:[%s465_s3] sm:$0x3] %vm179_vm0, %v175_v25  ;;  %v168_v46 = vadd.f32 %v164_v34, %v151_v40 }
  0x18   :  { %v152_v48 = vadd.f32 %v148_v38, %v134_v43  ;;  %v135_v50 = vadd.f32 %v131_v42, %v117_v15 }
  0x19   :  { %v176_v49 = vadd.f32 %v233_v63, %v168_v46 }
  0x1a   :  { %v169_v52 = vadd.f32 %v165_v44, %v152_v48  ;;  %v153_v19 = vadd.f32 %v149_v47, %v135_v50 }
  0x1b   :  { %181 = vst.msk [vmem:[%s465_s3 + $0x2] sm:$0x3] %vm179_vm0, %v176_v49 }
  0x1c   :  { %v177_v53 = vadd.f32 %v233_v63, %v169_v52  ;;  %v170_v54 = vadd.f32 %v166_v51, %v153_v19 }
  0x1e   :  { %182 = vst.msk [vmem:[%s465_s3 + $0x4] sm:$0x3] %vm179_vm0, %v177_v53  ;;  %v178_v24 = vadd.f32 %v233_v63, %v170_v54 }
  0x20   :  { %183 = vst.msk [vmem:[%s465_s3 + $0x6] sm:$0x3] %vm179_vm0, %v178_v24 }

// kernel: _lambda_.81
= control target key start
LH: loop header
LB: loop body
LE: loop exit
PB: predicated region body
PF: predicated region fallthrough
CT: control target
= control target key end

     0   :  { %vm176_vm0 = vcmask 386048   ;;  %s455_s0 = inlined_call_operand.vmem [shape: f32[2,4,4,48], index: 0, kind: input, shape index: {}]   ;;  %s456_s1 = inlined_call_operand.vmem [shape: f32[9,1,1,48], index: 1, kind: input, shape index: {}]   ;;  %s457_s2 = inlined_call_operand.vmem [shape: f32[1,1,1,48], index: 2, kind: input, shape index: {}]   ;;  %s458_s3 = inlined_call_operand.vmem [shape: f32[2,2,2,48], index: 3, kind: output, shape index: {}]  }
   0x1   :  { %v14_v0 = vld [vmem:[%s455_s0] sm:$0x3]  ;;  %v47_v5 = vld [vmem:[%s455_s0 + $0x2] sm:$0x3]  ;;  %v187_v8 = vld [vmem:[%s455_s0 + $0x4] sm:$0x3] }
   0x2   :  { %v253_v1 = vld [vmem:[%s456_s1] ss:$0 sm:$0xff]  ;;  %v30_v2 = vld [vmem:[%s455_s0 + $0x1] sm:$0x3]  ;;  %v279_v9 = vld [vmem:[%s456_s1 + $0x3] ss:$0 sm:$0xff] }
   0x3   :  { %v261_v3 = vld [vmem:[%s456_s1 + $0x1] ss:$0 sm:$0xff]  ;;  %v22_v4 = vmul.f32 %v253_v1, %v14_v0  ;;  %v270_v6 = vld [vmem:[%s456_s1 + $0x2] ss:$0 sm:$0xff]  ;;  %v192_v11 = vld [vmem:[%s455_s0 + $0x5] sm:$0x3]  ;;  %v74_v14 = vmul.f32 %v279_v9, %v187_v8 }
   0x4   :  { %v39_v7 = vmul.f32 %v261_v3, %v30_v2  ;;  %v56_v10 = vmul.f32 %v270_v6, %v47_v5  ;;  %v288_v12 = vld [vmem:[%s456_s1 + $0x4] ss:$0 sm:$0xff]  ;;  %v294_v15 = vld [vmem:[%s456_s1 + $0x5] ss:$0 sm:$0xff]  ;;  %v197_v16 = vld [vmem:[%s455_s0 + $0x6] sm:$0x3] }
   0x5   :  { %v91_v18 = vmul.f32 %v288_v12, %v192_v11  ;;  %v303_v19 = vld [vmem:[%s456_s1 + $0x6] ss:$0 sm:$0xff]  ;;  %v202_v20 = vld [vmem:[%s455_s0 + $0x8] sm:$0x3]  ;;  %v108_v23 = vmul.f32 %v294_v15, %v197_v16  ;;  %v315_v24 = vld [vmem:[%s456_s1 + $0x7] ss:$0 sm:$0xff] }
   0x6   :  { %v43_v13 = vadd.f32 %v39_v7, %v22_v4  ;;  %v207_v21 = vld [vmem:[%s455_s0 + $0x9] sm:$0x3]  ;;  %v15_v25 = vld [vmem:[%s455_s0 + $0x4] sm:$0x3]  ;;  %v48_v28 = vld [vmem:[%s455_s0 + $0x6] sm:$0x3]  ;;  %v126_v31 = vmul.f32 %v303_v19, %v202_v20 }
   0x7   :  { %v23_v26 = vmul.f32 %v253_v1, %v15_v25  ;;  %v31_v27 = vld [vmem:[%s455_s0 + $0x5] sm:$0x3]  ;;  %v188_v29 = vld [vmem:[%s455_s0 + $0x8] sm:$0x3]  ;;  %v212_v32 = vld [vmem:[%s455_s0 + $0xa] sm:$0x3]  ;;  %v57_v35 = vmul.f32 %v270_v6, %v48_v28  ;;  %v143_v40 = vmul.f32 %v315_v24, %v207_v21 }
   0x8   :  { %v60_v17 = vadd.f32 %v56_v10, %v43_v13  ;;  %v337_v33 = vld [vmem:[%s456_s1 + $0x8] ss:$0 sm:$0xff]  ;;  %v40_v34 = vmul.f32 %v261_v3, %v31_v27  ;;  %v193_v36 = vld [vmem:[%s455_s0 + $0x9] sm:$0x3]  ;;  %v16_v38 = vld [vmem:[%s455_s0 + $0x10] sm:$0x3]  ;;  %v75_v42 = vmul.f32 %v279_v9, %v188_v29 }
   0x9   :  { %v198_v37 = vld [vmem:[%s455_s0 + $0xa] sm:$0x3]  ;;  %v32_v43 = vld [vmem:[%s455_s0 + $0x11] sm:$0x3]  ;;  %v189_v45 = vld [vmem:[%s455_s0 + $0x14] sm:$0x3]  ;;  %v24_v46 = vmul.f32 %v253_v1, %v16_v38  ;;  %v160_v50 = vmul.f32 %v337_v33, %v212_v32  ;;  %v92_v52 = vmul.f32 %v288_v12, %v193_v36 }
   0xa   :  { %v78_v22 = vadd.f32 %v74_v14, %v60_v17  ;;  %v44_v41 = vadd.f32 %v40_v34, %v23_v26  ;;  %v49_v44 = vld [vmem:[%s455_s0 + $0x12] sm:$0x3]  ;;  %v41_v47 = vmul.f32 %v261_v3, %v32_v43  ;;  %v203_v53 = vld [vmem:[%s455_s0 + $0xc] sm:$0x3]  ;;  %v194_v54 = vld [vmem:[%s455_s0 + $0x15] sm:$0x3]  ;;  %v109_v56 = vmul.f32 %v294_v15, %v198_v37 }
   0xb   :  { %v58_v48 = vmul.f32 %v270_v6, %v49_v44  ;;  %v17_v55 = vld [vmem:[%s455_s0 + $0x14] sm:$0x3]  ;;  %v76_v58 = vmul.f32 %v279_v9, %v189_v45  ;;  %v50_v60 = vld [vmem:[%s455_s0 + $0x16] sm:$0x3]  ;;  %v190_v61 = vld [vmem:[%s455_s0 + $0x18] sm:$0x3]  ;;  %v127_v8 = vmul.f32 %v303_v19, %v203_v53  ;;  %v93_v11 = vmul.f32 %v288_v12, %v194_v54 }
   0xc   :  { %v95_v30 = vadd.f32 %v91_v18, %v78_v22  ;;  %v61_v51 = vadd.f32 %v57_v35, %v44_v41  ;;  %v45_v57 = vadd.f32 %v41_v47, %v24_v46  ;;  %v33_v59 = vld [vmem:[%s455_s0 + $0x15] sm:$0x3]  ;;  %v226_v63 = vld [vmem:[%s457_s2] ss:$0 sm:$0xff]  ;;  %v208_v2 = vld [vmem:[%s455_s0 + $0xd] sm:$0x3]  ;;  %v25_v5 = vmul.f32 %v253_v1, %v17_v55 }
   0xd   :  { %v199_v4 = vld [vmem:[%s455_s0 + $0x16] sm:$0x3]  ;;  %v42_v7 = vmul.f32 %v261_v3, %v33_v59  ;;  %v59_v13 = vmul.f32 %v270_v6, %v50_v60  ;;  %v195_v14 = vld [vmem:[%s455_s0 + $0x19] sm:$0x3]  ;;  %v77_v3 = vmul.f32 %v279_v9, %v190_v61  ;;  %v144_v20 = vmul.f32 %v315_v24, %v208_v2  ;;  %v213_v6 = vld [vmem:[%s455_s0 + $0xe] sm:$0x3] }
   0xe   :  { %v112_v39 = vadd.f32 %v108_v23, %v95_v30  ;;  %v79_v0 = vadd.f32 %v75_v42, %v61_v51  ;;  %v62_v10 = vadd.f32 %v58_v48, %v45_v57  ;;  %v204_v18 = vld [vmem:[%s455_s0 + $0x18] sm:$0x3]  ;;  %v110_v22 = vmul.f32 %v294_v15, %v199_v4  ;;  %v200_v23 = vld [vmem:[%s455_s0 + $0x1a] sm:$0x3]  ;;  %v215_v45 = vld [vmem:[%s455_s0 + $0x1e] sm:$0x3] }
   0xf   :  { %v46_v1 = vadd.f32 %v42_v7, %v25_v5  ;;  %v209_v9 = vld [vmem:[%s455_s0 + $0x19] sm:$0x3]  ;;  %v94_v28 = vmul.f32 %v288_v12, %v195_v14  ;;  %v128_v30 = vmul.f32 %v303_v19, %v204_v18  ;;  %v161_v34 = vmul.f32 %v337_v33, %v213_v6 }
  0x10   :  { %v130_v49 = vadd.f32 %v126_v31, %v112_v39  ;;  %v96_v17 = vadd.f32 %v92_v52, %v79_v0  ;;  %v80_v21 = vadd.f32 %v76_v58, %v62_v10  ;;  %v205_v31 = vld [vmem:[%s455_s0 + $0x1c] sm:$0x3]  ;;  %v214_v35 = vld [vmem:[%s455_s0 + $0x1a] sm:$0x3]  ;;  %v111_v36 = vmul.f32 %v294_v15, %v200_v23 }
  0x11   :  { %v63_v27 = vadd.f32 %v59_v13, %v46_v1  ;;  %v145_v38 = vmul.f32 %v315_v24, %v209_v9  ;;  %v210_v39 = vld [vmem:[%s455_s0 + $0x1d] sm:$0x3]  ;;  %v129_v42 = vmul.f32 %v303_v19, %v205_v31  ;;  %v162_v44 = vmul.f32 %v337_v33, %v214_v35 }
  0x12   :  { %v147_v62 = vadd.f32 %v143_v40, %v130_v49  ;;  %v113_v26 = vadd.f32 %v109_v56, %v96_v17  ;;  %v97_v29 = vadd.f32 %v93_v11, %v80_v21  ;;  %v146_v47 = vmul.f32 %v315_v24, %v210_v39 }
  0x13   :  { %v81_v12 = vadd.f32 %v77_v3, %v63_v27  ;;  %v163_v51 = vmul.f32 %v337_v33, %v215_v45 }
  0x14   :  { %v164_v16 = vadd.f32 %v160_v50, %v147_v62  ;;  %v131_v32 = vadd.f32 %v127_v8, %v113_v26  ;;  %v114_v37 = vadd.f32 %v110_v22, %v97_v29 }
  0x15   :  { %v98_v41 = vadd.f32 %v94_v28, %v81_v12 }
  0x16   :  { %v172_v25 = vadd.f32 %v226_v63, %v164_v16  ;;  %v148_v40 = vadd.f32 %v144_v20, %v131_v32  ;;  %v132_v43 = vadd.f32 %v128_v30, %v114_v37 }
  0x17   :  { %v115_v15 = vadd.f32 %v111_v36, %v98_v41 }
  0x18   :  { %177 = vst.msk [vmem:[%s458_s3] sm:$0x3] %vm176_vm0, %v172_v25  ;;  %v165_v46 = vadd.f32 %v161_v34, %v148_v40  ;;  %v149_v48 = vadd.f32 %v145_v38, %v132_v43 }
  0x19   :  { %v133_v50 = vadd.f32 %v129_v42, %v115_v15 }
  0x1a   :  { %v173_v49 = vadd.f32 %v226_v63, %v165_v46  ;;  %v166_v52 = vadd.f32 %v162_v44, %v149_v48 }
  0x1b   :  { %v150_v19 = vadd.f32 %v146_v47, %v133_v50 }
  0x1c   :  { %178 = vst.msk [vmem:[%s458_s3 + $0x2] sm:$0x3] %vm176_vm0, %v173_v49  ;;  %v174_v53 = vadd.f32 %v226_v63, %v166_v52 }
  0x1d   :  { %v167_v54 = vadd.f32 %v163_v51, %v150_v19 }
  0x1e   :  { %179 = vst.msk [vmem:[%s458_s3 + $0x4] sm:$0x3] %vm176_vm0, %v174_v53 }
  0x1f   :  { %v175_v24 = vadd.f32 %v226_v63, %v167_v54 }
  0x21   :  { %180 = vst.msk [vmem:[%s458_s3 + $0x6] sm:$0x3] %vm176_vm0, %v175_v24 }

// kernel: _lambda_.104
= control target key start
LH: loop header
LB: loop body
LE: loop exit
PB: predicated region body
PF: predicated region fallthrough
CT: control target
= control target key end

     0   :  { %vm93_vm0 = vcmask 778240   ;;  %s232_s0 = inlined_call_operand.vmem [shape: f32[8,2,2,96], index: 0, kind: input, shape index: {}]   ;;  %s233_s1 = inlined_call_operand.vmem [shape: f32[9,1,1,96], index: 1, kind: input, shape index: {}]   ;;  %s234_s2 = inlined_call_operand.vmem [shape: f32[1,1,1,96], index: 2, kind: input, shape index: {}]   ;;  %s235_s3 = inlined_call_operand.vmem [shape: f32[2,1,1,96], index: 3, kind: output, shape index: {}]  }
   0x1   :  { %v14_v0 = vld [vmem:[%s232_s0] sm:$0x1]  ;;  %v100_v2 = vld [vmem:[%s232_s0 + $0x8] sm:$0x1]  ;;  %v102_v4 = vld [vmem:[%s233_s1 + $0x1] sm:$0x1] }
   0x2   :  { %v16_v1 = vld [vmem:[%s233_s1] sm:$0x1]  ;;  %v30_v5 = vld [vmem:[%s232_s0 + $0x1] sm:$0x1]  ;;  %v103_v6 = vld [vmem:[%s233_s1 + $0x2] sm:$0x1]  ;;  %v26_v7 = vmul.f32 %v102_v4, %v100_v2 }
   0x3   :  { %v17_v3 = vmul.f32 %v16_v1, %v14_v0  ;;  %v34_v8 = vmul.f32 %v103_v6, %v30_v5  ;;  %v104_v9 = vld [vmem:[%s232_s0 + $0x10] sm:$0x1]  ;;  %v106_v10 = vld [vmem:[%s233_s1 + $0x3] sm:$0x1]  ;;  %v107_v11 = vld [vmem:[%s232_s0 + $0x18] sm:$0x1] }
   0x4   :  { %v109_v12 = vld [vmem:[%s233_s1 + $0x4] sm:$0x1]  ;;  %v43_v14 = vmul.f32 %v106_v10, %v104_v9  ;;  %v110_v15 = vld [vmem:[%s232_s0 + $0x11] sm:$0x1]  ;;  %v112_v16 = vld [vmem:[%s233_s1 + $0x5] sm:$0x1] }
   0x5   :  { %v28_v13 = vadd.f32 %v26_v7, %v17_v3  ;;  %v52_v18 = vmul.f32 %v109_v12, %v107_v11  ;;  %v113_v19 = vld [vmem:[%s232_s0 + $0x2] sm:$0x1]  ;;  %v15_v20 = vld [vmem:[%s232_s0 + $0x4] sm:$0x1]  ;;  %v101_v21 = vld [vmem:[%s232_s0 + $0xc] sm:$0x1]  ;;  %v60_v28 = vmul.f32 %v112_v16, %v110_v15 }
   0x6   :  { %v115_v22 = vld [vmem:[%s233_s1 + $0x6] sm:$0x1]  ;;  %v18_v23 = vmul.f32 %v16_v1, %v15_v20  ;;  %v27_v24 = vmul.f32 %v102_v4, %v101_v21  ;;  %v31_v25 = vld [vmem:[%s232_s0 + $0x5] sm:$0x1]  ;;  %v105_v26 = vld [vmem:[%s232_s0 + $0x14] sm:$0x1] }
   0x7   :  { %v36_v17 = vadd.f32 %v34_v8, %v28_v13  ;;  %v35_v29 = vmul.f32 %v103_v6, %v31_v25  ;;  %v108_v30 = vld [vmem:[%s232_s0 + $0x1c] sm:$0x1]  ;;  %v116_v31 = vld [vmem:[%s232_s0 + $0xa] sm:$0x1]  ;;  %v118_v32 = vld [vmem:[%s233_s1 + $0x7] sm:$0x1]  ;;  %v44_v34 = vmul.f32 %v106_v10, %v105_v26  ;;  %v69_v36 = vmul.f32 %v115_v22, %v113_v19 }
   0x8   :  { %v29_v33 = vadd.f32 %v27_v24, %v18_v23  ;;  %v111_v37 = vld [vmem:[%s232_s0 + $0x15] sm:$0x1]  ;;  %v119_v38 = vld [vmem:[%s232_s0 + $0x3] sm:$0x1]  ;;  %v121_v39 = vld [vmem:[%s233_s1 + $0x8] sm:$0x1]  ;;  %v53_v41 = vmul.f32 %v109_v12, %v108_v30  ;;  %v78_v43 = vmul.f32 %v118_v32, %v116_v31 }
   0x9   :  { %v45_v27 = vadd.f32 %v43_v14, %v36_v17  ;;  %v114_v44 = vld [vmem:[%s232_s0 + $0x6] sm:$0x1]  ;;  %v61_v46 = vmul.f32 %v112_v16, %v111_v37  ;;  %v86_v48 = vmul.f32 %v121_v39, %v119_v38  ;;  %v117_v49 = vld [vmem:[%s232_s0 + $0xe] sm:$0x1]  ;;  %v120_v53 = vld [vmem:[%s232_s0 + $0x7] sm:$0x1] }
   0xa   :  { %v37_v40 = vadd.f32 %v35_v29, %v29_v33  ;;  %v70_v51 = vmul.f32 %v115_v22, %v114_v44  ;;  %v90_v54 = vld [vmem:[%s234_s2] sm:$0x1]  ;;  %v79_v56 = vmul.f32 %v118_v32, %v117_v49  ;;  %v87_v59 = vmul.f32 %v121_v39, %v120_v53 }
   0xb   :  { %v54_v35 = vadd.f32 %v52_v18, %v45_v27 }
   0xc   :  { %v46_v45 = vadd.f32 %v44_v34, %v37_v40 }
   0xd   :  { %v62_v42 = vadd.f32 %v60_v28, %v54_v35 }
   0xe   :  { %v55_v50 = vadd.f32 %v53_v41, %v46_v45 }
   0xf   :  { %v71_v47 = vadd.f32 %v69_v36, %v62_v42 }
  0x10   :  { %v63_v55 = vadd.f32 %v61_v46, %v55_v50 }
  0x11   :  { %v80_v52 = vadd.f32 %v78_v43, %v71_v47 }
  0x12   :  { %v72_v58 = vadd.f32 %v70_v51, %v63_v55 }
  0x13   :  { %v88_v57 = vadd.f32 %v86_v48, %v80_v52 }
  0x14   :  { %v81_v61 = vadd.f32 %v79_v56, %v72_v58 }
  0x15   :  { %v91_v60 = vadd.f32 %v90_v54, %v88_v57 }
  0x16   :  { %v89_v62 = vadd.f32 %v87_v59, %v81_v61 }
  0x17   :  { %94 = vst.msk [vmem:[%s235_s3] sm:$0x1] %vm93_vm0, %v91_v60 }
  0x18   :  { %v92_v63 = vadd.f32 %v90_v54, %v89_v62 }
  0x1a   :  { %95 = vst.msk [vmem:[%s235_s3 + $0x1] sm:$0x1] %vm93_vm0, %v92_v63 }

// kernel: _lambda_.107
= control target key start
LH: loop header
LB: loop body
LE: loop exit
PB: predicated region body
PF: predicated region fallthrough
CT: control target
= control target key end

     0   :  { %vm90_vm0 = vcmask 778240   ;;  %s227_s0 = inlined_call_operand.vmem [shape: f32[2,3,3,96], index: 0, kind: input, shape index: {}]   ;;  %s228_s1 = inlined_call_operand.vmem [shape: f32[9,1,1,96], index: 1, kind: input, shape index: {}]   ;;  %s229_s2 = inlined_call_operand.vmem [shape: f32[1,1,1,96], index: 2, kind: input, shape index: {}]   ;;  %s230_s3 = inlined_call_operand.vmem [shape: f32[2,1,1,96], index: 3, kind: output, shape index: {}]  }
   0x1   :  { %v14_v0 = vld [vmem:[%s227_s0] sm:$0x1]  ;;  %v21_v2 = vld [vmem:[%s227_s0 + $0x1] sm:$0x1]  ;;  %v29_v5 = vld [vmem:[%s227_s0 + $0x2] sm:$0x1] }
   0x2   :  { %v16_v1 = vld [vmem:[%s228_s1] sm:$0x1]  ;;  %v97_v4 = vld [vmem:[%s228_s1 + $0x1] sm:$0x1]  ;;  %v98_v6 = vld [vmem:[%s228_s1 + $0x2] sm:$0x1] }
   0x3   :  { %v17_v3 = vmul.f32 %v16_v1, %v14_v0  ;;  %v25_v7 = vmul.f32 %v97_v4, %v21_v2  ;;  %v33_v8 = vmul.f32 %v98_v6, %v29_v5  ;;  %v99_v9 = vld [vmem:[%s227_s0 + $0x4] sm:$0x1]  ;;  %v101_v10 = vld [vmem:[%s228_s1 + $0x3] sm:$0x1]  ;;  %v102_v11 = vld [vmem:[%s227_s0 + $0x5] sm:$0x1] }
   0x4   :  { %v104_v12 = vld [vmem:[%s228_s1 + $0x4] sm:$0x1]  ;;  %v42_v14 = vmul.f32 %v101_v10, %v99_v9  ;;  %v105_v15 = vld [vmem:[%s227_s0 + $0x6] sm:$0x1]  ;;  %v107_v16 = vld [vmem:[%s228_s1 + $0x5] sm:$0x1] }
   0x5   :  { %v27_v13 = vadd.f32 %v25_v7, %v17_v3  ;;  %v50_v18 = vmul.f32 %v104_v12, %v102_v11  ;;  %v108_v19 = vld [vmem:[%s227_s0 + $0x8] sm:$0x1]  ;;  %v15_v20 = vld [vmem:[%s227_s0 + $0xc] sm:$0x1]  ;;  %v22_v21 = vld [vmem:[%s227_s0 + $0xd] sm:$0x1]  ;;  %v58_v28 = vmul.f32 %v107_v16, %v105_v15 }
   0x6   :  { %v110_v22 = vld [vmem:[%s228_s1 + $0x6] sm:$0x1]  ;;  %v18_v23 = vmul.f32 %v16_v1, %v15_v20  ;;  %v26_v24 = vmul.f32 %v97_v4, %v22_v21  ;;  %v30_v25 = vld [vmem:[%s227_s0 + $0xe] sm:$0x1]  ;;  %v100_v26 = vld [vmem:[%s227_s0 + $0x10] sm:$0x1] }
   0x7   :  { %v35_v17 = vadd.f32 %v33_v8, %v27_v13  ;;  %v34_v29 = vmul.f32 %v98_v6, %v30_v25  ;;  %v103_v30 = vld [vmem:[%s227_s0 + $0x11] sm:$0x1]  ;;  %v111_v31 = vld [vmem:[%s227_s0 + $0x9] sm:$0x1]  ;;  %v113_v32 = vld [vmem:[%s228_s1 + $0x7] sm:$0x1]  ;;  %v43_v34 = vmul.f32 %v101_v10, %v100_v26  ;;  %v67_v36 = vmul.f32 %v110_v22, %v108_v19 }
   0x8   :  { %v28_v33 = vadd.f32 %v26_v24, %v18_v23  ;;  %v106_v37 = vld [vmem:[%s227_s0 + $0x12] sm:$0x1]  ;;  %v114_v38 = vld [vmem:[%s227_s0 + $0xa] sm:$0x1]  ;;  %v116_v39 = vld [vmem:[%s228_s1 + $0x8] sm:$0x1]  ;;  %v51_v41 = vmul.f32 %v104_v12, %v103_v30  ;;  %v75_v43 = vmul.f32 %v113_v32, %v111_v31 }
   0x9   :  { %v44_v27 = vadd.f32 %v42_v14, %v35_v17  ;;  %v109_v44 = vld [vmem:[%s227_s0 + $0x14] sm:$0x1]  ;;  %v59_v46 = vmul.f32 %v107_v16, %v106_v37  ;;  %v83_v48 = vmul.f32 %v116_v39, %v114_v38  ;;  %v112_v49 = vld [vmem:[%s227_s0 + $0x15] sm:$0x1]  ;;  %v115_v53 = vld [vmem:[%s227_s0 + $0x16] sm:$0x1] }
   0xa   :  { %v36_v40 = vadd.f32 %v34_v29, %v28_v33  ;;  %v68_v51 = vmul.f32 %v110_v22, %v109_v44  ;;  %v87_v54 = vld [vmem:[%s229_s2] sm:$0x1]  ;;  %v76_v56 = vmul.f32 %v113_v32, %v112_v49  ;;  %v84_v59 = vmul.f32 %v116_v39, %v115_v53 }
   0xb   :  { %v52_v35 = vadd.f32 %v50_v18, %v44_v27 }
   0xc   :  { %v45_v45 = vadd.f32 %v43_v34, %v36_v40 }
   0xd   :  { %v60_v42 = vadd.f32 %v58_v28, %v52_v35 }
   0xe   :  { %v53_v50 = vadd.f32 %v51_v41, %v45_v45 }
   0xf   :  { %v69_v47 = vadd.f32 %v67_v36, %v60_v42 }
  0x10   :  { %v61_v55 = vadd.f32 %v59_v46, %v53_v50 }
  0x11   :  { %v77_v52 = vadd.f32 %v75_v43, %v69_v47 }
  0x12   :  { %v70_v58 = vadd.f32 %v68_v51, %v61_v55 }
  0x13   :  { %v85_v57 = vadd.f32 %v83_v48, %v77_v52 }
  0x14   :  { %v78_v61 = vadd.f32 %v76_v56, %v70_v58 }
  0x15   :  { %v88_v60 = vadd.f32 %v87_v54, %v85_v57 }
  0x16   :  { %v86_v62 = vadd.f32 %v84_v59, %v78_v61 }
  0x17   :  { %91 = vst.msk [vmem:[%s230_s3] sm:$0x1] %vm90_vm0, %v88_v60 }
  0x18   :  { %v89_v63 = vadd.f32 %v87_v54, %v86_v62 }
  0x1a   :  { %92 = vst.msk [vmem:[%s230_s3 + $0x1] sm:$0x1] %vm90_vm0, %v89_v63 }

// kernel: _lambda_.116
= control target key start
LH: loop header
LB: loop body
LE: loop exit
PB: predicated region body
PF: predicated region fallthrough
CT: control target
= control target key end

     0   :  { %s49_s0 = inlined_call_operand.vmem [shape: f32[2,1,1024], index: 0, kind: input, shape index: {}]   ;;  %s50_s1 = inlined_call_operand.vmem [shape: f32[2,1024], index: 1, kind: output, shape index: {}]  }
   0x1   :  { %v8_v0 = vld [vmem:[%s49_s0] sm:$0xff]  ;;  %v9_v1 = vld [vmem:[%s49_s0 + $0x8] sm:$0xff] }
   0x2   :  { %14 = vst [vmem:[#allocation1] ss:$2 sm:$0xff] %v8_v0 }
   0x3   :  { %16 = vst [vmem:[#allocation1 + $0x1] ss:$2 sm:$0xff] %v9_v1 }
   0xa   :  { %v17_v2 = vld [vmem:[#allocation1] sm:$0xff]  ;;  %v18_v3 = vld [vmem:[#allocation1 + $0x8] sm:$0xff] }
   0xb   :  { %21 = vst [vmem:[%s50_s1] sm:$0xff] %v17_v2 }
   0xc   :  { %22 = vst [vmem:[%s50_s1 + $0x8] sm:$0xff] %v18_v3 }

// kernel: _lambda_.115
= control target key start
LH: loop header
LB: loop body
LE: loop exit
PB: predicated region body
PF: predicated region fallthrough
CT: control target
= control target key end

     0   :  { %s1103_s12 = smov 0   ;;  %s1105_s13 = smov 0   ;;  %s1308_s0 = inlined_call_operand.vmem [shape: bf16[8,256], index: 0, kind: input, shape index: {}]   ;;  %s1309_s1 = inlined_call_operand.vmem [shape: bf16[256,1024], index: 1, kind: input, shape index: {}]   ;;  %s1310_s2 = inlined_call_operand.vmem [shape: f32[1,1024], index: 2, kind: input, shape index: {}]   ;;  %s1311_s3 = inlined_call_operand.vmem [shape: f32[8,1024], index: 3, kind: output, shape index: {}]  }
   0x1   :  { %s1107_s14 = smov 0   ;;  %s1109_s15 = smov 0  }
   0x2   :  { %s1111_s16 = smov 0  }
   0x3 LB: > { %s28_s17 = sadd.s32 1, %s1077_s15  ;;  %p76_p1 = scmp.ne.s32.totalorder %s1069_s13, %s1065_s12  ;;  %s1081_s16 = sphi %s1111_s16, %s13_s16   ;;  %s1077_s15 = sphi %s1109_s15, %s1315_s15   ;;  %s1073_s14 = sphi %s1107_s14, %s1314_s14   ;;  %s1069_s13 = sphi %s1105_s13, %s1313_s13   ;;  %s1065_s12 = sphi %s1103_s12, %s1312_s12  }
   0x4   : > { %p30_p0 = scmp.ge.s32.totalorder %s28_s17, 4  ;;  %p77_p2 = scmp.eq.s32.totalorder %s1081_s16, 0 }
   0x5   : > { %s69_s19 = sadd.s32 1, %s1069_s13  ;;  %p831_p5 = scmp.ge.s32.totalorder %s1081_s16, 4 }
   0x6   : > { %s1317_s17 = smov (%p30_p0, %s28_s17), 0  ;;  %p78_p3 = por %p77_p2, %p76_p1 }
   0x7   : > { %s65_s18 = ssub.s32 %s1077_s15, %s1317_s17  ;;  %169 = sbr.rel (%p831_p5) target bundleno = 48 (0x30), region = 20 }
   0x8   : > { %p67_p4 = scmp.eq.s32.totalorder %s65_s18, 0 }
   0xa   : > { %s1138_s20 = scalar_select %p67_p4, %s1069_s13, %s69_s19  }
   0xc   : > { %172 = sbr.rel (!%p78_p3) target bundleno = 48 (0x30), region = 24  ;;  %s174_s21 = sand.u32 (%p78_p3), 1, %s1069_s13  }
   0xd   : > { %s970_s22 = sshll.u32 (%p78_p3), %s1077_s15, 3  ;;  %s832_s23 = sshll.u32 (%p78_p3), %s174_s21, 8 }
   0xe   : > { %s1146_s26 = scalar_lea.vmem (%p78_p3), %s1309_s1, %s970_s22  ;;  %s1151_s27 = scalar_lea.vmem (%p78_p3), [#allocation3], %s832_s23 }
   0xf   : > { %v273_v0 = vld [vmem:[%s1146_s26] sm:$0xff] (%p78_p3) }
  0x10   : > { %v275_v1 = vld [vmem:[%s1146_s26 + $0x20] sm:$0xff] (%p78_p3)  ;;  %274 = vst [vmem:[%s1151_s27] sm:$0xff] (%p78_p3), %v273_v0 }
  0x11   : > { %v277_v2 = vld [vmem:[%s1146_s26 + $0x40] sm:$0xff]  ;;  %276 = vst [vmem:[%s1151_s27 + $0x8] sm:$0xff] %v275_v1 }
  0x12   : > { %v279_v3 = vld [vmem:[%s1146_s26 + $0x60] sm:$0xff]  ;;  %278 = vst [vmem:[%s1151_s27 + $0x10] sm:$0xff] %v277_v2 }
  0x13   : > { %v281_v4 = vld [vmem:[%s1146_s26 + $0x80] sm:$0xff]  ;;  %280 = vst [vmem:[%s1151_s27 + $0x18] sm:$0xff] %v279_v3 }
  0x14   : > { %v283_v5 = vld [vmem:[%s1146_s26 + $0xa0] sm:$0xff]  ;;  %282 = vst [vmem:[%s1151_s27 + $0x20] sm:$0xff] %v281_v4 }
  0x15   : > { %v285_v6 = vld [vmem:[%s1146_s26 + $0xc0] sm:$0xff]  ;;  %284 = vst [vmem:[%s1151_s27 + $0x28] sm:$0xff] %v283_v5 }
  0x16   : > { %v287_v7 = vld [vmem:[%s1146_s26 + $0xe0] sm:$0xff]  ;;  %286 = vst [vmem:[%s1151_s27 + $0x30] sm:$0xff] %v285_v6 }
  0x17   : > { %v289_v8 = vld [vmem:[%s1146_s26 + $0x100] sm:$0xff]  ;;  %288 = vst [vmem:[%s1151_s27 + $0x38] sm:$0xff] %v287_v7 }
  0x18   : > { %v291_v9 = vld [vmem:[%s1146_s26 + $0x120] sm:$0xff]  ;;  %290 = vst [vmem:[%s1151_s27 + $0x40] sm:$0xff] %v289_v8 }
  0x19   : > { %v293_v10 = vld [vmem:[%s1146_s26 + $0x140] sm:$0xff]  ;;  %292 = vst [vmem:[%s1151_s27 + $0x48] sm:$0xff] %v291_v9 }
  0x1a   : > { %v295_v11 = vld [vmem:[%s1146_s26 + $0x160] sm:$0xff]  ;;  %294 = vst [vmem:[%s1151_s27 + $0x50] sm:$0xff] %v293_v10 }
  0x1b   : > { %v297_v12 = vld [vmem:[%s1146_s26 + $0x180] sm:$0xff]  ;;  %296 = vst [vmem:[%s1151_s27 + $0x58] sm:$0xff] %v295_v11 }
  0x1c   : > { %v299_v13 = vld [vmem:[%s1146_s26 + $0x1a0] sm:$0xff]  ;;  %298 = vst [vmem:[%s1151_s27 + $0x60] sm:$0xff] %v297_v12 }
  0x1d   : > { %v301_v14 = vld [vmem:[%s1146_s26 + $0x1c0] sm:$0xff]  ;;  %300 = vst [vmem:[%s1151_s27 + $0x68] sm:$0xff] %v299_v13 }
  0x1e   : > { %v303_v15 = vld [vmem:[%s1146_s26 + $0x1e0] sm:$0xff]  ;;  %302 = vst [vmem:[%s1151_s27 + $0x70] sm:$0xff] %v301_v14 }
  0x1f   : > { %v305_v16 = vld [vmem:[%s1146_s26 + $0x200] sm:$0xff]  ;;  %304 = vst [vmem:[%s1151_s27 + $0x78] sm:$0xff] %v303_v15 }
  0x20   : > { %v307_v17 = vld [vmem:[%s1146_s26 + $0x220] sm:$0xff]  ;;  %306 = vst [vmem:[%s1151_s27 + $0x80] sm:$0xff] %v305_v16 }
  0x21   : > { %v309_v18 = vld [vmem:[%s1146_s26 + $0x240] sm:$0xff]  ;;  %308 = vst [vmem:[%s1151_s27 + $0x88] sm:$0xff] %v307_v17 }
  0x22   : > { %v311_v19 = vld [vmem:[%s1146_s26 + $0x260] sm:$0xff]  ;;  %310 = vst [vmem:[%s1151_s27 + $0x90] sm:$0xff] %v309_v18 }
  0x23   : > { %v313_v20 = vld [vmem:[%s1146_s26 + $0x280] sm:$0xff]  ;;  %312 = vst [vmem:[%s1151_s27 + $0x98] sm:$0xff] %v311_v19 }
  0x24   : > { %v315_v21 = vld [vmem:[%s1146_s26 + $0x2a0] sm:$0xff]  ;;  %314 = vst [vmem:[%s1151_s27 + $0xa0] sm:$0xff] %v313_v20 }
  0x25   : > { %v317_v22 = vld [vmem:[%s1146_s26 + $0x2c0] sm:$0xff]  ;;  %316 = vst [vmem:[%s1151_s27 + $0xa8] sm:$0xff] %v315_v21 }
  0x26   : > { %v319_v23 = vld [vmem:[%s1146_s26 + $0x2e0] sm:$0xff]  ;;  %318 = vst [vmem:[%s1151_s27 + $0xb0] sm:$0xff] %v317_v22 }
  0x27   : > { %v321_v24 = vld [vmem:[%s1146_s26 + $0x300] sm:$0xff]  ;;  %320 = vst [vmem:[%s1151_s27 + $0xb8] sm:$0xff] %v319_v23 }
  0x28   : > { %v323_v25 = vld [vmem:[%s1146_s26 + $0x320] sm:$0xff]  ;;  %322 = vst [vmem:[%s1151_s27 + $0xc0] sm:$0xff] %v321_v24 }
  0x29   : > { %v325_v26 = vld [vmem:[%s1146_s26 + $0x340] sm:$0xff]  ;;  %324 = vst [vmem:[%s1151_s27 + $0xc8] sm:$0xff] %v323_v25 }
  0x2a   : > { %v327_v27 = vld [vmem:[%s1146_s26 + $0x360] sm:$0xff]  ;;  %326 = vst [vmem:[%s1151_s27 + $0xd0] sm:$0xff] %v325_v26 }
  0x2b   : > { %v329_v28 = vld [vmem:[%s1146_s26 + $0x380] sm:$0xff]  ;;  %328 = vst [vmem:[%s1151_s27 + $0xd8] sm:$0xff] %v327_v27 }
  0x2c   : > { %v331_v29 = vld [vmem:[%s1146_s26 + $0x3a0] sm:$0xff]  ;;  %330 = vst [vmem:[%s1151_s27 + $0xe0] sm:$0xff] %v329_v28 }
  0x2d   : > { %v333_v30 = vld [vmem:[%s1146_s26 + $0x3c0] sm:$0xff]  ;;  %332 = vst [vmem:[%s1151_s27 + $0xe8] sm:$0xff] %v331_v29 }
  0x2e   : > { %v335_v31 = vld [vmem:[%s1146_s26 + $0x3e0] sm:$0xff]  ;;  %334 = vst [vmem:[%s1151_s27 + $0xf0] sm:$0xff] %v333_v30 }
  0x2f   : > { %336 = vst [vmem:[%s1151_s27 + $0xf8] sm:$0xff] %v335_v31 }
  0x30 PF: > { %p835_p6 = scmp.ge.s32.totalorder %s1081_s16, 1  ;;  %p349_p7 = scmp.lt.s32.totalorder %s1081_s16, 5 }
  0x32   : > { %p350_p8 = pnand %p835_p6, %p349_p7 }
  0x33   : > { %s356_s28 = sand.u32 (!%p350_p8), 1, %s1065_s12   ;;  %s837_s6 = sshll.u32 (!%p350_p8), %s1073_s14, 1 }
  0x34   : > { %353 = sbr.rel (%p350_p8) target bundleno = 233 (0xe9), region = 66  ;;  %s836_s29 = sshll.u32 (!%p350_p8), %s356_s28, 8 }
  0x35   : > { %s1217_s30 = scalar_lea.vmem (!%p350_p8), [#allocation3], %s836_s29  ;;  %p409_p9 = scmp.lt.s32.totalorder (!%p350_p8), %s837_s6, 7 }
  0x39   : > { %v898_v32 = vld [vmem:[%s1217_s30 + $0x70] sm:$0xf]  ;;  %v986_v33 = vld [vmem:[%s1217_s30 + $0x74] sm:$0xf0]  ;;  %v985_v37 = vld [vmem:[%s1217_s30 + $0x74] sm:$0xf] }
  0x3a   : > { %v962_v34 = vld [vmem:[%s1217_s30 + $0xf0] sm:$0xf]  ;;  %v899_v35 = vor.u32 %v986_v33, %v898_v32  ;;  %v1002_v36 = vld [vmem:[%s1217_s30 + $0xf4] sm:$0xf0]  ;;  %v900_v38 = vld [vmem:[%s1217_s30 + $0x78] sm:$0xf0] }
  0x3b   : > { %v963_v39 = vor.u32 %v1002_v36, %v962_v34  ;;  %v903_v40 = vor.u32 %v985_v37, %v900_v38  ;;  %v1001_v41 = vld [vmem:[%s1217_s30 + $0xf4] sm:$0xf]  ;;  %v964_v42 = vld [vmem:[%s1217_s30 + $0xf8] sm:$0xf0]  ;;  %v890_v43 = vld [vmem:[%s1217_s30 + $0x60] sm:$0xf] }
  0x3c   : > { %631 = vmatpush.bf16.msra.mxu0 %v899_v35  ;;  %v967_v44 = vor.u32 %v1001_v41, %v964_v42  ;;  %v984_v45 = vld [vmem:[%s1217_s30 + $0x64] sm:$0xf0]  ;;  %v954_v46 = vld [vmem:[%s1217_s30 + $0xe0] sm:$0xf]  ;;  %v983_v50 = vld [vmem:[%s1217_s30 + $0x64] sm:$0xf] }
  0x3d   : > { %v1000_v47 = vld [vmem:[%s1217_s30 + $0xe4] sm:$0xf0]  ;;  %644 = vmatpush.bf16.msra.mxu1 %v963_v39  ;;  %657 = vmatpush.bf16.msra.mxu2 %v903_v40  ;;  %v891_v48 = vor.u32 %v984_v45, %v890_v43  ;;  %v892_v51 = vld [vmem:[%s1217_s30 + $0x68] sm:$0xf0]  ;;  %v999_v52 = vld [vmem:[%s1217_s30 + $0xe4] sm:$0xf] }
  0x3e   : > { %v955_v49 = vor.u32 %v1000_v47, %v954_v46  ;;  %670 = vmatpush.bf16.msra.mxu3 %v967_v44  ;;  %v895_v53 = vor.u32 %v983_v50, %v892_v51  ;;  %v956_v54 = vld [vmem:[%s1217_s30 + $0xe8] sm:$0xf0]  ;;  %v882_v55 = vld [vmem:[%s1217_s30 + $0x50] sm:$0xf]  ;;  %v982_v56 = vld [vmem:[%s1217_s30 + $0x54] sm:$0xf0] }
  0x3f   : > { %v959_v57 = vor.u32 %v999_v52, %v956_v54  ;;  %v946_v58 = vld [vmem:[%s1217_s30 + $0xd0] sm:$0xf]  ;;  %v998_v59 = vld [vmem:[%s1217_s30 + $0xd4] sm:$0xf0]  ;;  %v981_v60 = vld [vmem:[%s1217_s30 + $0x54] sm:$0xf]  ;;  %v883_v61 = vor.u32 %v982_v56, %v882_v55 }
  0x40   : > { %632 = vmatpush.bf16.msra.mxu0 %v891_v48  ;;  %v884_v62 = vld [vmem:[%s1217_s30 + $0x58] sm:$0xf0]  ;;  %v997_v63 = vld [vmem:[%s1217_s30 + $0xd4] sm:$0xf]  ;;  %v947_v1 = vor.u32 %v998_v59, %v946_v58  ;;  %v874_v3 = vld [vmem:[%s1217_s30 + $0x40] sm:$0xf] }
  0x41   : > { %v948_v0 = vld [vmem:[%s1217_s30 + $0xd8] sm:$0xf0]  ;;  %645 = vmatpush.bf16.msra.mxu1 %v955_v49  ;;  %658 = vmatpush.bf16.msra.mxu2 %v895_v53  ;;  %v887_v2 = vor.u32 %v981_v60, %v884_v62  ;;  %v980_v4 = vld [vmem:[%s1217_s30 + $0x44] sm:$0xf0]  ;;  %v938_v5 = vld [vmem:[%s1217_s30 + $0xc0] sm:$0xf] }
  0x42   : > { %671 = vmatpush.bf16.msra.mxu3 %v959_v57  ;;  %v951_v6 = vor.u32 %v997_v63, %v948_v0  ;;  %v996_v7 = vld [vmem:[%s1217_s30 + $0xc4] sm:$0xf0]  ;;  %v979_v8 = vld [vmem:[%s1217_s30 + $0x44] sm:$0xf]  ;;  %v876_v9 = vld [vmem:[%s1217_s30 + $0x48] sm:$0xf0]  ;;  %v875_v12 = vor.u32 %v980_v4, %v874_v3 }
  0x43   : > { %v995_v10 = vld [vmem:[%s1217_s30 + $0xc4] sm:$0xf]  ;;  %v940_v11 = vld [vmem:[%s1217_s30 + $0xc8] sm:$0xf0]  ;;  %v939_v13 = vor.u32 %v996_v7, %v938_v5  ;;  %v879_v14 = vor.u32 %v979_v8, %v876_v9  ;;  %v866_v15 = vld [vmem:[%s1217_s30 + $0x30] sm:$0xf] }
  0x44   : > { %633 = vmatpush.bf16.msra.mxu0 %v883_v61  ;;  %v978_v16 = vld [vmem:[%s1217_s30 + $0x34] sm:$0xf0]  ;;  %v930_v17 = vld [vmem:[%s1217_s30 + $0xb0] sm:$0xf]  ;;  %v943_v18 = vor.u32 %v995_v10, %v940_v11  ;;  %v977_v20 = vld [vmem:[%s1217_s30 + $0x34] sm:$0xf] }
  0x45   : > { %646 = vmatpush.bf16.msra.mxu1 %v947_v1  ;;  %659 = vmatpush.bf16.msra.mxu2 %v887_v2  ;;  %v994_v19 = vld [vmem:[%s1217_s30 + $0xb4] sm:$0xf0]  ;;  %v868_v21 = vld [vmem:[%s1217_s30 + $0x38] sm:$0xf0]  ;;  %v993_v22 = vld [vmem:[%s1217_s30 + $0xb4] sm:$0xf]  ;;  %v867_v24 = vor.u32 %v978_v16, %v866_v15 }
  0x46   : > { %672 = vmatpush.bf16.msra.mxu3 %v951_v6  ;;  %v932_v23 = vld [vmem:[%s1217_s30 + $0xb8] sm:$0xf0]  ;;  %v931_v25 = vor.u32 %v994_v19, %v930_v17  ;;  %v871_v26 = vor.u32 %v977_v20, %v868_v21  ;;  %v858_v27 = vld [vmem:[%s1217_s30 + $0x20] sm:$0xf]  ;;  %v976_v28 = vld [vmem:[%s1217_s30 + $0x24] sm:$0xf0] }
  0x47   : > { %v922_v29 = vld [vmem:[%s1217_s30 + $0xa0] sm:$0xf]  ;;  %v935_v30 = vor.u32 %v993_v22, %v932_v23  ;;  %v992_v31 = vld [vmem:[%s1217_s30 + $0xa4] sm:$0xf0]  ;;  %v975_v32 = vld [vmem:[%s1217_s30 + $0x24] sm:$0xf]  ;;  %v859_v36 = vor.u32 %v976_v28, %v858_v27 }
  0x48   : > { %634 = vmatpush.bf16.msra.mxu0 %v875_v12  ;;  %v860_v33 = vld [vmem:[%s1217_s30 + $0x28] sm:$0xf0]  ;;  %v991_v34 = vld [vmem:[%s1217_s30 + $0xa4] sm:$0xf]  ;;  %v923_v37 = vor.u32 %v992_v31, %v922_v29  ;;  %v850_v39 = vld [vmem:[%s1217_s30 + $0x10] sm:$0xf] }
  0x49   : > { %647 = vmatpush.bf16.msra.mxu1 %v939_v13  ;;  %660 = vmatpush.bf16.msra.mxu2 %v879_v14  ;;  %v924_v35 = vld [vmem:[%s1217_s30 + $0xa8] sm:$0xf0]  ;;  %v863_v38 = vor.u32 %v975_v32, %v860_v33  ;;  %v974_v40 = vld [vmem:[%s1217_s30 + $0x14] sm:$0xf0]  ;;  %v914_v41 = vld [vmem:[%s1217_s30 + $0x90] sm:$0xf] }
  0x4a   : > { %673 = vmatpush.bf16.msra.mxu3 %v943_v18  ;;  %v927_v42 = vor.u32 %v991_v34, %v924_v35  ;;  %v990_v43 = vld [vmem:[%s1217_s30 + $0x94] sm:$0xf0]  ;;  %v973_v44 = vld [vmem:[%s1217_s30 + $0x14] sm:$0xf]  ;;  %v852_v45 = vld [vmem:[%s1217_s30 + $0x18] sm:$0xf0]  ;;  %v851_v48 = vor.u32 %v974_v40, %v850_v39 }
  0x4b   : > { %v989_v46 = vld [vmem:[%s1217_s30 + $0x94] sm:$0xf]  ;;  %v916_v47 = vld [vmem:[%s1217_s30 + $0x98] sm:$0xf0]  ;;  %v431_v49 = vld [vmem:[%s1308_s0] sm:$0xff]  ;;  %v915_v50 = vor.u32 %v990_v43, %v914_v41  ;;  %v855_v51 = vor.u32 %v973_v44, %v852_v45  ;;  %s1319_s6 = smov (!%p409_p9, %s837_s6), 7 }
  0x4c   : > { %635 = vmatpush.bf16.msra.mxu0 %v867_v24  ;;  %v842_v52 = vld [vmem:[%s1217_s30] sm:$0xf]  ;;  %v972_v53 = vld [vmem:[%s1217_s30 + $0x4] sm:$0xf0]  ;;  %v919_v55 = vor.u32 %v989_v46, %v916_v47  ;;  %v971_v57 = vld [vmem:[%s1217_s30 + $0x4] sm:$0xf]  ;;  %v465_v61 = vunpack.c.l.b16 %v431_v49  ;;  %v466_v63 = vunpack.c.h.b16 %v431_v49  ;;  %s411_s9 = scalar_lea.vmem %s1310_s2, %s1319_s6 }
  0x4d   : > { %648 = vmatpush.bf16.msra.mxu1 %v931_v25  ;;  %661 = vmatpush.bf16.msra.mxu2 %v871_v26  ;;  %v906_v54 = vld [vmem:[%s1217_s30 + $0x80] sm:$0xf]  ;;  %v988_v56 = vld [vmem:[%s1217_s30 + $0x84] sm:$0xf0]  ;;  %v844_v58 = vld [vmem:[%s1217_s30 + $0x8] sm:$0xf0]  ;;  %v843_v62 = vor.u32 %v972_v53, %v842_v52 }
  0x4e   : > { %674 = vmatpush.bf16.msra.mxu3 %v935_v30  ;;  %v987_v59 = vld [vmem:[%s1217_s30 + $0x84] sm:$0xf]  ;;  %v908_v60 = vld [vmem:[%s1217_s30 + $0x88] sm:$0xf0]  ;;  %v907_v0 = vor.u32 %v988_v56, %v906_v54  ;;  %v847_v1 = vor.u32 %v971_v57, %v844_v58  ;;  %v467_v3 = vpack.c.b16 %v465_v61, %v465_v61  ;;  %v468_v4 = vpack.c.b16 %v466_v63, %v466_v63  ;;  %v692_v5 = vld [vmem:[%s411_s9] sm:$0x3] }
  0x4f   : > { %v911_v2 = vor.u32 %v987_v59, %v908_v60  ;;  %v694_v7 = vperm.slane %v692_v5, 0  ;;  %s839_s10 = sshll.u32 %s1319_s6, 3  ;;  %v695_v13 = vperm.slane %v692_v5, 1 }
  0x50   : > { %636 = vmatpush.bf16.msra.mxu0 %v859_v36  ;;  %s421_s18 = scalar_lea.vmem %s1311_s3, %s839_s10 }
  0x51   : > { %649 = vmatpush.bf16.msra.mxu1 %v923_v37  ;;  %662 = vmatpush.bf16.msra.mxu2 %v863_v38 }
  0x52   : > { %675 = vmatpush.bf16.msra.mxu3 %v927_v42 }
  0x54   : > { %637 = vmatpush.bf16.msra.mxu0 %v851_v48 }
  0x55   : > { %650 = vmatpush.bf16.msra.mxu1 %v915_v50  ;;  %663 = vmatpush.bf16.msra.mxu2 %v855_v51 }
  0x56   : > { %676 = vmatpush.bf16.msra.mxu3 %v919_v55 }
  0x58   : > { %638 = vmatpush.bf16.msra.mxu0 %v843_v62 }
  0x59   : > { %651 = vmatpush.bf16.msra.mxu1 %v907_v0  ;;  %664 = vmatpush.bf16.msra.mxu2 %v847_v1 }
  0x5a   : > { %677 = vmatpush.bf16.msra.mxu3 %v911_v2 }
  0x5b   : > { %639 = vmatmul.bf16.vlgmr.msra.gmra.mxu0 %v467_v3 }
  0x5c   : > { %652 = vmatmul.bf16.vlgmr.msra.gmra.mxu1 %v468_v4  ;;  %665 = vmatmul.bf16.vlgmr.msra.gmra.mxu2 %v467_v3 }
  0x5d   : > { %678 = vmatmul.bf16.vlgmr.msra.gmra.mxu3 %v468_v4 }
  0xd8   : > { %v640_v6 = vpop.f32.mrf.mxu0 }
  0xd9   : > { %v653_v8 = vpop.f32.mrf.mxu1 }
  0xda   : > { %v654_v9 = vadd.f32 %v653_v8, %v640_v6 }
  0xdc   : > { %v698_v10 = vadd.f32 %v694_v7, %v654_v9 }
  0xde   : > { %v700_v11 = vmax.f32 %v698_v10, 0.0 }
  0xdf   : > { %v666_v12 = vpop.f32.mrf.mxu2 }
  0xe0   : > { %702 = vst [vmem:[%s421_s18] sm:$0xff] %v700_v11  ;;  %v679_v14 = vpop.f32.mrf.mxu3  ;;  %v642_v15 = vpop.f32.mrf.mxu0 }
  0xe1   : > { %v680_v16 = vadd.f32 %v679_v14, %v666_v12  ;;  %v655_v17 = vpop.f32.mrf.mxu1 }
  0xe3   : > { %v699_v18 = vadd.f32 %v695_v13, %v680_v16 }
  0xe5   : > { %v701_v19 = vmax.f32 %v699_v18, 0.0 }
  0xe7   : > { %703 = vst [vmem:[%s421_s18 + $0x8] sm:$0xff] %v701_v19  ;;  %v668_v20 = vpop.f32.mrf.mxu2 }
  0xe8   : > { %v681_v21 = vpop.f32.mrf.mxu3 }
  0xe9 PF: > { %s13_s16 = sadd.s32 1, %s1081_s16   ;;  %s1312_s12 = smov %s1069_s13 }
  0xea   : > { %p10_p10 = scmp.ge.s32.totalorder %s13_s16, 6   ;;  %s1313_s13 = smov %s1138_s20 }
  0xeb   : > { %s1314_s14 = smov %s1077_s15  ;;  %s1315_s15 = smov %s1317_s17 }
  0xec   :  { %12 = sbr.rel (!%p10_p10) target bundleno = 3 (0x3), region = 119 }

// kernel: _lambda_.117
= control target key start
LH: loop header
LB: loop body
LE: loop exit
PB: predicated region body
PF: predicated region fallthrough
CT: control target
= control target key end

     0   :  { %s952_s12 = smov 0   ;;  %s954_s13 = smov 0   ;;  %s1035_s0 = inlined_call_operand.vmem [shape: bf16[8,1024], index: 0, kind: input, shape index: {}]   ;;  %s1036_s1 = inlined_call_operand.vmem [shape: bf16[1024,128], index: 1, kind: input, shape index: {}]   ;;  %s1037_s2 = inlined_call_operand.vmem [shape: f32[1,128], index: 2, kind: input, shape index: {}]   ;;  %s1038_s3 = inlined_call_operand.vmem [shape: f32[8,128], index: 3, kind: output, shape index: {}]  }
   0x1   :  { %s956_s14 = smov 0  }
   0x2 LB: > { %s25_s15 = sadd.s32 1, %s925_s13  ;;  %p711_p0 = scmp.ge.s32.totalorder %s929_s14, 1  ;;  %s929_s14 = sphi %s956_s14, %s13_s14   ;;  %s925_s13 = sphi %s954_s13, %s1040_s13   ;;  %s921_s12 = sphi %s952_s12, %s1039_s12  }
   0x3   : > { %p26_p1 = scmp.ge.s32.totalorder %s25_s15, 2  ;;  %p189_p2 = scmp.lt.s32.totalorder %s929_s14, 3 }
   0x5   : > { %s1042_s15 = smov (%p26_p1, %s25_s15), 0  ;;  %p190_p3 = pnand %p711_p0, %p189_p2 }
   0x6   : > { %s712_s16 = sshll.u32 (!%p190_p3), %s921_s12, 2  ;;  %s714_s17 = sshll.u32 (!%p190_p3), %s921_s12, 6 }
   0x7   : > { %193 = sbr.rel (%p190_p3) target bundleno = 205 (0xcd), region = 32  ;;  %p233_p4 = scmp.lt.s32.totalorder (!%p190_p3), %s712_s16, 7 }
   0x8   : > { %p241_p5 = scmp.lt.s32.totalorder (!%p190_p3), %s714_s17, 127  ;;  %p716_p6 = scmp.ne.s32.totalorder (!%p190_p3), %s921_s12, 0 }
   0xc   : > { %s1044_s16 = smov (!%p233_p4, %s712_s16), 7  ;;  %s1046_s17 = smov (!%p241_p5, %s714_s17), 127 }
   0xd   : > { %s713_s18 = sshll.u32 %s1044_s16, 2  ;;  %s715_s22 = sshll.u32 %s1046_s17, 2 }
   0xe   : > { %s977_s21 = scalar_lea.vmem %s1035_s0, %s713_s18  ;;  %s982_s25 = scalar_lea.vmem %s1036_s1, %s715_s22 }
   0xf   : > { %262 = sbr.rel (%p716_p6) target bundleno = 22 (0x16), region = 36 }
  0x14   : > { %v931_v0 = vmov 0.0  }
  0x15   : > { %263 = vst [vmem:[#allocation2] sm:$0xff] %v931_v0 }
  0x16 PF: > { %v856_v1 = vld [vmem:[%s982_s25 + $0x38] sm:$0xff]  ;;  %v855_v5 = vld [vmem:[%s982_s25 + $0x30] sm:$0xff]  ;;  %v854_v9 = vld [vmem:[%s982_s25 + $0x28] sm:$0xff]  ;;  %p845_p7 = scmp.ne.s32.totalorder %s921_s12, 1 }
  0x17   : > { %v864_v2 = vld [vmem:[%s982_s25 + $0x78] sm:$0xff]  ;;  %537 = vmatpush.bf16.msra.mxu0 %v856_v1  ;;  %v863_v6 = vld [vmem:[%s982_s25 + $0x70] sm:$0xff]  ;;  %v862_v10 = vld [vmem:[%s982_s25 + $0x68] sm:$0xff] }
  0x18   : > { %v872_v3 = vld [vmem:[%s982_s25 + $0xb8] sm:$0xff]  ;;  %550 = vmatpush.bf16.msra.mxu1 %v864_v2  ;;  %v871_v7 = vld [vmem:[%s982_s25 + $0xb0] sm:$0xff]  ;;  %v870_v11 = vld [vmem:[%s982_s25 + $0xa8] sm:$0xff] }
  0x19   : > { %v880_v4 = vld [vmem:[%s982_s25 + $0xf8] sm:$0xff]  ;;  %563 = vmatpush.bf16.msra.mxu2 %v872_v3  ;;  %v879_v8 = vld [vmem:[%s982_s25 + $0xf0] sm:$0xff]  ;;  %v878_v12 = vld [vmem:[%s982_s25 + $0xe8] sm:$0xff] }
  0x1a   : > { %576 = vmatpush.bf16.msra.mxu3 %v880_v4  ;;  %v853_v13 = vld [vmem:[%s982_s25 + $0x20] sm:$0xff]  ;;  %v852_v17 = vld [vmem:[%s982_s25 + $0x18] sm:$0xff]  ;;  %v851_v21 = vld [vmem:[%s982_s25 + $0x10] sm:$0xff] }
  0x1b   : > { %538 = vmatpush.bf16.msra.mxu0 %v855_v5  ;;  %v861_v14 = vld [vmem:[%s982_s25 + $0x60] sm:$0xff]  ;;  %v860_v18 = vld [vmem:[%s982_s25 + $0x58] sm:$0xff]  ;;  %v859_v22 = vld [vmem:[%s982_s25 + $0x50] sm:$0xff] }
  0x1c   : > { %551 = vmatpush.bf16.msra.mxu1 %v863_v6  ;;  %v869_v15 = vld [vmem:[%s982_s25 + $0xa0] sm:$0xff]  ;;  %v868_v19 = vld [vmem:[%s982_s25 + $0x98] sm:$0xff]  ;;  %v867_v23 = vld [vmem:[%s982_s25 + $0x90] sm:$0xff] }
  0x1d   : > { %564 = vmatpush.bf16.msra.mxu2 %v871_v7  ;;  %v877_v16 = vld [vmem:[%s982_s25 + $0xe0] sm:$0xff]  ;;  %v876_v20 = vld [vmem:[%s982_s25 + $0xd8] sm:$0xff]  ;;  %v875_v24 = vld [vmem:[%s982_s25 + $0xd0] sm:$0xff] }
  0x1e   : > { %577 = vmatpush.bf16.msra.mxu3 %v879_v8  ;;  %v850_v25 = vld [vmem:[%s982_s25 + $0x8] sm:$0xff]  ;;  %v265_v27 = vld [vmem:[%s977_s21] sm:$0xff] }
  0x1f   : > { %539 = vmatpush.bf16.msra.mxu0 %v854_v9  ;;  %v858_v26 = vld [vmem:[%s982_s25 + $0x48] sm:$0xff]  ;;  %v333_v31 = vunpack.c.l.b16 %v265_v27  ;;  %v334_v32 = vunpack.c.h.b16 %v265_v27  ;;  %v849_v33 = vld [vmem:[%s982_s25] sm:$0xff] }
  0x20   : > { %552 = vmatpush.bf16.msra.mxu1 %v862_v10  ;;  %v866_v28 = vld [vmem:[%s982_s25 + $0x88] sm:$0xff]  ;;  %v857_v34 = vld [vmem:[%s982_s25 + $0x40] sm:$0xff] }
  0x21   : > { %565 = vmatpush.bf16.msra.mxu2 %v870_v11  ;;  %v874_v29 = vld [vmem:[%s982_s25 + $0xc8] sm:$0xff]  ;;  %v865_v37 = vld [vmem:[%s982_s25 + $0x80] sm:$0xff]  ;;  %v337_v39 = vpack.c.b16 %v333_v31, %v333_v31  ;;  %v338_v40 = vpack.c.b16 %v334_v32, %v334_v32 }
  0x22   : > { %578 = vmatpush.bf16.msra.mxu3 %v878_v12  ;;  %v266_v30 = vld [vmem:[%s977_s21 + $0x8] sm:$0xff]  ;;  %v873_v38 = vld [vmem:[%s982_s25 + $0xc0] sm:$0xff] }
  0x23   : > { %540 = vmatpush.bf16.msra.mxu0 %v853_v13  ;;  %v335_v35 = vunpack.c.l.b16 %v266_v30  ;;  %v336_v36 = vunpack.c.h.b16 %v266_v30  ;;  %v264_v51 = vld [vmem:[#allocation2] sm:$0xff] }
  0x24   : > { %553 = vmatpush.bf16.msra.mxu1 %v861_v14 }
  0x25   : > { %566 = vmatpush.bf16.msra.mxu2 %v869_v15  ;;  %v339_v41 = vpack.c.b16 %v335_v35, %v335_v35  ;;  %v340_v42 = vpack.c.b16 %v336_v36, %v336_v36 }
  0x26   : > { %579 = vmatpush.bf16.msra.mxu3 %v877_v16 }
  0x27   : > { %541 = vmatpush.bf16.msra.mxu0 %v852_v17 }
  0x28   : > { %554 = vmatpush.bf16.msra.mxu1 %v860_v18 }
  0x29   : > { %567 = vmatpush.bf16.msra.mxu2 %v868_v19 }
  0x2a   : > { %580 = vmatpush.bf16.msra.mxu3 %v876_v20 }
  0x2b   : > { %542 = vmatpush.bf16.msra.mxu0 %v851_v21 }
  0x2c   : > { %555 = vmatpush.bf16.msra.mxu1 %v859_v22 }
  0x2d   : > { %568 = vmatpush.bf16.msra.mxu2 %v867_v23 }
  0x2e   : > { %581 = vmatpush.bf16.msra.mxu3 %v875_v24 }
  0x2f   : > { %543 = vmatpush.bf16.msra.mxu0 %v850_v25 }
  0x30   : > { %556 = vmatpush.bf16.msra.mxu1 %v858_v26 }
  0x31   : > { %569 = vmatpush.bf16.msra.mxu2 %v866_v28 }
  0x32   : > { %582 = vmatpush.bf16.msra.mxu3 %v874_v29 }
  0x33   : > { %544 = vmatpush.bf16.msra.mxu0 %v849_v33 }
  0x34   : > { %557 = vmatpush.bf16.msra.mxu1 %v857_v34 }
  0x35   : > { %570 = vmatpush.bf16.msra.mxu2 %v865_v37 }
  0x36   : > { %583 = vmatpush.bf16.msra.mxu3 %v873_v38  ;;  %545 = vmatmul.bf16.vlgmr.msra.gmra.mxu0 %v337_v39 }
  0x37   : > { %558 = vmatmul.bf16.vlgmr.msra.gmra.mxu1 %v338_v40 }
  0x38   : > { %571 = vmatmul.bf16.vlgmr.msra.gmra.mxu2 %v339_v41 }
  0x39   : > { %584 = vmatmul.bf16.vlgmr.msra.gmra.mxu3 %v340_v42 }
  0xb3   : > { %v546_v43 = vpop.f32.mrf.mxu0 }
  0xb4   : > { %v559_v44 = vpop.f32.mrf.mxu1 }
  0xb5   : > { %v560_v45 = vadd.f32 %v559_v44, %v546_v43 }
  0xbb   : > { %v572_v46 = vpop.f32.mrf.mxu2  ;;  %v548_v49 = vpop.f32.mrf.mxu0 }
  0xbc   : > { %v585_v47 = vpop.f32.mrf.mxu3  ;;  %v573_v48 = vadd.f32 %v572_v46, %v560_v45  ;;  %v561_v50 = vpop.f32.mrf.mxu1 }
  0xbe   : > { %v586_v52 = vadd.f32 %v585_v47, %v573_v48 }
  0xc0   : > { %v589_v53 = vadd.f32 %v586_v52, %v264_v51  ;;  %594 = sbr.rel (%p845_p7) target bundleno = 205 (0xcd), region = 40 }
  0xc2   : > { %590 = vst [vmem:[#allocation2] sm:$0xff] %v589_v53 }
  0xc3   : > { %v574_v54 = vpop.f32.mrf.mxu2 }
  0xc4   : > { %v587_v55 = vpop.f32.mrf.mxu3 }
  0xc5   : > { %v906_v57 = vld [vmem:[%s1037_s2] ss:$0 sm:$0xff] }
  0xc9   : > { %v595_v56 = vld [vmem:[#allocation2] sm:$0xff] }
  0xca   : > { %v600_v58 = vadd.f32 %v906_v57, %v595_v56 }
  0xcc   : > { %601 = vst [vmem:[%s1038_s3] sm:$0xff] %v600_v58 }
  0xcd PF: > { %s13_s14 = sadd.s32 1, %s929_s14   ;;  %s1039_s12 = smov %s925_s13 }
  0xce   : > { %p10_p8 = scmp.ge.s32.totalorder %s13_s14, 4   ;;  %s1040_s13 = smov %s1042_s15 }
  0xd0   :  { %12 = sbr.rel (!%p10_p8) target bundleno = 2 (0x2), region = 76 }

</bundles_post_ra>
